<compile_context>
chip_gen: v6e
topology: v6e:2x2x1
jax: 0.10.0
libtpu: 0.0.40
codegen_flags: <defaults>
</compile_context>

<pallas_src>
import functools

import jax
import jax.numpy as jnp
from jax.experimental import pallas as pl
from jax.experimental.pallas import tpu as pltpu

D_IN = 784        # 28 * 28
D_IN_PAD = 896    # 7 * 128, lane-aligned K for the first matmul
D_H1, D_H2, D_H3 = 1024, 512, 256


def _round_up(a, m):
    return (a + m - 1) // m * m


def _chip_config():
    """Static per-process chip detection for dtype / tiling / VMEM decisions."""
    try:
        kind = jax.devices()[0].device_kind.lower()
    except Exception:
        kind = ""
    is_v7x = ("v7" in kind) or ("7x" in kind)
    is_v6 = "v6" in kind
    # bf16 elementwise (bias + ReLU) only where the VPU supports bf16 natively.
    use_bf16_ew = is_v6 or is_v7x
    # v7x: 64 MiB physical VMEM per TensorCore; v5e/v6e: 128 MiB.
    vmem_limit = (48 << 20) if is_v7x else (64 << 20)
    return use_bf16_ew, is_v7x, vmem_limit


def _disc_kernel(x_ref, w1_ref, b1_ref, w2_ref, b2_ref, w3_ref, b3_ref,
                 w4_ref, b4_ref, o_ref, *, ew_dtype):
    # x_ref: (TB, 896) bf16 batch tile. Weights stay VMEM-resident across the
    # grid (constant index_map). MXU matmuls accumulate in f32; the bias-add /
    # ReLU run in ew_dtype (bf16 on v6e/v7x, f32 on v5e).
    x = x_ref[...]

    def dense_relu(h, w_ref, b_ref, recast_for_mxu):
        acc = jnp.dot(h, w_ref[...], preferred_element_type=jnp.float32)
        act = jnp.maximum(acc.astype(ew_dtype) + b_ref[...], 0)
        return act.astype(jnp.bfloat16) if recast_for_mxu else act

    # Linear(784->1024)+ReLU, Linear(1024->512)+ReLU, Linear(512->256)+ReLU.
    # (Dropout = identity in eval mode.)
    h = dense_relu(x, w1_ref, b1_ref, True)
    h = dense_relu(h, w2_ref, b2_ref, True)
    h = dense_relu(h, w3_ref, b3_ref, False)

    # Linear(256 -> 1): out dim is 1, so use an f32 lane reduction instead of
    # a degenerate (N=1) MXU matmul. w4_ref is (1, 256) f32; b4 lives in SMEM.
    logit = jnp.sum(h.astype(jnp.float32) * w4_ref[...], axis=-1,
                    keepdims=True) + b4_ref[0, 0]

    # Sigmoid: exp on the EUP; exact reciprocal (EUP slack makes it free).
    o_ref[...] = pl.reciprocal(1.0 + jnp.exp(-logit), approx=False)


def init_params(key):
    """Deterministic parameter init matching the PyTorch module's shapes.

    PyTorch nn.Linear stores weight as (out, in); we keep the transposed
    (in, out) layout for the kernel. Biases are kept 2-D for TPU layout.
    Master params stay in f32; prepare_params casts for the kernel.
    """
    dims = [(D_IN, D_H1), (D_H1, D_H2), (D_H2, D_H3), (D_H3, 1)]
    params = []
    for fan_in, fan_out in dims:
        kw, kb, key = jax.random.split(key, 3)
        bound = 1.0 / jnp.sqrt(fan_in)
        w = jax.random.uniform(kw, (fan_in, fan_out), jnp.float32, -bound, bound)
        b = jax.random.uniform(kb, (1, fan_out), jnp.float32, -bound, bound)
        params.append((w, b))
    return params


def prepare_params(params):
    """One-time cast/pad of weights into the kernel's layout (hoisted out of
    the per-call wrapper per the perf review)."""
    use_bf16_ew, _, _ = _chip_config()
    ew_dtype = jnp.bfloat16 if use_bf16_ew else jnp.float32
    (w1, b1), (w2, b2), (w3, b3), (w4, b4) = params
    return dict(
        w1=jnp.pad(w1.astype(jnp.bfloat16), ((0, D_IN_PAD - D_IN), (0, 0))),
        b1=b1.reshape(1, D_H1).astype(ew_dtype),
        w2=w2.astype(jnp.bfloat16),
        b2=b2.reshape(1, D_H2).astype(ew_dtype),
        w3=w3.astype(jnp.bfloat16),
        b3=b3.reshape(1, D_H3).astype(ew_dtype),
        w4=w4.reshape(1, D_H3).astype(jnp.float32),   # (1, 256) lane reduce
        b4=b4.reshape(1, 1).astype(jnp.float32),      # scalar bias -> SMEM
    )


def discriminator_forward(x, prepped, *, block_b=512):
    use_bf16_ew, is_v7x, vmem_limit = _chip_config()
    ew_dtype = jnp.bfloat16 if use_bf16_ew else jnp.float32

    B = x.shape[0]
    b_pad8 = _round_up(max(B, 1), 8)

    # Tile selection: biggest tile <= block_b (amortizes ~0.35 us per-step
    # overhead). On v7x, force >= 2 and an even number of grid steps so the
    # "parallel" batch axis keeps both TensorCores busy and balanced.
    steps = -(-b_pad8 // block_b)
    if is_v7x:
        if steps == 1 and b_pad8 > 8:
            steps = 2
        elif steps > 1 and steps % 2 == 1:
            steps += 1
    tb = _round_up(-(-b_pad8 // steps), 8)
    b_pad = tb * steps

    # Lane-align K: zero-pad x columns 784 -> 896 (w1 rows are pre-padded).
    x_p = jnp.pad(x.reshape(B, D_IN).astype(jnp.bfloat16),
                  ((0, b_pad - B), (0, D_IN_PAD - D_IN)))

    # Weights/biases: full block, same block index every grid step -> resident.
    def _const(shape):
        return pl.BlockSpec(shape, lambda i: (0, 0))

    in_specs = [
        pl.BlockSpec((tb, D_IN_PAD), lambda i: (i, 0)),        # x batch tile
        _const((D_IN_PAD, D_H1)), _const((1, D_H1)),
        _const((D_H1, D_H2)),     _const((1, D_H2)),
        _const((D_H2, D_H3)),     _const((1, D_H3)),
        _const((1, D_H3)),                                      # w4 row
        pl.BlockSpec(memory_space=pltpu.MemorySpace.SMEM),      # b4 scalar
    ]
    out_specs = pl.BlockSpec((tb, 1), lambda i: (i, 0))

    args = (x_p, prepped["w1"], prepped["b1"], prepped["w2"], prepped["b2"],
            prepped["w3"], prepped["b3"], prepped["w4"], prepped["b4"])

    flops = 2 * b_pad * (D_IN_PAD * D_H1 + D_H1 * D_H2 + D_H2 * D_H3 + D_H3)
    bytes_accessed = sum(int(a.size) * a.dtype.itemsize for a in args) + b_pad * 4

    out = pl.pallas_call(
        functools.partial(_disc_kernel, ew_dtype=ew_dtype),
        out_shape=jax.ShapeDtypeStruct((b_pad, 1), jnp.float32),
        grid_spec=pltpu.PrefetchScalarGridSpec(
            num_scalar_prefetch=0,
            grid=(steps,),
            in_specs=in_specs,
            out_specs=out_specs,
        ),
        compiler_params=pltpu.CompilerParams(
            dimension_semantics=("parallel",),
            vmem_limit_bytes=vmem_limit,
        ),
        cost_estimate=pl.CostEstimate(
            flops=flops, transcendentals=b_pad, bytes_accessed=bytes_accessed),
    )(*args)

    return out[:B]


if __name__ == "__main__":
    key = jax.random.PRNGKey(0)
    k_x, k_p = jax.random.split(key)

    # Small deterministic input consistent with the module: MNIST-like NCHW.
    B = 2
    x = jax.random.normal(k_x, (B, 1, 28, 28), dtype=jnp.float32)

    params = init_params(k_p)
    prepped = prepare_params(params)

    out = discriminator_forward(x, prepped)
    out = jax.block_until_ready(out)

    # Pure-JAX reference mirroring the kernel's precision recipe
    # (bf16 MXU inputs, f32 accumulation, ew_dtype bias/ReLU).
    use_bf16_ew, _, _ = _chip_config()
    ew_dtype = jnp.bfloat16 if use_bf16_ew else jnp.float32

    def ref(x, params, ew_dtype):
        (w1, b1), (w2, b2), (w3, b3), (w4, b4) = params
        h = x.reshape(x.shape[0], D_IN).astype(jnp.bfloat16)
        for idx, (w, b) in enumerate(((w1, b1), (w2, b2), (w3, b3))):
            acc = jnp.dot(h, w.astype(jnp.bfloat16),
                          preferred_element_type=jnp.float32)
            h = jnp.maximum(acc.astype(ew_dtype) + b.astype(ew_dtype), 0)
            if idx < 2:
                h = h.astype(jnp.bfloat16)
        logit = jnp.sum(h.astype(jnp.float32) * w4.reshape(1, D_H3),
                        axis=-1, keepdims=True) + b4.reshape(1, 1)
        return jax.nn.sigmoid(logit)

    ref_out = ref(x, params, ew_dtype)
    assert out.shape == (B, 1)
    # Tolerance covers MXU-vs-XLA accumulation order + bf16 rounding.
    assert jnp.allclose(out, ref_out, atol=5e-3, rtol=0.0), (
        jnp.max(jnp.abs(out - ref_out)))

    print("KERNEL_OK")
</pallas_src>

<mosaic_0001>
module attributes {stable_mosaic.version = 11 : i64} {
  func.func @_disc_kernel(%arg0: i32, %arg1: memref<8x896xbf16, #tpu.memory_space<vmem>>, %arg2: memref<896x1024xbf16, #tpu.memory_space<vmem>>, %arg3: memref<1x1024xf32, #tpu.memory_space<vmem>>, %arg4: memref<1024x512xbf16, #tpu.memory_space<vmem>>, %arg5: memref<1x512xf32, #tpu.memory_space<vmem>>, %arg6: memref<512x256xbf16, #tpu.memory_space<vmem>>, %arg7: memref<1x256xf32, #tpu.memory_space<vmem>>, %arg8: memref<1x256xf32, #tpu.memory_space<vmem>>, %arg9: memref<1x1xf32, #tpu.memory_space<smem>>, %arg10: memref<8x1xf32, #tpu.memory_space<vmem>>) attributes {dimension_semantics = [#tpu.dimension_semantics<parallel>], iteration_bounds = array<i64: 1>, scalar_prefetch = 0 : i64, scratch_operands = 0 : i64, tpu.core_type = #tpu.core_type<tc>, window_params = [{transform_indices = @transform_0, window_bounds = array<i64: 8, 896>}, {pipeline_mode = #tpu.pipeline_mode<synchronous>, transform_indices = @transform_1, window_bounds = array<i64: 896, 1024>}, {pipeline_mode = #tpu.pipeline_mode<synchronous>, transform_indices = @transform_2, window_bounds = array<i64: 1, 1024>}, {pipeline_mode = #tpu.pipeline_mode<synchronous>, transform_indices = @transform_3, window_bounds = array<i64: 1024, 512>}, {pipeline_mode = #tpu.pipeline_mode<synchronous>, transform_indices = @transform_4, window_bounds = array<i64: 1, 512>}, {pipeline_mode = #tpu.pipeline_mode<synchronous>, transform_indices = @transform_5, window_bounds = array<i64: 512, 256>}, {pipeline_mode = #tpu.pipeline_mode<synchronous>, transform_indices = @transform_6, window_bounds = array<i64: 1, 256>}, {pipeline_mode = #tpu.pipeline_mode<synchronous>, transform_indices = @transform_7, window_bounds = array<i64: 1, 256>}, {transform_indices = @transform_8, window_bounds = array<i64: 1, 1>}, {transform_indices = @transform_9, window_bounds = array<i64: 8, 1>}]} {
    %c0 = arith.constant 0 : index
    %c0_0 = arith.constant 0 : index
    %0 = vector.load %arg1[%c0, %c0_0] : memref<8x896xbf16, #tpu.memory_space<vmem>>, vector<8x896xbf16>
    %c0_1 = arith.constant 0 : index
    %c0_2 = arith.constant 0 : index
    %1 = vector.load %arg2[%c0_1, %c0_2] : memref<896x1024xbf16, #tpu.memory_space<vmem>>, vector<896x1024xbf16>
    %cst = arith.constant dense<0.000000e+00> : vector<8x1024xf32>
    %2 = tpu.matmul %0, %1, %cst {dimension_numbers = #tpu.dot_dimension_numbers<[1], [0], [0], [1], [0, 0, 1, 1], [], []>} : vector<8x896xbf16>, vector<896x1024xbf16>, vector<8x1024xf32> -> vector<8x1024xf32>
    %c0_3 = arith.constant 0 : index
    %c0_4 = arith.constant 0 : index
    %3 = vector.load %arg3[%c0_3, %c0_4] : memref<1x1024xf32, #tpu.memory_space<vmem>>, vector<1x1024xf32>
    %4 = vector.broadcast %3 : vector<1x1024xf32> to vector<8x1024xf32>
    %5 = arith.addf %2, %4 : vector<8x1024xf32>
    %cst_5 = arith.constant 0.000000e+00 : f32
    %6 = vector.broadcast %cst_5 : f32 to vector<8x1024xf32>
    %7 = arith.maximumf %5, %6 : vector<8x1024xf32>
    %8 = arith.truncf %7 : vector<8x1024xf32> to vector<8x1024xbf16>
    %c0_6 = arith.constant 0 : index
    %c0_7 = arith.constant 0 : index
    %9 = vector.load %arg4[%c0_6, %c0_7] : memref<1024x512xbf16, #tpu.memory_space<vmem>>, vector<1024x512xbf16>
    %cst_8 = arith.constant dense<0.000000e+00> : vector<8x512xf32>
    %10 = tpu.matmul %8, %9, %cst_8 {dimension_numbers = #tpu.dot_dimension_numbers<[1], [0], [0], [1], [0, 0, 1, 1], [], []>} : vector<8x1024xbf16>, vector<1024x512xbf16>, vector<8x512xf32> -> vector<8x512xf32>
    %c0_9 = arith.constant 0 : index
    %c0_10 = arith.constant 0 : index
    %11 = vector.load %arg5[%c0_9, %c0_10] : memref<1x512xf32, #tpu.memory_space<vmem>>, vector<1x512xf32>
    %12 = vector.broadcast %11 : vector<1x512xf32> to vector<8x512xf32>
    %13 = arith.addf %10, %12 : vector<8x512xf32>
    %cst_11 = arith.constant 0.000000e+00 : f32
    %14 = vector.broadcast %cst_11 : f32 to vector<8x512xf32>
    %15 = arith.maximumf %13, %14 : vector<8x512xf32>
    %16 = arith.truncf %15 : vector<8x512xf32> to vector<8x512xbf16>
    %c0_12 = arith.constant 0 : index
    %c0_13 = arith.constant 0 : index
    %17 = vector.load %arg6[%c0_12, %c0_13] : memref<512x256xbf16, #tpu.memory_space<vmem>>, vector<512x256xbf16>
    %cst_14 = arith.constant dense<0.000000e+00> : vector<8x256xf32>
    %18 = tpu.matmul %16, %17, %cst_14 {dimension_numbers = #tpu.dot_dimension_numbers<[1], [0], [0], [1], [0, 0, 1, 1], [], []>} : vector<8x512xbf16>, vector<512x256xbf16>, vector<8x256xf32> -> vector<8x256xf32>
    %c0_15 = arith.constant 0 : index
    %c0_16 = arith.constant 0 : index
    %19 = vector.load %arg7[%c0_15, %c0_16] : memref<1x256xf32, #tpu.memory_space<vmem>>, vector<1x256xf32>
    %20 = vector.broadcast %19 : vector<1x256xf32> to vector<8x256xf32>
    %21 = arith.addf %18, %20 : vector<8x256xf32>
    %cst_17 = arith.constant 0.000000e+00 : f32
    %22 = vector.broadcast %cst_17 : f32 to vector<8x256xf32>
    %23 = arith.maximumf %21, %22 : vector<8x256xf32>
    %c0_18 = arith.constant 0 : index
    %c0_19 = arith.constant 0 : index
    %24 = vector.load %arg8[%c0_18, %c0_19] : memref<1x256xf32, #tpu.memory_space<vmem>>, vector<1x256xf32>
    %25 = vector.broadcast %24 : vector<1x256xf32> to vector<8x256xf32>
    %26 = arith.mulf %23, %25 : vector<8x256xf32>
    %cst_20 = arith.constant dense<0.000000e+00> : vector<8xf32>
    %27 = vector.multi_reduction <add>, %26, %cst_20 [1] : vector<8x256xf32> to vector<8xf32>
    %28 = vector.shape_cast %27 : vector<8xf32> to vector<8x1xf32>
    %c0_21 = arith.constant 0 : index
    %c0_22 = arith.constant 0 : index
    %29 = memref.load %arg9[%c0_21, %c0_22] : memref<1x1xf32, #tpu.memory_space<smem>>
    %30 = vector.broadcast %29 : f32 to vector<8x1xf32>
    %31 = arith.addf %28, %30 : vector<8x1xf32>
    %cst_23 = arith.constant 0.000000e+00 : f32
    %32 = vector.broadcast %cst_23 : f32 to vector<8x1xf32>
    %33 = arith.subf %32, %31 : vector<8x1xf32>
    %34 = math.exp %33 : vector<8x1xf32>
    %cst_24 = arith.constant 1.000000e+00 : f32
    %35 = vector.broadcast %cst_24 : f32 to vector<8x1xf32>
    %36 = arith.addf %35, %34 : vector<8x1xf32>
    %37 = tpu.reciprocal %36 : vector<8x1xf32> -> vector<8x1xf32>
    %c0_25 = arith.constant 0 : index
    %c0_26 = arith.constant 0 : index
    %38 = vector.load %arg10[%c0_25, %c0_26] : memref<8x1xf32, #tpu.memory_space<vmem>>, vector<8x1xf32>
    tpu.vector_store %arg10[%c0_25, %c0_26], %37 {strides = array<i32>} : memref<8x1xf32, #tpu.memory_space<vmem>>, vector<8x1xf32>,
    return
  }
  func.func @transform_0(%arg0: i32) -> (i32, i32) {
    %c0_i32 = arith.constant 0 : i32
    %c0_i32_0 = arith.constant 0 : i32
    return %arg0, %c0_i32 : i32, i32
  }
  func.func @transform_1(%arg0: i32) -> (i32, i32) {
    %c0_i32 = arith.constant 0 : i32
    %c0_i32_0 = arith.constant 0 : i32
    %c0_i32_1 = arith.constant 0 : i32
    return %c0_i32, %c0_i32_0 : i32, i32
  }
  func.func @transform_2(%arg0: i32) -> (i32, i32) {
    %c0_i32 = arith.constant 0 : i32
    %c0_i32_0 = arith.constant 0 : i32
    %c0_i32_1 = arith.constant 0 : i32
    return %c0_i32, %c0_i32_0 : i32, i32
  }
  func.func @transform_3(%arg0: i32) -> (i32, i32) {
    %c0_i32 = arith.constant 0 : i32
    %c0_i32_0 = arith.constant 0 : i32
    %c0_i32_1 = arith.constant 0 : i32
    return %c0_i32, %c0_i32_0 : i32, i32
  }
  func.func @transform_4(%arg0: i32) -> (i32, i32) {
    %c0_i32 = arith.constant 0 : i32
    %c0_i32_0 = arith.constant 0 : i32
    %c0_i32_1 = arith.constant 0 : i32
    return %c0_i32, %c0_i32_0 : i32, i32
  }
  func.func @transform_5(%arg0: i32) -> (i32, i32) {
    %c0_i32 = arith.constant 0 : i32
    %c0_i32_0 = arith.constant 0 : i32
    %c0_i32_1 = arith.constant 0 : i32
    return %c0_i32, %c0_i32_0 : i32, i32
  }
  func.func @transform_6(%arg0: i32) -> (i32, i32) {
    %c0_i32 = arith.constant 0 : i32
    %c0_i32_0 = arith.constant 0 : i32
    %c0_i32_1 = arith.constant 0 : i32
    return %c0_i32, %c0_i32_0 : i32, i32
  }
  func.func @transform_7(%arg0: i32) -> (i32, i32) {
    %c0_i32 = arith.constant 0 : i32
    %c0_i32_0 = arith.constant 0 : i32
    %c0_i32_1 = arith.constant 0 : i32
    return %c0_i32, %c0_i32_0 : i32, i32
  }
  func.func @transform_8(%arg0: i32) -> (i32, i32) {
    %c0_i32 = arith.constant 0 : i32
    %c0_i32_0 = arith.constant 0 : i32
    %c0_i32_1 = arith.constant 0 : i32
    return %c0_i32, %c0_i32_0 : i32, i32
  }
  func.func @transform_9(%arg0: i32) -> (i32, i32) {
    %c0_i32 = arith.constant 0 : i32
    %c0_i32_0 = arith.constant 0 : i32
    return %arg0, %c0_i32 : i32, i32
  }
}

</mosaic_0001>

<bundles_post_ra>
// kernel: tpu_custom_call.1
= control target key start
LH: loop header
LB: loop body
LE: loop exit
PB: predicated region body
PF: predicated region fallthrough
CT: control target
= control target key end

     0   :  { %15 = vsyncpa [#allocation4], 0  ;;  %s7737_s0 = inlined_call_operand.hbm [shape: bf16[8,896], index: 0, kind: input, shape index: {}]   ;;  %s7738_s1 = inlined_call_operand.hbm [shape: bf16[896,1024], index: 1, kind: input, shape index: {}]   ;;  %s7739_s2 = inlined_call_operand.hbm [shape: f32[1,1024], index: 2, kind: input, shape index: {}]   ;;  %s7740_s3 = inlined_call_operand.hbm [shape: bf16[1024,512], index: 3, kind: input, shape index: {}]   ;;  %s7741_s4 = inlined_call_operand.hbm [shape: f32[1,512], index: 4, kind: input, shape index: {}]   ;;  %s7742_s5 = inlined_call_operand.hbm [shape: bf16[512,256], index: 5, kind: input, shape index: {}]   ;;  %s7743_s6 = inlined_call_operand.hbm [shape: f32[1,256], index: 6, kind: input, shape index: {}]   ;;  %s7744_s7 = inlined_call_operand.hbm [shape: f32[1,256], index: 7, kind: input, shape index: {}]   ;;  %s7745_s8 = inlined_call_operand.<no memory space> [shape: f32[1,1], index: 8, kind: input, shape index: {}]   ;;  %s7746_s9 = inlined_call_operand.vmem [shape: f32[8,1], index: 9, kind: output, shape index: {}]  }
   0x1   :  { %16 = vsyncpa [#allocation6], 0 }
   0x2   :  { %17 = vsyncpa [#allocation9], 0 }
   0x3   :  { %18 = vsyncpa [#allocation12], 0 }
   0x4   :  { %19 = vsyncpa [#allocation15], 0  ;;  %s7428_s30 = smov [#allocation5]  }
   0x5   :  { %s35_s10 = sshll.u32 %s7428_s30, 4  ;;  %s36_s10 = int_to_ptr.vmem [resolvable:$true] %s35_s10 }
   0x6   :  { %s7266_s11 = scalar_lea.vmem %s36_s10, 57344  ;;  %p7271_p1 = scmp.lt.s32.totalorder %s36_s10, %s36_s10 }
   0x7   :  { %p7267_p0 = scmp.ne.s32.totalorder %s36_s10, %s7266_s11  ;;  %p7272_p2 = scmp.lt.s32.totalorder %s7266_s11, %s7266_s11 }
   0x9   :  { %p7273_p3 = por %p7272_p2, %p7271_p1 }
   0xb   :  { %p7274_p4 = pnand %p7273_p3, %p7267_p0 }
   0xd   :  { %7277 = shalt.err (!%p7274_p4)
}
   0xe   :  { %s7429_s12 = smov 512   ;;  %s7430_s13 = smov 32  }
   0xf   :  { %41 = dma.hbm_to_vmem [thread:$0]  %s7738_s1, 57344, %s36_s10, [#allocation6], %s7429_s12, %s7429_s12, %s7430_s13  }
  0x10   :  { %s7431_s16 = smov [#allocation8]  }
  0x11   :  { %s57_s17 = sshll.u32 %s7431_s16, 4  ;;  %s58_s17 = int_to_ptr.vmem [resolvable:$true] %s57_s17 }
  0x12   :  { %s7286_s18 = scalar_lea.vmem %s58_s17, 32768  ;;  %p7291_p6 = scmp.lt.s32.totalorder %s58_s17, %s58_s17 }
  0x13   :  { %p7287_p5 = scmp.ne.s32.totalorder %s58_s17, %s7286_s18  ;;  %p7292_p7 = scmp.lt.s32.totalorder %s7286_s18, %s7286_s18 }
  0x15   :  { %p7293_p8 = por %p7292_p7, %p7291_p6 }
  0x17   :  { %p7294_p9 = pnand %p7293_p8, %p7287_p5 }
  0x19   :  { %7297 = shalt.err (!%p7294_p9)
}
  0x1a   :  { %s7432_s19 = smov 256   ;;  %s7433_s20 = smov 16  }
  0x1b   :  { %63 = dma.hbm_to_vmem [thread:$0]  %s7740_s3, 32768, %s58_s17, [#allocation9], %s7432_s19, %s7432_s19, %s7433_s20  }
  0x1c   :  { %s7434_s23 = smov [#allocation11]  }
  0x1d   :  { %s79_s24 = sshll.u32 %s7434_s23, 4  ;;  %s80_s24 = int_to_ptr.vmem [resolvable:$true] %s79_s24 }
  0x1e   :  { %s7306_s1 = scalar_lea.vmem %s80_s24, 8192  ;;  %p7311_p11 = scmp.lt.s32.totalorder %s80_s24, %s80_s24 }
  0x1f   :  { %p7307_p10 = scmp.ne.s32.totalorder %s80_s24, %s7306_s1  ;;  %p7312_p12 = scmp.lt.s32.totalorder %s7306_s1, %s7306_s1 }
  0x21   :  { %p7313_p13 = por %p7312_p12, %p7311_p11 }
  0x23   :  { %p7314_p0 = pnand %p7313_p13, %p7307_p10 }
  0x25   :  { %7317 = shalt.err (!%p7314_p0)
}
  0x26   :  { %s7435_s25 = smov 128   ;;  %s7436_s26 = smov 8  }
  0x27   :  { %85 = dma.hbm_to_vmem [thread:$0]  %s7742_s5, 8192, %s80_s24, [#allocation12], %s7435_s25, %s7435_s25, %s7436_s26  }
  0x28   :  { %s7437_s29 = smov [#allocation3]   ;;  %s7438_s3 = smov [#allocation7]  }
  0x29   :  { %s26_s30 = sshll.u32 %s7437_s29, 4  ;;  %s48_s10 = sshll.u32 %s7438_s3, 4  ;;  %s27_s30 = int_to_ptr.vmem [resolvable:$true] %s26_s30  ;;  %s49_s10 = int_to_ptr.vmem [resolvable:$true] %s48_s10 }
  0x2a   :  { %s7326_s11 = scalar_lea.vmem %s27_s30, 448  ;;  %p7331_p2 = scmp.lt.s32.totalorder %s27_s30, %s27_s30 }
  0x2b   :  { %p7327_p1 = scmp.ne.s32.totalorder %s27_s30, %s7326_s11  ;;  %p7332_p3 = scmp.lt.s32.totalorder %s7326_s11, %s7326_s11 }
  0x2d   :  { %p7333_p4 = por %p7332_p3, %p7331_p2 }
  0x2f   :  { %p7334_p5 = pnand %p7333_p4, %p7327_p1 }
  0x31   :  { %7337 = shalt.err (!%p7334_p5)
}
  0x32   :  { %29 = dma.hbm_to_vmem [thread:$0]  %s7737_s0, 448, %s27_s30, [#allocation4]  }
  0x33   :  { %s7346_s14 = scalar_lea.vmem %s49_s10, 128  ;;  %p7351_p7 = scmp.lt.s32.totalorder %s49_s10, %s49_s10 }
  0x34   :  { %p7347_p6 = scmp.ne.s32.totalorder %s49_s10, %s7346_s14  ;;  %p7352_p8 = scmp.lt.s32.totalorder %s7346_s14, %s7346_s14 }
  0x36   :  { %p7353_p9 = por %p7352_p8, %p7351_p7 }
  0x38   :  { %p7354_p10 = pnand %p7353_p9, %p7347_p6 }
  0x3a   :  { %7357 = shalt.err (!%p7354_p10)
}
  0x3b   :  { %51 = dma.hbm_to_vmem [thread:$0]  %s7739_s2, 128, %s49_s10, [#allocation6]  }
  0x3c   :  { %s7439_s16 = smov [#allocation10]   ;;  %s7440_s18 = smov [#allocation13]  }
  0x3d   :  { %s70_s17 = sshll.u32 %s7439_s16, 4  ;;  %s92_s19 = sshll.u32 %s7440_s18, 4  ;;  %s71_s17 = int_to_ptr.vmem [resolvable:$true] %s70_s17  ;;  %s93_s19 = int_to_ptr.vmem [resolvable:$true] %s92_s19 }
  0x3e   :  { %s7366_s20 = scalar_lea.vmem %s71_s17, 64  ;;  %p7371_p12 = scmp.lt.s32.totalorder %s71_s17, %s71_s17 }
  0x3f   :  { %p7367_p11 = scmp.ne.s32.totalorder %s71_s17, %s7366_s20  ;;  %p7372_p13 = scmp.lt.s32.totalorder %s7366_s20, %s7366_s20 }
  0x41   :  { %p7373_p0 = por %p7372_p13, %p7371_p12 }
  0x43   :  { %p7374_p1 = pnand %p7373_p0, %p7367_p11 }
  0x45   :  { %7377 = shalt.err (!%p7374_p1)
}
  0x46   :  { %73 = dma.hbm_to_vmem [thread:$0]  %s7741_s4, 64, %s71_s17, [#allocation9]  }
  0x47   :  { %s7386_s22 = scalar_lea.vmem %s93_s19, 32  ;;  %p7391_p3 = scmp.lt.s32.totalorder %s93_s19, %s93_s19 }
  0x48   :  { %p7387_p2 = scmp.ne.s32.totalorder %s93_s19, %s7386_s22  ;;  %p7392_p4 = scmp.lt.s32.totalorder %s7386_s22, %s7386_s22 }
  0x4a   :  { %p7393_p5 = por %p7392_p4, %p7391_p3 }
  0x4c   :  { %p7394_p6 = pnand %p7393_p5, %p7387_p2 }
  0x4e   :  { %7397 = shalt.err (!%p7394_p6)
}
  0x4f   :  { %95 = dma.hbm_to_vmem [thread:$0]  %s7743_s6, 32, %s93_s19, [#allocation12]  }
  0x50   :  { %s7441_s24 = smov [#allocation14]  }
  0x51   :  { %s102_s1 = sshll.u32 %s7441_s24, 4  ;;  %s103_s1 = int_to_ptr.vmem [resolvable:$true] %s102_s1 }
  0x52   :  { %s7406_s25 = scalar_lea.vmem %s103_s1, 32  ;;  %p7411_p8 = scmp.lt.s32.totalorder %s103_s1, %s103_s1 }
  0x53   :  { %p7407_p7 = scmp.ne.s32.totalorder %s103_s1, %s7406_s25  ;;  %p7412_p9 = scmp.lt.s32.totalorder %s7406_s25, %s7406_s25 }
  0x55   :  { %p7413_p10 = por %p7412_p9, %p7411_p8 }
  0x57   :  { %p7414_p11 = pnand %p7413_p10, %p7407_p7 }
  0x59   :  { %7417 = shalt.err (!%p7414_p11)
}
  0x5a   :  { %105 = dma.hbm_to_vmem [thread:$0]  %s7744_s7, 32, %s103_s1, [#allocation15]  }
  0x5b   :  { %7418 = dma.done.wait [#allocation4], 448  }
  0x5c   :  { %7419 = vsyncadd [#allocation4], 4294966848 }
  0x5d   :  { %7420 = dma.done.wait [#allocation6], 57472  }
  0x5e   :  { %7421 = vsyncadd [#allocation6], 4294909824 }
  0x5f   :  { %7422 = dma.done.wait [#allocation9], 32832  }
  0x60   :  { %7423 = vsyncadd [#allocation9], 4294934464 }
  0x61   :  { %7424 = dma.done.wait [#allocation12], 8224  }
  0x62   :  { %7425 = vsyncadd [#allocation12], 4294959072 }
  0x63   :  { %7426 = dma.done.wait [#allocation15], 32  }
  0x64   :  { %7427 = vsyncadd [#allocation15], 4294967264  ;;  %v193_v0 = vld [vmem:[#allocation5 + $0x1c0] sm:$0xff]  ;;  %v7519_v54 = vld [vmem:[#allocation3 + $0x8] sm:$0xff]  ;;  %vm5963_vm0 = vcmask 7168  }
  0x65   :  { %v197_v1 = vld [vmem:[#allocation5 + $0x1e0] sm:$0xff]  ;;  %v7527_v59 = vcombine.high %v7519_v54, %v7519_v54 }
  0x66   :  { %v321_v2 = vld [vmem:[#allocation5 + $0x5c0] sm:$0xff]  ;;  %v6038_v3 = vcombine.high %v193_v0, %v197_v1  ;;  %v6037_v5 = vcombine.low %v193_v0, %v197_v1 }
  0x67   :  { %v325_v4 = vld [vmem:[#allocation5 + $0x5e0] sm:$0xff]  ;;  %2965 = vmatprep.mubr.bf16.mxu1 %v7527_v59 }
  0x68   :  { %v185_v6 = vld [vmem:[#allocation5 + $0x180] sm:$0xff]  ;;  %v6166_v8 = vcombine.high %v321_v2, %v325_v4  ;;  %v6165_v9 = vcombine.low %v321_v2, %v325_v4  ;;  %2892 = vmatprep.subr.bf16.mxu0 %v6038_v3 }
  0x69   :  { %v189_v7 = vld [vmem:[#allocation5 + $0x1a0] sm:$0xff]  ;;  %2893 = vmatpush1.bf16.msra.mxu0 %v6037_v5 }
  0x6a   :  { %v6030_v10 = vcombine.high %v185_v6, %v189_v7  ;;  %v313_v11 = vld [vmem:[#allocation5 + $0x580] sm:$0xff]  ;;  %2933 = vmatprep.subr.bf16.mxu1 %v6166_v8  ;;  %v6029_v18 = vcombine.low %v185_v6, %v189_v7 }
  0x6b   :  { %v317_v12 = vld [vmem:[#allocation5 + $0x5a0] sm:$0xff]  ;;  %2934 = vmatpush1.bf16.msra.mxu1 %v6165_v9 }
  0x6c   :  { %v177_v13 = vld [vmem:[#allocation5 + $0x140] sm:$0xff]  ;;  %v6158_v14 = vcombine.high %v313_v11, %v317_v12  ;;  %2894 = vmatprep.subr.bf16.mxu0 %v6030_v10  ;;  %v6157_v19 = vcombine.low %v313_v11, %v317_v12 }
  0x6d   :  { %v181_v15 = vld [vmem:[#allocation5 + $0x160] sm:$0xff]  ;;  %2895 = vmatpush1.bf16.msra.mxu0 %v6029_v18 }
  0x6e   :  { %v305_v16 = vld [vmem:[#allocation5 + $0x540] sm:$0xff]  ;;  %v6022_v20 = vcombine.high %v177_v13, %v181_v15  ;;  %2935 = vmatprep.subr.bf16.mxu1 %v6158_v14  ;;  %v6021_v26 = vcombine.low %v177_v13, %v181_v15 }
  0x6f   :  { %v309_v17 = vld [vmem:[#allocation5 + $0x560] sm:$0xff]  ;;  %2936 = vmatpush1.bf16.msra.mxu1 %v6157_v19 }
  0x70   :  { %v6150_v21 = vcombine.high %v305_v16, %v309_v17  ;;  %v169_v22 = vld [vmem:[#allocation5 + $0x100] sm:$0xff]  ;;  %2896 = vmatprep.subr.bf16.mxu0 %v6022_v20  ;;  %v6149_v27 = vcombine.low %v305_v16, %v309_v17 }
  0x71   :  { %v173_v23 = vld [vmem:[#allocation5 + $0x120] sm:$0xff]  ;;  %2897 = vmatpush1.bf16.msra.mxu0 %v6021_v26 }
  0x72   :  { %v297_v24 = vld [vmem:[#allocation5 + $0x500] sm:$0xff]  ;;  %v6014_v28 = vcombine.high %v169_v22, %v173_v23  ;;  %2937 = vmatprep.subr.bf16.mxu1 %v6150_v21  ;;  %v6013_v34 = vcombine.low %v169_v22, %v173_v23 }
  0x73   :  { %v301_v25 = vld [vmem:[#allocation5 + $0x520] sm:$0xff]  ;;  %2938 = vmatpush1.bf16.msra.mxu1 %v6149_v27 }
  0x74   :  { %v6142_v29 = vcombine.high %v297_v24, %v301_v25  ;;  %v161_v30 = vld [vmem:[#allocation5 + $0xc0] sm:$0xff]  ;;  %2898 = vmatprep.subr.bf16.mxu0 %v6014_v28  ;;  %v6141_v35 = vcombine.low %v297_v24, %v301_v25 }
  0x75   :  { %v165_v31 = vld [vmem:[#allocation5 + $0xe0] sm:$0xff]  ;;  %2899 = vmatpush1.bf16.msra.mxu0 %v6013_v34 }
  0x76   :  { %v289_v32 = vld [vmem:[#allocation5 + $0x4c0] sm:$0xff]  ;;  %v6006_v36 = vcombine.high %v161_v30, %v165_v31  ;;  %2939 = vmatprep.subr.bf16.mxu1 %v6142_v29  ;;  %v6005_v42 = vcombine.low %v161_v30, %v165_v31 }
  0x77   :  { %v293_v33 = vld [vmem:[#allocation5 + $0x4e0] sm:$0xff]  ;;  %2940 = vmatpush1.bf16.msra.mxu1 %v6141_v35 }
  0x78   :  { %v6134_v37 = vcombine.high %v289_v32, %v293_v33  ;;  %v153_v38 = vld [vmem:[#allocation5 + $0x80] sm:$0xff]  ;;  %2900 = vmatprep.subr.bf16.mxu0 %v6006_v36  ;;  %v6133_v43 = vcombine.low %v289_v32, %v293_v33 }
  0x79   :  { %v157_v39 = vld [vmem:[#allocation5 + $0xa0] sm:$0xff]  ;;  %2901 = vmatpush1.bf16.msra.mxu0 %v6005_v42 }
  0x7a   :  { %v281_v40 = vld [vmem:[#allocation5 + $0x480] sm:$0xff]  ;;  %v5998_v44 = vcombine.high %v153_v38, %v157_v39  ;;  %2941 = vmatprep.subr.bf16.mxu1 %v6134_v37  ;;  %v5997_v50 = vcombine.low %v153_v38, %v157_v39 }
  0x7b   :  { %v285_v41 = vld [vmem:[#allocation5 + $0x4a0] sm:$0xff]  ;;  %2942 = vmatpush1.bf16.msra.mxu1 %v6133_v43 }
  0x7c   :  { %v6126_v45 = vcombine.high %v281_v40, %v285_v41  ;;  %v145_v46 = vld [vmem:[#allocation5 + $0x40] sm:$0xff]  ;;  %2902 = vmatprep.subr.bf16.mxu0 %v5998_v44  ;;  %v6125_v51 = vcombine.low %v281_v40, %v285_v41 }
  0x7d   :  { %v149_v47 = vld [vmem:[#allocation5 + $0x60] sm:$0xff]  ;;  %2903 = vmatpush1.bf16.msra.mxu0 %v5997_v50 }
  0x7e   :  { %v273_v48 = vld [vmem:[#allocation5 + $0x440] sm:$0xff]  ;;  %v5990_v52 = vcombine.high %v145_v46, %v149_v47  ;;  %2943 = vmatprep.subr.bf16.mxu1 %v6126_v45  ;;  %v5989_v62 = vcombine.low %v145_v46, %v149_v47 }
  0x7f   :  { %v277_v49 = vld [vmem:[#allocation5 + $0x460] sm:$0xff]  ;;  %2944 = vmatpush1.bf16.msra.mxu1 %v6125_v51 }
  0x80   :  { %v7517_v53 = vld [vmem:[#allocation3] sm:$0xff]  ;;  %v6118_v55 = vcombine.high %v273_v48, %v277_v49  ;;  %2904 = vmatprep.subr.bf16.mxu0 %v5990_v52  ;;  %v6117_v63 = vcombine.low %v273_v48, %v277_v49 }
  0x81   :  { %v137_v56 = vld [vmem:[#allocation5] sm:$0xff]  ;;  %v7523_v58 = vcombine.high %v7517_v53, %v7517_v53  ;;  %2905 = vmatpush1.bf16.msra.mxu0 %v5989_v62 }
  0x82   :  { %v141_v57 = vld [vmem:[#allocation5 + $0x20] sm:$0xff]  ;;  %2945 = vmatprep.subr.bf16.mxu1 %v6118_v55 }
  0x83   :  { %v265_v60 = vld [vmem:[#allocation5 + $0x400] sm:$0xff]  ;;  %2924 = vmatprep.mubr.bf16.mxu0 %v7523_v58  ;;  %v5982_v0 = vcombine.high %v137_v56, %v141_v57  ;;  %v5981_v6 = vcombine.low %v137_v56, %v141_v57  ;;  %2946 = vmatpush1.bf16.msra.mxu1 %v6117_v63 }
  0x84   :  { %v269_v61 = vld [vmem:[#allocation5 + $0x420] sm:$0xff] }
  0x85   :  { %v6110_v1 = vcombine.high %v265_v60, %v269_v61  ;;  %v257_v2 = vld [vmem:[#allocation5 + $0x3c0] sm:$0xff]  ;;  %2906 = vmatprep.subr.bf16.mxu0 %v5982_v0  ;;  %v6109_v7 = vcombine.low %v265_v60, %v269_v61 }
  0x86   :  { %v261_v3 = vld [vmem:[#allocation5 + $0x3e0] sm:$0xff]  ;;  %2907 = vmatpush1.bf16.msra.mxu0 %v5981_v6 }
  0x87   :  { %v385_v4 = vld [vmem:[#allocation5 + $0x7c0] sm:$0xff]  ;;  %v6102_v8 = vcombine.high %v257_v2, %v261_v3  ;;  %2947 = vmatprep.subr.bf16.mxu1 %v6110_v1  ;;  %v6101_v14 = vcombine.low %v257_v2, %v261_v3 }
  0x88   :  { %v389_v5 = vld [vmem:[#allocation5 + $0x7e0] sm:$0xff]  ;;  %2948 = vmatpush1.bf16.msra.mxu1 %v6109_v7 }
  0x89   :  { %v6230_v9 = vcombine.high %v385_v4, %v389_v5  ;;  %v249_v10 = vld [vmem:[#allocation5 + $0x380] sm:$0xff]  ;;  %2908 = vmatprep.subr.bf16.mxu0 %v6102_v8  ;;  %v6229_v15 = vcombine.low %v385_v4, %v389_v5 }
  0x8a   :  { %v253_v11 = vld [vmem:[#allocation5 + $0x3a0] sm:$0xff]  ;;  %2909 = vmatpush2.bf16.msra.mxu0 %v6101_v14 }
  0x8b   :  { %v377_v12 = vld [vmem:[#allocation5 + $0x780] sm:$0xff]  ;;  %v6094_v16 = vcombine.high %v249_v10, %v253_v11  ;;  %2949 = vmatprep.subr.bf16.mxu1 %v6230_v9  ;;  %v6093_v22 = vcombine.low %v249_v10, %v253_v11 }
  0x8c   :  { %v381_v13 = vld [vmem:[#allocation5 + $0x7a0] sm:$0xff]  ;;  %2950 = vmatpush2.bf16.msra.mxu1 %v6229_v15 }
  0x8d   :  { %v6222_v17 = vcombine.high %v377_v12, %v381_v13  ;;  %v241_v18 = vld [vmem:[#allocation5 + $0x340] sm:$0xff]  ;;  %2910 = vmatprep.subr.bf16.mxu0 %v6094_v16  ;;  %v6221_v23 = vcombine.low %v377_v12, %v381_v13  ;;  %v7533_v16 = vcombine.low %v7517_v53, %v7517_v53 }
  0x8e   :  { %v245_v19 = vld [vmem:[#allocation5 + $0x360] sm:$0xff]  ;;  %2911 = vmatpush2.bf16.msra.mxu0 %v6093_v22 }
  0x8f   :  { %v369_v20 = vld [vmem:[#allocation5 + $0x740] sm:$0xff]  ;;  %v6086_v24 = vcombine.high %v241_v18, %v245_v19  ;;  %2951 = vmatprep.subr.bf16.mxu1 %v6222_v17  ;;  %v6085_v30 = vcombine.low %v241_v18, %v245_v19  ;;  %v7537_v19 = vcombine.low %v7519_v54, %v7519_v54 }
  0x90   :  { %v373_v21 = vld [vmem:[#allocation5 + $0x760] sm:$0xff]  ;;  %2952 = vmatpush2.bf16.msra.mxu1 %v6221_v23 }
  0x91   :  { %v6214_v25 = vcombine.high %v369_v20, %v373_v21  ;;  %v233_v26 = vld [vmem:[#allocation5 + $0x300] sm:$0xff]  ;;  %2912 = vmatprep.subr.bf16.mxu0 %v6086_v24  ;;  %v6213_v31 = vcombine.low %v369_v20, %v373_v21  ;;  %v7539_v21 = vld [vmem:[#allocation3 + $0x10] sm:$0xff] }
  0x92   :  { %v237_v27 = vld [vmem:[#allocation5 + $0x320] sm:$0xff]  ;;  %2913 = vmatpush2.bf16.msra.mxu0 %v6085_v30 }
  0x93   :  { %v361_v28 = vld [vmem:[#allocation5 + $0x700] sm:$0xff]  ;;  %v6078_v32 = vcombine.high %v233_v26, %v237_v27  ;;  %2953 = vmatprep.subr.bf16.mxu1 %v6214_v25  ;;  %v6077_v38 = vcombine.low %v233_v26, %v237_v27 }
  0x94   :  { %v365_v29 = vld [vmem:[#allocation5 + $0x720] sm:$0xff]  ;;  %2954 = vmatpush2.bf16.msra.mxu1 %v6213_v31 }
  0x95   :  { %v6206_v33 = vcombine.high %v361_v28, %v365_v29  ;;  %v225_v34 = vld [vmem:[#allocation5 + $0x2c0] sm:$0xff]  ;;  %2914 = vmatprep.subr.bf16.mxu0 %v6078_v32  ;;  %v6205_v39 = vcombine.low %v361_v28, %v365_v29  ;;  %v7544_v28 = vcombine.high %v7539_v21, %v7539_v21 }
  0x96   :  { %v229_v35 = vld [vmem:[#allocation5 + $0x2e0] sm:$0xff]  ;;  %2915 = vmatpush2.bf16.msra.mxu0 %v6077_v38 }
  0x97   :  { %v353_v36 = vld [vmem:[#allocation5 + $0x6c0] sm:$0xff]  ;;  %v6070_v40 = vcombine.high %v225_v34, %v229_v35  ;;  %2955 = vmatprep.subr.bf16.mxu1 %v6206_v33  ;;  %v6069_v46 = vcombine.low %v225_v34, %v229_v35 }
  0x98   :  { %v357_v37 = vld [vmem:[#allocation5 + $0x6e0] sm:$0xff]  ;;  %2956 = vmatpush2.bf16.msra.mxu1 %v6205_v39 }
  0x99   :  { %v6198_v41 = vcombine.high %v353_v36, %v357_v37  ;;  %v217_v42 = vld [vmem:[#allocation5 + $0x280] sm:$0xff]  ;;  %2916 = vmatprep.subr.bf16.mxu0 %v6070_v40  ;;  %v6197_v47 = vcombine.low %v353_v36, %v357_v37  ;;  %v7442_v36 = vmov 0  }
  0x9a   :  { %v221_v43 = vld [vmem:[#allocation5 + $0x2a0] sm:$0xff]  ;;  %2917 = vmatpush2.bf16.msra.mxu0 %v6069_v46 }
  0x9b   :  { %v345_v44 = vld [vmem:[#allocation5 + $0x680] sm:$0xff]  ;;  %v6062_v48 = vcombine.high %v217_v42, %v221_v43  ;;  %2957 = vmatprep.subr.bf16.mxu1 %v6198_v41  ;;  %v6061_v56 = vcombine.low %v217_v42, %v221_v43 }
  0x9c   :  { %v349_v45 = vld [vmem:[#allocation5 + $0x6a0] sm:$0xff]  ;;  %2958 = vmatpush2.bf16.msra.mxu1 %v6197_v47 }
  0x9d   :  { %v6190_v49 = vcombine.high %v345_v44, %v349_v45  ;;  %v209_v50 = vld [vmem:[#allocation5 + $0x240] sm:$0xff]  ;;  %2918 = vmatprep.subr.bf16.mxu0 %v6062_v48  ;;  %v6189_v57 = vcombine.low %v345_v44, %v349_v45 }
  0x9e   :  { %v213_v51 = vld [vmem:[#allocation5 + $0x260] sm:$0xff]  ;;  %2919 = vmatpush2.bf16.msra.mxu0 %v6061_v56 }
  0x9f   :  { %v337_v52 = vld [vmem:[#allocation5 + $0x640] sm:$0xff]  ;;  %v6054_v60 = vcombine.high %v209_v50, %v213_v51  ;;  %2959 = vmatprep.subr.bf16.mxu1 %v6190_v49  ;;  %v6053_v2 = vcombine.low %v209_v50, %v213_v51 }
  0xa0   :  { %v341_v55 = vld [vmem:[#allocation5 + $0x660] sm:$0xff]  ;;  %2960 = vmatpush2.bf16.msra.mxu1 %v6189_v57 }
  0xa1   :  { %v6182_v61 = vcombine.high %v337_v52, %v341_v55  ;;  %v201_v62 = vld [vmem:[#allocation5 + $0x200] sm:$0xff]  ;;  %2920 = vmatprep.subr.bf16.mxu0 %v6054_v60  ;;  %v6181_v3 = vcombine.low %v337_v52, %v341_v55 }
  0xa2   :  { %v205_v63 = vld [vmem:[#allocation5 + $0x220] sm:$0xff]  ;;  %2921 = vmatpush2.bf16.msra.mxu0 %v6053_v2 }
  0xa3   :  { %v329_v0 = vld [vmem:[#allocation5 + $0x600] sm:$0xff]  ;;  %v6046_v4 = vcombine.high %v201_v62, %v205_v63  ;;  %2961 = vmatprep.subr.bf16.mxu1 %v6182_v61  ;;  %v6045_v10 = vcombine.low %v201_v62, %v205_v63 }
  0xa4   :  { %v333_v1 = vld [vmem:[#allocation5 + $0x620] sm:$0xff]  ;;  %2962 = vmatpush2.bf16.msra.mxu1 %v6181_v3 }
  0xa5   :  { %v6174_v5 = vcombine.high %v329_v0, %v333_v1  ;;  %v449_v6 = vld [vmem:[#allocation5 + $0x9c0] sm:$0xff]  ;;  %2922 = vmatprep.subr.bf16.mxu0 %v6046_v4  ;;  %v6173_v11 = vcombine.low %v329_v0, %v333_v1 }
  0xa6   :  { %v453_v7 = vld [vmem:[#allocation5 + $0x9e0] sm:$0xff]  ;;  %2923 = vmatpush2.bf16.msra.mxu0 %v6045_v10 }
  0xa7   :  { %v577_v8 = vld [vmem:[#allocation5 + $0xdc0] sm:$0xff]  ;;  %v6294_v12 = vcombine.high %v449_v6, %v453_v7  ;;  %2963 = vmatprep.subr.bf16.mxu1 %v6174_v5  ;;  %v6293_v20 = vcombine.low %v449_v6, %v453_v7 }
  0xa8   :  { %v581_v9 = vld [vmem:[#allocation5 + $0xde0] sm:$0xff]  ;;  %2964 = vmatpush2.bf16.msra.mxu1 %v6173_v11 }
  0xa9   :  { %v6422_v13 = vcombine.high %v577_v8, %v581_v9  ;;  %v441_v14 = vld [vmem:[#allocation5 + $0x980] sm:$0xff]  ;;  %2974 = vmatprep.subr.bf16.mxu0 %v6294_v12  ;;  %v6421_v22 = vcombine.low %v577_v8, %v581_v9  ;;  %2925 = vmatmul.mubr.bf16.vlgmr.msra.gmra.mxu0 %v7533_v16 }
  0xaa   :  { %v445_v15 = vld [vmem:[#allocation5 + $0x9a0] sm:$0xff]  ;;  %2975 = vmatpush1.bf16.msra.mxu0 %v6293_v20  ;;  %3006 = vmatprep.mubr.bf16.mxu0 %v7544_v28 }
  0xab   :  { %v569_v17 = vld [vmem:[#allocation5 + $0xd80] sm:$0xff]  ;;  %v6286_v23 = vcombine.high %v441_v14, %v445_v15  ;;  %3015 = vmatprep.subr.bf16.mxu1 %v6422_v13  ;;  %2966 = vmatmul.mubr.bf16.vlgmr.msra.gmra.mxu1 %v7537_v19  ;;  %v6285_v54 = vcombine.low %v441_v14, %v445_v15  ;;  %v194_v14 = vld [vmem:[#allocation5 + $0x1c8] sm:$0xff] }
  0xac   :  { %v573_v18 = vld [vmem:[#allocation5 + $0xda0] sm:$0xff]  ;;  %3016 = vmatpush1.bf16.msra.mxu1 %v6421_v22  ;;  %3047 = vmatprep.mubr.bf16.mxu1 %v7442_v36 }
  0xad   :  { %v433_v24 = vld [vmem:[#allocation5 + $0x940] sm:$0xff]  ;;  %v6414_v25 = vcombine.high %v569_v17, %v573_v18  ;;  %2976 = vmatprep.subr.bf16.mxu0 %v6286_v23  ;;  %v6413_v29 = vcombine.low %v569_v17, %v573_v18  ;;  %v198_v17 = vld [vmem:[#allocation5 + $0x1e8] sm:$0xff] }
  0xae   :  { %v437_v26 = vld [vmem:[#allocation5 + $0x960] sm:$0xff]  ;;  %2977 = vmatpush1.bf16.msra.mxu0 %v6285_v54 }
  0xaf   :  { %v561_v53 = vld [vmem:[#allocation5 + $0xd40] sm:$0xff]  ;;  %v6278_v30 = vcombine.high %v433_v24, %v437_v26  ;;  %3017 = vmatprep.subr.bf16.mxu1 %v6414_v25  ;;  %v6277_v37 = vcombine.low %v433_v24, %v437_v26  ;;  %v186_v25 = vld [vmem:[#allocation5 + $0x188] sm:$0xff]  ;;  %v6768_v26 = vld [vmem:[#allocation3 + $0x18] ss:$0 sps:$4 sm:$0xff]  }
  0xb0   :  { %v565_v27 = vld [vmem:[#allocation5 + $0xd60] sm:$0xff]  ;;  %3018 = vmatpush1.bf16.msra.mxu1 %v6413_v29  ;;  %v6039_v29 = vcombine.low %v194_v14, %v198_v17 }
  0xb1   :  { %v425_v31 = vld [vmem:[#allocation5 + $0x900] sm:$0xff]  ;;  %v6406_v34 = vcombine.high %v561_v53, %v565_v27  ;;  %2978 = vmatprep.subr.bf16.mxu0 %v6278_v30  ;;  %v6405_v38 = vcombine.low %v561_v53, %v565_v27  ;;  %v6040_v53 = vcombine.high %v194_v14, %v198_v17  ;;  %v190_v27 = vld [vmem:[#allocation5 + $0x1a8] sm:$0xff] }
  0xb2   :  { %v429_v32 = vld [vmem:[#allocation5 + $0x920] sm:$0xff]  ;;  %2979 = vmatpush1.bf16.msra.mxu0 %v6277_v37  ;;  %v138_v14 = vld [vmem:[#allocation5 + $0x8] sm:$0xff] }
  0xb3   :  { %v553_v33 = vld [vmem:[#allocation5 + $0xd00] sm:$0xff]  ;;  %v6270_v39 = vcombine.high %v425_v31, %v429_v32  ;;  %3019 = vmatprep.subr.bf16.mxu1 %v6406_v34  ;;  %v6269_v45 = vcombine.low %v425_v31, %v429_v32  ;;  %v6032_v34 = vcombine.high %v186_v25, %v190_v27  ;;  %v142_v17 = vld [vmem:[#allocation5 + $0x28] sm:$0xff] }
  0xb4   :  { %v557_v35 = vld [vmem:[#allocation5 + $0xd20] sm:$0xff]  ;;  %3020 = vmatpush1.bf16.msra.mxu1 %v6405_v38  ;;  %v6031_v38 = vcombine.low %v186_v25, %v190_v27  ;;  %v322_v25 = vld [vmem:[#allocation5 + $0x5c8] sm:$0xff] }
  0xb5   :  { %v417_v40 = vld [vmem:[#allocation5 + $0x8c0] sm:$0xff]  ;;  %v6398_v43 = vcombine.high %v553_v33, %v557_v35  ;;  %2980 = vmatprep.subr.bf16.mxu0 %v6270_v39  ;;  %v6397_v46 = vcombine.low %v553_v33, %v557_v35  ;;  %v178_v33 = vld [vmem:[#allocation5 + $0x148] sm:$0xff] }
  0xb6   :  { %v421_v41 = vld [vmem:[#allocation5 + $0x8e0] sm:$0xff]  ;;  %2981 = vmatpush1.bf16.msra.mxu0 %v6269_v45  ;;  %v182_v35 = vld [vmem:[#allocation5 + $0x168] sm:$0xff] }
  0xb7   :  { %v545_v42 = vld [vmem:[#allocation5 + $0xcc0] sm:$0xff]  ;;  %v6262_v47 = vcombine.high %v417_v40, %v421_v41  ;;  %3021 = vmatprep.subr.bf16.mxu1 %v6398_v43  ;;  %v6261_v55 = vcombine.low %v417_v40, %v421_v41  ;;  %v6024_v43 = vcombine.high %v178_v33, %v182_v35 }
  0xb8   :  { %v549_v44 = vld [vmem:[#allocation5 + $0xce0] sm:$0xff]  ;;  %3022 = vmatpush1.bf16.msra.mxu1 %v6397_v46  ;;  %v6023_v46 = vcombine.low %v178_v33, %v182_v35  ;;  %v7552_v35 = vcombine.low %v7539_v21, %v7539_v21 }
  0xb9   :  { %v409_v48 = vld [vmem:[#allocation5 + $0x880] sm:$0xff]  ;;  %v6390_v51 = vcombine.high %v545_v42, %v549_v44  ;;  %2982 = vmatprep.subr.bf16.mxu0 %v6262_v47  ;;  %v6389_v56 = vcombine.low %v545_v42, %v549_v44  ;;  %v170_v42 = vld [vmem:[#allocation5 + $0x108] sm:$0xff] }
  0xba   :  { %v413_v49 = vld [vmem:[#allocation5 + $0x8a0] sm:$0xff]  ;;  %2983 = vmatpush1.bf16.msra.mxu0 %v6261_v55  ;;  %v174_v44 = vld [vmem:[#allocation5 + $0x128] sm:$0xff] }
  0xbb   :  { %v537_v50 = vld [vmem:[#allocation5 + $0xc80] sm:$0xff]  ;;  %v6254_v57 = vcombine.high %v409_v48, %v413_v49  ;;  %3023 = vmatprep.subr.bf16.mxu1 %v6390_v51  ;;  %v6253_v1 = vcombine.low %v409_v48, %v413_v49  ;;  %v6016_v51 = vcombine.high %v170_v42, %v174_v44 }
  0xbc   :  { %v541_v52 = vld [vmem:[#allocation5 + $0xca0] sm:$0xff]  ;;  %3024 = vmatpush1.bf16.msra.mxu1 %v6389_v56  ;;  %v6015_v56 = vcombine.low %v170_v42, %v174_v44  ;;  %v310_v44 = vld [vmem:[#allocation5 + $0x568] sm:$0xff] }
  0xbd   :  { %v401_v60 = vld [vmem:[#allocation5 + $0x840] sm:$0xff]  ;;  %v6382_v63 = vcombine.high %v537_v50, %v541_v52  ;;  %2984 = vmatprep.subr.bf16.mxu0 %v6254_v57  ;;  %v6381_v2 = vcombine.low %v537_v50, %v541_v52  ;;  %v162_v50 = vld [vmem:[#allocation5 + $0xc8] sm:$0xff] }
  0xbe   :  { %v405_v61 = vld [vmem:[#allocation5 + $0x860] sm:$0xff]  ;;  %2985 = vmatpush1.bf16.msra.mxu0 %v6253_v1  ;;  %v166_v52 = vld [vmem:[#allocation5 + $0xe8] sm:$0xff] }
  0xbf   :  { %v529_v62 = vld [vmem:[#allocation5 + $0xc40] sm:$0xff]  ;;  %v6246_v3 = vcombine.high %v401_v60, %v405_v61  ;;  %3025 = vmatprep.subr.bf16.mxu1 %v6382_v63  ;;  %v6245_v9 = vcombine.low %v401_v60, %v405_v61  ;;  %v6008_v63 = vcombine.high %v162_v50, %v166_v52 }
  0xc0   :  { %v533_v0 = vld [vmem:[#allocation5 + $0xc60] sm:$0xff]  ;;  %3026 = vmatpush1.bf16.msra.mxu1 %v6381_v2  ;;  %v6007_v2 = vcombine.low %v162_v50, %v166_v52 }
  0xc1   :  { %v393_v4 = vld [vmem:[#allocation5 + $0x800] sm:$0xff]  ;;  %v6374_v7 = vcombine.high %v529_v62, %v533_v0  ;;  %2986 = vmatprep.subr.bf16.mxu0 %v6246_v3  ;;  %v6373_v10 = vcombine.low %v529_v62, %v533_v0  ;;  %v154_v62 = vld [vmem:[#allocation5 + $0x88] sm:$0xff] }
  0xc2   :  { %v397_v5 = vld [vmem:[#allocation5 + $0x820] sm:$0xff]  ;;  %2987 = vmatpush1.bf16.msra.mxu0 %v6245_v9  ;;  %v158_v0 = vld [vmem:[#allocation5 + $0xa8] sm:$0xff] }
  0xc3   :  { %v521_v6 = vld [vmem:[#allocation5 + $0xc00] sm:$0xff]  ;;  %v6238_v11 = vcombine.high %v393_v4, %v397_v5  ;;  %3027 = vmatprep.subr.bf16.mxu1 %v6374_v7  ;;  %v6237_v18 = vcombine.low %v393_v4, %v397_v5  ;;  %v6000_v7 = vcombine.high %v154_v62, %v158_v0 }
  0xc4   :  { %v525_v8 = vld [vmem:[#allocation5 + $0xc20] sm:$0xff]  ;;  %3028 = vmatpush1.bf16.msra.mxu1 %v6373_v10  ;;  %v5999_v10 = vcombine.low %v154_v62, %v158_v0 }
  0xc5   :  { %v513_v12 = vld [vmem:[#allocation5 + $0xbc0] sm:$0xff]  ;;  %v6366_v15 = vcombine.high %v521_v6, %v525_v8  ;;  %2988 = vmatprep.subr.bf16.mxu0 %v6238_v11  ;;  %v6365_v20 = vcombine.low %v521_v6, %v525_v8  ;;  %v146_v6 = vld [vmem:[#allocation5 + $0x48] sm:$0xff] }
  0xc6   :  { %v517_v13 = vld [vmem:[#allocation5 + $0xbe0] sm:$0xff]  ;;  %2989 = vmatpush1.bf16.msra.mxu0 %v6237_v18  ;;  %v150_v8 = vld [vmem:[#allocation5 + $0x68] sm:$0xff] }
  0xc7   :  { %v6358_v22 = vcombine.high %v513_v12, %v517_v13  ;;  %v505_v23 = vld [vmem:[#allocation5 + $0xb80] sm:$0xff]  ;;  %3029 = vmatprep.subr.bf16.mxu1 %v6366_v15  ;;  %v6357_v54 = vcombine.low %v513_v12, %v517_v13  ;;  %v5992_v15 = vcombine.high %v146_v6, %v150_v8 }
  0xc8   :  { %v509_v24 = vld [vmem:[#allocation5 + $0xba0] sm:$0xff]  ;;  %3030 = vmatpush1.bf16.msra.mxu1 %v6365_v20  ;;  %v5991_v20 = vcombine.low %v146_v6, %v150_v8 }
  0xc9   :  { %2990 = vmatprep.subr.bf16.mxu0 %v6358_v22  ;;  %v6350_v30 = vcombine.high %v505_v23, %v509_v24  ;;  %v497_v31 = vld [vmem:[#allocation5 + $0xb40] sm:$0xff]  ;;  %3056 = vmatprep.subr.bf16.mxu1 %v6040_v53  ;;  %v6349_v37 = vcombine.low %v505_v23, %v509_v24  ;;  %v258_v23 = vld [vmem:[#allocation5 + $0x3c8] sm:$0xff] }
  0xca   :  { %v501_v32 = vld [vmem:[#allocation5 + $0xb60] sm:$0xff]  ;;  %2991 = vmatpush2.bf16.msra.mxu0 %v6357_v54  ;;  %v262_v24 = vld [vmem:[#allocation5 + $0x3e8] sm:$0xff]  ;;  %v5983_v54 = vcombine.low %v138_v14, %v142_v17 }
  0xcb   :  { %3048 = vmatmul.mubr.bf16.vlgmr.msra.gmra.mxu1 %v6768_v26  ;;  %2992 = vmatprep.subr.bf16.mxu0 %v6350_v30  ;;  %v6342_v39 = vcombine.high %v497_v31, %v501_v32  ;;  %v489_v40 = vld [vmem:[#allocation5 + $0xb00] sm:$0xff]  ;;  %v6341_v45 = vcombine.low %v497_v31, %v501_v32  ;;  %v5984_v26 = vcombine.high %v138_v14, %v142_v17  ;;  %v326_v53 = vld [vmem:[#allocation5 + $0x5e8] sm:$0xff] }
  0xcc   :  { %3057 = vmatpush1.bf16.msra.mxu1 %v6039_v29  ;;  %v493_v41 = vld [vmem:[#allocation5 + $0xb20] sm:$0xff]  ;;  %3088 = vmatprep.mubr.bf16.mxu1 %v7523_v58  ;;  %v6168_v29 = vcombine.high %v322_v25, %v326_v53  ;;  %v250_v30 = vld [vmem:[#allocation5 + $0x388] sm:$0xff]  ;;  %v6104_v33 = vcombine.high %v258_v23, %v262_v24 }
  0xcd   :  { %3058 = vmatprep.subr.bf16.mxu1 %v6032_v34  ;;  %v6334_v47 = vcombine.high %v489_v40, %v493_v41  ;;  %v481_v48 = vld [vmem:[#allocation5 + $0xac0] sm:$0xff]  ;;  %v6333_v55 = vcombine.low %v489_v40, %v493_v41  ;;  %v254_v31 = vld [vmem:[#allocation5 + $0x3a8] sm:$0xff] }
  0xce   :  { %2993 = vmatpush2.bf16.msra.mxu0 %v6349_v37  ;;  %v485_v49 = vld [vmem:[#allocation5 + $0xae0] sm:$0xff]  ;;  %v314_v32 = vld [vmem:[#allocation5 + $0x588] sm:$0xff]  ;;  %v6167_v37 = vcombine.low %v322_v25, %v326_v53  ;;  %v6096_v42 = vcombine.high %v250_v30, %v254_v31  ;;  %v6095_v21 = vcombine.low %v250_v30, %v254_v31 }
  0xcf   :  { %2994 = vmatprep.subr.bf16.mxu0 %v6342_v39  ;;  %v6326_v57 = vcombine.high %v481_v48, %v485_v49  ;;  %v473_v60 = vld [vmem:[#allocation5 + $0xa80] sm:$0xff]  ;;  %v6325_v1 = vcombine.low %v481_v48, %v485_v49  ;;  %v318_v34 = vld [vmem:[#allocation5 + $0x5a8] sm:$0xff] }
  0xd0   :  { %3059 = vmatpush1.bf16.msra.mxu1 %v6031_v38  ;;  %v477_v61 = vld [vmem:[#allocation5 + $0xaa0] sm:$0xff]  ;;  %v6103_v38 = vcombine.low %v258_v23, %v262_v24  ;;  %v6160_v39 = vcombine.high %v314_v32, %v318_v34  ;;  %v242_v40 = vld [vmem:[#allocation5 + $0x348] sm:$0xff] }
  0xd1   :  { %3060 = vmatprep.subr.bf16.mxu1 %v6024_v43  ;;  %v6318_v3 = vcombine.high %v473_v60, %v477_v61  ;;  %v465_v4 = vld [vmem:[#allocation5 + $0xa40] sm:$0xff]  ;;  %v6317_v9 = vcombine.low %v473_v60, %v477_v61  ;;  %v246_v41 = vld [vmem:[#allocation5 + $0x368] sm:$0xff] }
  0xd2   :  { %2995 = vmatpush2.bf16.msra.mxu0 %v6341_v45  ;;  %v469_v5 = vld [vmem:[#allocation5 + $0xa60] sm:$0xff]  ;;  %v306_v43 = vld [vmem:[#allocation5 + $0x548] sm:$0xff]  ;;  %v6159_v45 = vcombine.low %v314_v32, %v318_v34  ;;  %v6088_v50 = vcombine.high %v242_v40, %v246_v41 }
  0xd3   :  { %2996 = vmatprep.subr.bf16.mxu0 %v6334_v47  ;;  %v6310_v11 = vcombine.high %v465_v4, %v469_v5  ;;  %v457_v12 = vld [vmem:[#allocation5 + $0xa00] sm:$0xff]  ;;  %v6309_v18 = vcombine.low %v465_v4, %v469_v5  ;;  %v234_v47 = vld [vmem:[#allocation5 + $0x308] sm:$0xff]  ;;  %v6151_v52 = vcombine.low %v306_v43, %v310_v44 }
  0xd4   :  { %3061 = vmatpush1.bf16.msra.mxu1 %v6023_v46  ;;  %v461_v13 = vld [vmem:[#allocation5 + $0xa20] sm:$0xff]  ;;  %v6152_v46 = vcombine.high %v306_v43, %v310_v44  ;;  %v238_v48 = vld [vmem:[#allocation5 + $0x328] sm:$0xff] }
  0xd5   :  { %3062 = vmatprep.subr.bf16.mxu1 %v6016_v51  ;;  %v6302_v22 = vcombine.high %v457_v12, %v461_v13  ;;  %v6301_v27 = vcombine.low %v457_v12, %v461_v13  ;;  %v298_v49 = vld [vmem:[#allocation5 + $0x508] sm:$0xff]  ;;  %v6080_v62 = vcombine.high %v234_v47, %v238_v48 }
  0xd6   :  { %2997 = vmatpush2.bf16.msra.mxu0 %v6333_v55  ;;  %v302_v51 = vld [vmem:[#allocation5 + $0x528] sm:$0xff]  ;;  %v6087_v55 = vcombine.low %v242_v40, %v246_v41 }
  0xd7   :  { %2998 = vmatprep.subr.bf16.mxu0 %v6326_v57  ;;  %v226_v57 = vld [vmem:[#allocation5 + $0x2c8] sm:$0xff]  ;;  %v6143_v0 = vcombine.low %v298_v49, %v302_v51 }
  0xd8   :  { %3063 = vmatpush1.bf16.msra.mxu1 %v6015_v56  ;;  %v6144_v56 = vcombine.high %v298_v49, %v302_v51  ;;  %v230_v60 = vld [vmem:[#allocation5 + $0x2e8] sm:$0xff] }
  0xd9   :  { %3064 = vmatprep.subr.bf16.mxu1 %v6008_v63  ;;  %v290_v61 = vld [vmem:[#allocation5 + $0x4c8] sm:$0xff]  ;;  %v6072_v6 = vcombine.high %v226_v57, %v230_v60 }
  0xda   :  { %2999 = vmatpush2.bf16.msra.mxu0 %v6325_v1  ;;  %v294_v63 = vld [vmem:[#allocation5 + $0x4e8] sm:$0xff]  ;;  %v6079_v1 = vcombine.low %v234_v47, %v238_v48 }
  0xdb   :  { %3000 = vmatprep.subr.bf16.mxu0 %v6318_v3  ;;  %v218_v3 = vld [vmem:[#allocation5 + $0x288] sm:$0xff]  ;;  %v6135_v8 = vcombine.low %v290_v61, %v294_v63 }
  0xdc   :  { %3065 = vmatpush1.bf16.msra.mxu1 %v6007_v2  ;;  %v6136_v2 = vcombine.high %v290_v61, %v294_v63  ;;  %v222_v4 = vld [vmem:[#allocation5 + $0x2a8] sm:$0xff] }
  0xdd   :  { %3066 = vmatprep.subr.bf16.mxu1 %v6000_v7  ;;  %v282_v5 = vld [vmem:[#allocation5 + $0x488] sm:$0xff]  ;;  %v6064_v14 = vcombine.high %v218_v3, %v222_v4 }
  0xde   :  { %3001 = vmatpush2.bf16.msra.mxu0 %v6317_v9  ;;  %v286_v7 = vld [vmem:[#allocation5 + $0x4a8] sm:$0xff]  ;;  %v6071_v9 = vcombine.low %v226_v57, %v230_v60 }
  0xdf   :  { %3002 = vmatprep.subr.bf16.mxu0 %v6310_v11  ;;  %v210_v11 = vld [vmem:[#allocation5 + $0x248] sm:$0xff]  ;;  %v6127_v17 = vcombine.low %v282_v5, %v286_v7 }
  0xe0   :  { %3067 = vmatpush1.bf16.msra.mxu1 %v5999_v10  ;;  %v6128_v10 = vcombine.high %v282_v5, %v286_v7  ;;  %v214_v12 = vld [vmem:[#allocation5 + $0x268] sm:$0xff] }
  0xe1   :  { %3068 = vmatprep.subr.bf16.mxu1 %v5992_v15  ;;  %v274_v13 = vld [vmem:[#allocation5 + $0x448] sm:$0xff]  ;;  %v6056_v25 = vcombine.high %v210_v11, %v214_v12 }
  0xe2   :  { %3003 = vmatpush2.bf16.msra.mxu0 %v6309_v18  ;;  %v278_v15 = vld [vmem:[#allocation5 + $0x468] sm:$0xff]  ;;  %v6063_v18 = vcombine.low %v218_v3, %v222_v4 }
  0xe3   :  { %3004 = vmatprep.subr.bf16.mxu0 %v6302_v22  ;;  %v202_v22 = vld [vmem:[#allocation5 + $0x208] sm:$0xff]  ;;  %v6119_v53 = vcombine.low %v274_v13, %v278_v15 }
  0xe4   :  { %3069 = vmatpush1.bf16.msra.mxu1 %v5991_v20  ;;  %v6120_v20 = vcombine.high %v274_v13, %v278_v15  ;;  %v206_v23 = vld [vmem:[#allocation5 + $0x228] sm:$0xff] }
  0xe5   :  { %3070 = vmatprep.subr.bf16.mxu1 %v5984_v26  ;;  %v266_v24 = vld [vmem:[#allocation5 + $0x408] sm:$0xff]  ;;  %v6048_v32 = vcombine.high %v202_v22, %v206_v23 }
  0xe6   :  { %3005 = vmatpush2.bf16.msra.mxu0 %v6301_v27  ;;  %v270_v26 = vld [vmem:[#allocation5 + $0x428] sm:$0xff]  ;;  %v6055_v27 = vcombine.low %v210_v11, %v214_v12 }
  0xe7   :  { %3097 = vmatprep.subr.bf16.mxu0 %v6168_v29  ;;  %v386_v29 = vld [vmem:[#allocation5 + $0x7c8] sm:$0xff]  ;;  %v6111_v34 = vcombine.low %v266_v24, %v270_v26 }
  0xe8   :  { %3071 = vmatpush1.bf16.msra.mxu1 %v5983_v54  ;;  %v6112_v54 = vcombine.high %v266_v24, %v270_v26  ;;  %v390_v30 = vld [vmem:[#allocation5 + $0x7e8] sm:$0xff] }
  0xe9   :  { %3072 = vmatprep.subr.bf16.mxu1 %v6104_v33  ;;  %3007 = vmatmul.mubr.bf16.vlgmr.msra.gmra.mxu0 %v7552_v35  ;;  %v450_v31 = vld [vmem:[#allocation5 + $0x9c8] sm:$0xff]  ;;  %v6231_v44 = vcombine.low %v386_v29, %v390_v30 }
  0xea   :  { %3098 = vmatpush1.bf16.msra.mxu0 %v6167_v37  ;;  %3129 = vmatprep.mubr.bf16.mxu0 %v7527_v59  ;;  %v454_v33 = vld [vmem:[#allocation5 + $0x9e8] sm:$0xff]  ;;  %v6047_v37 = vcombine.low %v202_v22, %v206_v23 }
  0xeb   :  { %3099 = vmatprep.subr.bf16.mxu0 %v6160_v39  ;;  %v378_v39 = vld [vmem:[#allocation5 + $0x788] sm:$0xff] }
  0xec   :  { %3073 = vmatpush2.bf16.msra.mxu1 %v6103_v38  ;;  %v6232_v38 = vcombine.high %v386_v29, %v390_v30  ;;  %v382_v40 = vld [vmem:[#allocation5 + $0x7a8] sm:$0xff] }
  0xed   :  { %3074 = vmatprep.subr.bf16.mxu1 %v6096_v42  ;;  %v442_v41 = vld [vmem:[#allocation5 + $0x988] sm:$0xff]  ;;  %v6296_v42 = vcombine.high %v450_v31, %v454_v33  ;;  %v6223_v51 = vcombine.low %v378_v39, %v382_v40 }
  0xee   :  { %3100 = vmatpush1.bf16.msra.mxu0 %v6159_v45  ;;  %v446_v43 = vld [vmem:[#allocation5 + $0x9a8] sm:$0xff]  ;;  %v6295_v45 = vcombine.low %v450_v31, %v454_v33 }
  0xef   :  { %3101 = vmatprep.subr.bf16.mxu0 %v6152_v46  ;;  %v370_v46 = vld [vmem:[#allocation5 + $0x748] sm:$0xff]  ;;  %v6288_v49 = vcombine.high %v442_v41, %v446_v43 }
  0xf0   :  { %3075 = vmatpush2.bf16.msra.mxu1 %v6095_v21  ;;  %v6224_v21 = vcombine.high %v378_v39, %v382_v40  ;;  %v374_v47 = vld [vmem:[#allocation5 + $0x768] sm:$0xff] }
  0xf1   :  { %3076 = vmatprep.subr.bf16.mxu1 %v6088_v50  ;;  %v434_v48 = vld [vmem:[#allocation5 + $0x948] sm:$0xff]  ;;  %v6215_v63 = vcombine.low %v370_v46, %v374_v47 }
  0xf2   :  { %3102 = vmatpush1.bf16.msra.mxu0 %v6151_v52  ;;  %v438_v50 = vld [vmem:[#allocation5 + $0x968] sm:$0xff]  ;;  %v6287_v52 = vcombine.low %v442_v41, %v446_v43 }
  0xf3   :  { %3103 = vmatprep.subr.bf16.mxu0 %v6144_v56  ;;  %v362_v56 = vld [vmem:[#allocation5 + $0x708] sm:$0xff]  ;;  %v6280_v61 = vcombine.high %v434_v48, %v438_v50 }
  0xf4   :  { %3077 = vmatpush2.bf16.msra.mxu1 %v6087_v55  ;;  %v6216_v55 = vcombine.high %v370_v46, %v374_v47  ;;  %v366_v57 = vld [vmem:[#allocation5 + $0x728] sm:$0xff] }
  0xf5   :  { %3078 = vmatprep.subr.bf16.mxu1 %v6080_v62  ;;  %v426_v60 = vld [vmem:[#allocation5 + $0x908] sm:$0xff]  ;;  %v6207_v7 = vcombine.low %v362_v56, %v366_v57 }
  0xf6   :  { %3104 = vmatpush1.bf16.msra.mxu0 %v6143_v0  ;;  %v430_v62 = vld [vmem:[#allocation5 + $0x928] sm:$0xff]  ;;  %v6279_v0 = vcombine.low %v434_v48, %v438_v50 }
  0xf7   :  { %3105 = vmatprep.subr.bf16.mxu0 %v6136_v2  ;;  %v354_v2 = vld [vmem:[#allocation5 + $0x6c8] sm:$0xff]  ;;  %v6272_v5 = vcombine.high %v426_v60, %v430_v62 }
  0xf8   :  { %3079 = vmatpush2.bf16.msra.mxu1 %v6079_v1  ;;  %v6208_v1 = vcombine.high %v362_v56, %v366_v57  ;;  %v358_v3 = vld [vmem:[#allocation5 + $0x6e8] sm:$0xff] }
  0xf9   :  { %3080 = vmatprep.subr.bf16.mxu1 %v6072_v6  ;;  %v418_v4 = vld [vmem:[#allocation5 + $0x8c8] sm:$0xff]  ;;  %v6199_v15 = vcombine.low %v354_v2, %v358_v3 }
  0xfa   :  { %3106 = vmatpush1.bf16.msra.mxu0 %v6135_v8  ;;  %v422_v6 = vld [vmem:[#allocation5 + $0x8e8] sm:$0xff]  ;;  %v6271_v8 = vcombine.low %v426_v60, %v430_v62 }
  0xfb   :  { %3107 = vmatprep.subr.bf16.mxu0 %v6128_v10  ;;  %v346_v10 = vld [vmem:[#allocation5 + $0x688] sm:$0xff]  ;;  %v6264_v13 = vcombine.high %v418_v4, %v422_v6 }
  0xfc   :  { %3081 = vmatpush2.bf16.msra.mxu1 %v6071_v9  ;;  %v6200_v9 = vcombine.high %v354_v2, %v358_v3  ;;  %v350_v11 = vld [vmem:[#allocation5 + $0x6a8] sm:$0xff] }
  0xfd   :  { %3082 = vmatprep.subr.bf16.mxu1 %v6064_v14  ;;  %v410_v12 = vld [vmem:[#allocation5 + $0x888] sm:$0xff]  ;;  %v6191_v26 = vcombine.low %v346_v10, %v350_v11 }
  0xfe   :  { %3108 = vmatpush1.bf16.msra.mxu0 %v6127_v17  ;;  %v414_v14 = vld [vmem:[#allocation5 + $0x8a8] sm:$0xff]  ;;  %v6263_v17 = vcombine.low %v418_v4, %v422_v6 }
  0xff   :  { %3109 = vmatprep.subr.bf16.mxu0 %v6120_v20  ;;  %v338_v20 = vld [vmem:[#allocation5 + $0x648] sm:$0xff]  ;;  %v6256_v24 = vcombine.high %v410_v12, %v414_v14 }
 0x100   :  { %3083 = vmatpush2.bf16.msra.mxu1 %v6063_v18  ;;  %v6192_v18 = vcombine.high %v346_v10, %v350_v11  ;;  %v342_v22 = vld [vmem:[#allocation5 + $0x668] sm:$0xff] }
 0x101   :  { %3084 = vmatprep.subr.bf16.mxu1 %v6056_v25  ;;  %v402_v23 = vld [vmem:[#allocation5 + $0x848] sm:$0xff]  ;;  %v6183_v33 = vcombine.low %v338_v20, %v342_v22 }
 0x102   :  { %3110 = vmatpush1.bf16.msra.mxu0 %v6119_v53  ;;  %v406_v25 = vld [vmem:[#allocation5 + $0x868] sm:$0xff]  ;;  %v6255_v53 = vcombine.low %v410_v12, %v414_v14 }
 0x103   :  { %3111 = vmatprep.subr.bf16.mxu0 %v6112_v54  ;;  %v330_v54 = vld [vmem:[#allocation5 + $0x608] sm:$0xff]  ;;  %v6248_v31 = vcombine.high %v402_v23, %v406_v25 }
 0x104   :  { %3085 = vmatpush2.bf16.msra.mxu1 %v6055_v27  ;;  %v6184_v27 = vcombine.high %v338_v20, %v342_v22  ;;  %v334_v29 = vld [vmem:[#allocation5 + $0x628] sm:$0xff] }
 0x105   :  { %3086 = vmatprep.subr.bf16.mxu1 %v6048_v32  ;;  %v394_v30 = vld [vmem:[#allocation5 + $0x808] sm:$0xff]  ;;  %v6175_v43 = vcombine.low %v330_v54, %v334_v29 }
 0x106   :  { %3112 = vmatpush1.bf16.msra.mxu0 %v6111_v34  ;;  %v398_v32 = vld [vmem:[#allocation5 + $0x828] sm:$0xff]  ;;  %v6247_v34 = vcombine.low %v402_v23, %v406_v25 }
 0x107   :  { %3113 = vmatprep.subr.bf16.mxu0 %v6232_v38  ;;  %v514_v38 = vld [vmem:[#allocation5 + $0xbc8] sm:$0xff]  ;;  %v6240_v41 = vcombine.high %v394_v30, %v398_v32 }
 0x108   :  { %3087 = vmatpush2.bf16.msra.mxu1 %v6047_v37  ;;  %v6176_v37 = vcombine.high %v330_v54, %v334_v29  ;;  %v518_v39 = vld [vmem:[#allocation5 + $0xbe8] sm:$0xff] }
 0x109   :  { %3138 = vmatprep.subr.bf16.mxu1 %v6296_v42  ;;  %v578_v40 = vld [vmem:[#allocation5 + $0xdc8] sm:$0xff]  ;;  %v6360_v48 = vcombine.high %v514_v38, %v518_v39 }
 0x10a   :  { %3114 = vmatpush2.bf16.msra.mxu0 %v6231_v44  ;;  %v582_v42 = vld [vmem:[#allocation5 + $0xde8] sm:$0xff]  ;;  %v6239_v44 = vcombine.low %v394_v30, %v398_v32 }
 0x10b   :  { %3089 = vmatmul.mubr.bf16.vlgmr.msra.gmra.mxu1 %v7533_v16  ;;  %3115 = vmatprep.subr.bf16.mxu0 %v6224_v21  ;;  %v506_v21 = vld [vmem:[#allocation5 + $0xb88] sm:$0xff]  ;;  %v6423_v50 = vcombine.low %v578_v40, %v582_v42 }
 0x10c   :  { %3139 = vmatpush1.bf16.msra.mxu1 %v6295_v45  ;;  %3170 = vmatprep.mubr.bf16.mxu1 %v7544_v28  ;;  %v6424_v45 = vcombine.high %v578_v40, %v582_v42  ;;  %v510_v46 = vld [vmem:[#allocation5 + $0xba8] sm:$0xff] }
 0x10d   :  { %3140 = vmatprep.subr.bf16.mxu1 %v6288_v49  ;;  %v570_v47 = vld [vmem:[#allocation5 + $0xd88] sm:$0xff]  ;;  %v6352_v60 = vcombine.high %v506_v21, %v510_v46 }
 0x10e   :  { %3116 = vmatpush2.bf16.msra.mxu0 %v6223_v51  ;;  %v574_v49 = vld [vmem:[#allocation5 + $0xda8] sm:$0xff]  ;;  %v6359_v51 = vcombine.low %v514_v38, %v518_v39 }
 0x10f   :  { %3117 = vmatprep.subr.bf16.mxu0 %v6216_v55  ;;  %v498_v55 = vld [vmem:[#allocation5 + $0xb48] sm:$0xff]  ;;  %v6415_v62 = vcombine.low %v570_v47, %v574_v49 }
 0x110   :  { %3141 = vmatpush1.bf16.msra.mxu1 %v6287_v52  ;;  %v6416_v52 = vcombine.high %v570_v47, %v574_v49  ;;  %v502_v56 = vld [vmem:[#allocation5 + $0xb68] sm:$0xff] }
 0x111   :  { %3142 = vmatprep.subr.bf16.mxu1 %v6280_v61  ;;  %v562_v57 = vld [vmem:[#allocation5 + $0xd48] sm:$0xff]  ;;  %v6344_v4 = vcombine.high %v498_v55, %v502_v56 }
 0x112   :  { %3118 = vmatpush2.bf16.msra.mxu0 %v6215_v63  ;;  %v566_v61 = vld [vmem:[#allocation5 + $0xd68] sm:$0xff]  ;;  %v6351_v63 = vcombine.low %v506_v21, %v510_v46  ;;  %v199_v21 = vld [vmem:[#allocation5 + $0x1f0] sm:$0xff] }
 0x113   :  { %3119 = vmatprep.subr.bf16.mxu0 %v6208_v1  ;;  %v490_v1 = vld [vmem:[#allocation5 + $0xb08] sm:$0xff]  ;;  %v6407_v6 = vcombine.low %v562_v57, %v566_v61  ;;  %v323_v46 = vld [vmem:[#allocation5 + $0x5d0] sm:$0xff] }
 0x114   :  { %3143 = vmatpush1.bf16.msra.mxu1 %v6279_v0  ;;  %v6408_v0 = vcombine.high %v562_v57, %v566_v61  ;;  %v494_v2 = vld [vmem:[#allocation5 + $0xb28] sm:$0xff] }
 0x115   :  { %3144 = vmatprep.subr.bf16.mxu1 %v6272_v5  ;;  %v554_v3 = vld [vmem:[#allocation5 + $0xd08] sm:$0xff]  ;;  %v6336_v12 = vcombine.high %v490_v1, %v494_v2 }
 0x116   :  { %3120 = vmatpush2.bf16.msra.mxu0 %v6207_v7  ;;  %v558_v5 = vld [vmem:[#allocation5 + $0xd28] sm:$0xff]  ;;  %v6343_v7 = vcombine.low %v498_v55, %v502_v56  ;;  %v191_v55 = vld [vmem:[#allocation5 + $0x1b0] sm:$0xff] }
 0x117   :  { %3121 = vmatprep.subr.bf16.mxu0 %v6200_v9  ;;  %v482_v9 = vld [vmem:[#allocation5 + $0xac8] sm:$0xff]  ;;  %v6399_v14 = vcombine.low %v554_v3, %v558_v5  ;;  %v315_v56 = vld [vmem:[#allocation5 + $0x590] sm:$0xff] }
 0x118   :  { %3145 = vmatpush1.bf16.msra.mxu1 %v6271_v8  ;;  %v6400_v8 = vcombine.high %v554_v3, %v558_v5  ;;  %v486_v10 = vld [vmem:[#allocation5 + $0xae8] sm:$0xff]  ;;  %v7560_v3 = vld [vmem:[#allocation3 + $0x18] ss:$0 sps:$4 sm:$0xff]   ;;  %v311_v5 = vld [vmem:[#allocation5 + $0x570] sm:$0xff] }
 0x119   :  { %3146 = vmatprep.subr.bf16.mxu1 %v6264_v13  ;;  %v546_v11 = vld [vmem:[#allocation5 + $0xcc8] sm:$0xff]  ;;  %v6328_v23 = vcombine.high %v482_v9, %v486_v10 }
 0x11a   :  { %3122 = vmatpush2.bf16.msra.mxu0 %v6199_v15  ;;  %v550_v13 = vld [vmem:[#allocation5 + $0xce8] sm:$0xff]  ;;  %v6335_v15 = vcombine.low %v490_v1, %v494_v2  ;;  %v183_v2 = vld [vmem:[#allocation5 + $0x170] sm:$0xff] }
 0x11b   :  { %3123 = vmatprep.subr.bf16.mxu0 %v6192_v18  ;;  %v474_v18 = vld [vmem:[#allocation5 + $0xa88] sm:$0xff]  ;;  %v6391_v25 = vcombine.low %v546_v11, %v550_v13 }
 0x11c   :  { %3147 = vmatpush1.bf16.msra.mxu1 %v6263_v17  ;;  %v6392_v17 = vcombine.high %v546_v11, %v550_v13  ;;  %v478_v20 = vld [vmem:[#allocation5 + $0xaa8] sm:$0xff]  ;;  %v175_v11 = vld [vmem:[#allocation5 + $0x130] sm:$0xff] }
 0x11d   :  { %3148 = vmatprep.subr.bf16.mxu1 %v6256_v24  ;;  %v538_v22 = vld [vmem:[#allocation5 + $0xc88] sm:$0xff]  ;;  %v6320_v30 = vcombine.high %v474_v18, %v478_v20  ;;  %v303_v13 = vld [vmem:[#allocation5 + $0x530] sm:$0xff] }
 0x11e   :  { %3124 = vmatpush2.bf16.msra.mxu0 %v6191_v26  ;;  %v542_v24 = vld [vmem:[#allocation5 + $0xca8] sm:$0xff]  ;;  %v6327_v26 = vcombine.low %v482_v9, %v486_v10  ;;  %v171_v10 = vld [vmem:[#allocation5 + $0x110] sm:$0xff] }
 0x11f   :  { %3125 = vmatprep.subr.bf16.mxu0 %v6184_v27  ;;  %v466_v27 = vld [vmem:[#allocation5 + $0xa48] sm:$0xff]  ;;  %v6383_v32 = vcombine.low %v538_v22, %v542_v24 }
 0x120   :  { %3149 = vmatpush1.bf16.msra.mxu1 %v6255_v53  ;;  %v6384_v53 = vcombine.high %v538_v22, %v542_v24  ;;  %v470_v54 = vld [vmem:[#allocation5 + $0xa68] sm:$0xff]  ;;  %v167_v22 = vld [vmem:[#allocation5 + $0xf0] sm:$0xff] }
 0x121   :  { %3150 = vmatprep.subr.bf16.mxu1 %v6248_v31  ;;  %v530_v29 = vld [vmem:[#allocation5 + $0xc48] sm:$0xff]  ;;  %v6312_v40 = vcombine.high %v466_v27, %v470_v54  ;;  %v295_v24 = vld [vmem:[#allocation5 + $0x4f0] sm:$0xff] }
 0x122   :  { %3126 = vmatpush2.bf16.msra.mxu0 %v6183_v33  ;;  %v534_v31 = vld [vmem:[#allocation5 + $0xc68] sm:$0xff]  ;;  %v6319_v33 = vcombine.low %v474_v18, %v478_v20  ;;  %v163_v20 = vld [vmem:[#allocation5 + $0xd0] sm:$0xff] }
 0x123   :  { %3127 = vmatprep.subr.bf16.mxu0 %v6176_v37  ;;  %v458_v37 = vld [vmem:[#allocation5 + $0xa08] sm:$0xff]  ;;  %v6375_v42 = vcombine.low %v530_v29, %v534_v31 }
 0x124   :  { %3151 = vmatpush1.bf16.msra.mxu1 %v6247_v34  ;;  %v6376_v34 = vcombine.high %v530_v29, %v534_v31  ;;  %v462_v38 = vld [vmem:[#allocation5 + $0xa28] sm:$0xff]  ;;  %v159_v29 = vld [vmem:[#allocation5 + $0xb0] sm:$0xff] }
 0x125   :  { %3152 = vmatprep.subr.bf16.mxu1 %v6240_v41  ;;  %v522_v39 = vld [vmem:[#allocation5 + $0xc08] sm:$0xff]  ;;  %v6304_v47 = vcombine.high %v458_v37, %v462_v38  ;;  %v287_v31 = vld [vmem:[#allocation5 + $0x4b0] sm:$0xff] }
 0x126   :  { %3128 = vmatpush2.bf16.msra.mxu0 %v6175_v43  ;;  %v526_v41 = vld [vmem:[#allocation5 + $0xc28] sm:$0xff]  ;;  %v6311_v43 = vcombine.low %v466_v27, %v470_v54  ;;  %v155_v54 = vld [vmem:[#allocation5 + $0x90] sm:$0xff] }
 0x127   :  { %3179 = vmatprep.subr.bf16.mxu0 %v6424_v45  ;;  %v195_v45 = vld [vmem:[#allocation5 + $0x1d0] sm:$0xff]  ;;  %v6367_v49 = vcombine.low %v522_v39, %v526_v41 }
 0x128   :  { %3153 = vmatpush1.bf16.msra.mxu1 %v6239_v44  ;;  %v6368_v44 = vcombine.high %v522_v39, %v526_v41  ;;  %v6041_v61 = vcombine.low %v195_v45, %v199_v21  ;;  %v151_v39 = vld [vmem:[#allocation5 + $0x70] sm:$0xff] }
 0x129   :  { %3154 = vmatprep.subr.bf16.mxu1 %v6360_v48  ;;  %3130 = vmatmul.mubr.bf16.vlgmr.msra.gmra.mxu0 %v7537_v19  ;;  %v327_v48 = vld [vmem:[#allocation5 + $0x5f0] sm:$0xff] }
 0x12a   :  { %3180 = vmatpush1.bf16.msra.mxu0 %v6423_v50  ;;  %3211 = vmatprep.mubr.bf16.mxu0 %v7442_v36  ;;  %v6303_v50 = vcombine.low %v458_v37, %v462_v38  ;;  %v6170_v57 = vcombine.high %v323_v46, %v327_v48  ;;  %v147_v38 = vld [vmem:[#allocation5 + $0x50] sm:$0xff] }
 0x12b   :  { %3181 = vmatprep.subr.bf16.mxu0 %v6416_v52  ;;  %v187_v52 = vld [vmem:[#allocation5 + $0x190] sm:$0xff] }
 0x12c   :  { %3155 = vmatpush2.bf16.msra.mxu1 %v6359_v51  ;;  %v6042_v51 = vcombine.high %v195_v45, %v199_v21  ;;  %v279_v41 = vld [vmem:[#allocation5 + $0x470] sm:$0xff]  ;;  %v5994_v45 = vcombine.high %v147_v38, %v151_v39 }
 0x12d   :  { %3156 = vmatprep.subr.bf16.mxu1 %v6352_v60  ;;  %v319_v60 = vld [vmem:[#allocation5 + $0x5b0] sm:$0xff] }
 0x12e   :  { %3182 = vmatpush1.bf16.msra.mxu0 %v6415_v62  ;;  %v6169_v62 = vcombine.low %v323_v46, %v327_v48  ;;  %v6162_v1 = vcombine.high %v315_v56, %v319_v60  ;;  %v139_v46 = vld [vmem:[#allocation5 + $0x10] sm:$0xff] }
 0x12f   :  { %3183 = vmatprep.subr.bf16.mxu0 %v6408_v0  ;;  %v179_v0 = vld [vmem:[#allocation5 + $0x150] sm:$0xff] }
 0x130   :  { %3157 = vmatpush2.bf16.msra.mxu1 %v6351_v63  ;;  %v6034_v63 = vcombine.high %v187_v52, %v191_v55  ;;  %v267_v48 = vld [vmem:[#allocation5 + $0x410] sm:$0xff] }
 0x131   :  { %3158 = vmatprep.subr.bf16.mxu1 %v6344_v4  ;;  %v307_v4 = vld [vmem:[#allocation5 + $0x550] sm:$0xff] }
 0x132   :  { %3184 = vmatpush1.bf16.msra.mxu0 %v6407_v6  ;;  %v6033_v6 = vcombine.low %v187_v52, %v191_v55  ;;  %v6154_v9 = vcombine.high %v307_v4, %v311_v5 }
 0x133   :  { %3185 = vmatprep.subr.bf16.mxu0 %v6400_v8  ;;  %v6026_v8 = vcombine.high %v179_v0, %v183_v2 }
 0x134   :  { %3159 = vmatpush2.bf16.msra.mxu1 %v6343_v7  ;;  %v6161_v7 = vcombine.low %v315_v56, %v319_v60  ;;  %v263_v60 = vld [vmem:[#allocation5 + $0x3f0] sm:$0xff] }
 0x135   :  { %3160 = vmatprep.subr.bf16.mxu1 %v6336_v12  ;;  %v299_v12 = vld [vmem:[#allocation5 + $0x510] sm:$0xff] }
 0x136   :  { %3186 = vmatpush1.bf16.msra.mxu0 %v6399_v14  ;;  %v6025_v14 = vcombine.low %v179_v0, %v183_v2  ;;  %v6146_v18 = vcombine.high %v299_v12, %v303_v13  ;;  %v7571_v2 = vld [vmem:[#allocation7] sm:$0xff] }
 0x137   :  { %3187 = vmatprep.subr.bf16.mxu0 %v6392_v17  ;;  %v6018_v17 = vcombine.high %v171_v10, %v175_v11 }
 0x138   :  { %3161 = vmatpush2.bf16.msra.mxu1 %v6335_v15  ;;  %v6153_v15 = vcombine.low %v307_v4, %v311_v5 }
 0x139   :  { %3162 = vmatprep.subr.bf16.mxu1 %v6328_v23  ;;  %v291_v23 = vld [vmem:[#allocation5 + $0x4d0] sm:$0xff] }
 0x13a   :  { %3188 = vmatpush1.bf16.msra.mxu0 %v6391_v25  ;;  %v6017_v25 = vcombine.low %v171_v10, %v175_v11  ;;  %v6138_v27 = vcombine.high %v291_v23, %v295_v24  ;;  %v383_v10 = vld [vmem:[#allocation5 + $0x7b0] sm:$0xff] }
 0x13b   :  { %3189 = vmatprep.subr.bf16.mxu0 %v6384_v53  ;;  %v6010_v53 = vcombine.high %v163_v20, %v167_v22 }
 0x13c   :  { %3163 = vmatpush2.bf16.msra.mxu1 %v6327_v26  ;;  %v6145_v26 = vcombine.low %v299_v12, %v303_v13 }
 0x13d   :  { %3164 = vmatprep.subr.bf16.mxu1 %v6320_v30  ;;  %v283_v30 = vld [vmem:[#allocation5 + $0x490] sm:$0xff] }
 0x13e   :  { %3190 = vmatpush1.bf16.msra.mxu0 %v6383_v32  ;;  %v6009_v32 = vcombine.low %v163_v20, %v167_v22  ;;  %v6130_v37 = vcombine.high %v283_v30, %v287_v31  ;;  %v247_v20 = vld [vmem:[#allocation5 + $0x370] sm:$0xff] }
 0x13f   :  { %3191 = vmatprep.subr.bf16.mxu0 %v6376_v34  ;;  %v6002_v34 = vcombine.high %v155_v54, %v159_v29 }
 0x140   :  { %3165 = vmatpush2.bf16.msra.mxu1 %v6319_v33  ;;  %v6137_v33 = vcombine.low %v291_v23, %v295_v24  ;;  %v371_v23 = vld [vmem:[#allocation5 + $0x750] sm:$0xff] }
 0x141   :  { %3166 = vmatprep.subr.bf16.mxu1 %v6312_v40  ;;  %v275_v40 = vld [vmem:[#allocation5 + $0x450] sm:$0xff] }
 0x142   :  { %3192 = vmatpush1.bf16.msra.mxu0 %v6375_v42  ;;  %v6001_v42 = vcombine.low %v155_v54, %v159_v29  ;;  %v6122_v21 = vcombine.high %v275_v40, %v279_v41  ;;  %v6121_v52 = vcombine.low %v275_v40, %v279_v41  ;;  %v375_v24 = vld [vmem:[#allocation5 + $0x770] sm:$0xff] }
 0x143   :  { %3193 = vmatprep.subr.bf16.mxu0 %v6368_v44  ;;  %v6129_v44 = vcombine.low %v283_v30, %v287_v31  ;;  %v367_v40 = vld [vmem:[#allocation5 + $0x730] sm:$0xff] }
 0x144   :  { %3167 = vmatpush2.bf16.msra.mxu1 %v6311_v43  ;;  %v587_v43 = vlaneseq }
 0x145   :  { %3168 = vmatprep.subr.bf16.mxu1 %v6304_v47  ;;  %v143_v47 = vld [vmem:[#allocation5 + $0x30] sm:$0xff] }
 0x146   :  { %3194 = vmatpush1.bf16.msra.mxu0 %v6367_v49  ;;  %v271_v49 = vld [vmem:[#allocation5 + $0x430] sm:$0xff]  ;;  %v5986_v55 = vcombine.high %v139_v46, %v143_v47 }
 0x147   :  { %3220 = vmatprep.subr.bf16.mxu0 %v6042_v51  ;;  %v7566_v51 = vshrl.u32 %v587_v43, 7  ;;  %v6114_v56 = vcombine.high %v267_v48, %v271_v49 }
 0x148   :  { %3169 = vmatpush2.bf16.msra.mxu1 %v6303_v50  ;;  %v5993_v50 = vcombine.low %v147_v38, %v151_v39  ;;  %v363_v39 = vld [vmem:[#allocation5 + $0x710] sm:$0xff] }
 0x149   :  { %3261 = vmatprep.subr.bf16.mxu1 %v6170_v57  ;;  %3212 = vmatmul.mubr.bf16.vlgmr.msra.gmra.mxu0 %v7560_v3  ;;  %v259_v57 = vld [vmem:[#allocation5 + $0x3d0] sm:$0xff]  ;;  %v7569_v0 = vsub.s32 0, %v7566_v51 }
 0x14a   :  { %3221 = vmatpush1.bf16.msra.mxu0 %v6041_v61  ;;  %3252 = vmatprep.mubr.bf16.mxu0 %v7523_v58  ;;  %v387_v61 = vld [vmem:[#allocation5 + $0x7d0] sm:$0xff]  ;;  %v6106_v4 = vcombine.high %v259_v57, %v263_v60  ;;  %v6105_v12 = vcombine.low %v259_v57, %v263_v60 }
 0x14b   :  { %3171 = vmatmul.mubr.bf16.vlgmr.msra.gmra.mxu1 %v7552_v35  ;;  %3222 = vmatprep.subr.bf16.mxu0 %v6034_v63  ;;  %v5985_v63 = vcombine.low %v139_v46, %v143_v47  ;;  %v590_v11 = vrot.slane %v7571_v2, %v7569_v0  ;;  %v6210_v47 = vcombine.high %v363_v39, %v367_v40 }
 0x14c   :  { %3262 = vmatpush1.bf16.msra.mxu1 %v6169_v62  ;;  %3293 = vmatprep.mubr.bf16.mxu1 %v7527_v59  ;;  %v391_v62 = vld [vmem:[#allocation5 + $0x7f0] sm:$0xff] }
 0x14d   :  { %3263 = vmatprep.subr.bf16.mxu1 %v6162_v1  ;;  %v6113_v1 = vcombine.low %v267_v48, %v271_v49  ;;  %v6234_v5 = vcombine.high %v387_v61, %v391_v62  ;;  %v6233_v13 = vcombine.low %v387_v61, %v391_v62  ;;  %v227_v48 = vld [vmem:[#allocation5 + $0x2d0] sm:$0xff] }
 0x14e   :  { %3223 = vmatpush1.bf16.msra.mxu0 %v6033_v6  ;;  %v7574_v6 = vsub.s32 1, %v7566_v51  ;;  %v231_v49 = vld [vmem:[#allocation5 + $0x2f0] sm:$0xff] }
 0x14f   :  { %3224 = vmatprep.subr.bf16.mxu0 %v6026_v8  ;;  %v255_v8 = vld [vmem:[#allocation5 + $0x3b0] sm:$0xff]  ;;  %v6074_v57 = vcombine.high %v227_v48, %v231_v49 }
 0x150   :  { %3264 = vmatpush1.bf16.msra.mxu1 %v6161_v7  ;;  %v251_v7 = vld [vmem:[#allocation5 + $0x390] sm:$0xff] }
 0x151   :  { %3265 = vmatprep.subr.bf16.mxu1 %v6154_v9  ;;  %v379_v9 = vld [vmem:[#allocation5 + $0x790] sm:$0xff] }
 0x152   :  { %3225 = vmatpush1.bf16.msra.mxu0 %v6025_v14  ;;  %v6098_v14 = vcombine.high %v251_v7, %v255_v8  ;;  %v6225_v54 = vcombine.low %v379_v9, %v383_v10  ;;  %v219_v61 = vld [vmem:[#allocation5 + $0x290] sm:$0xff] }
 0x153   :  { %3226 = vmatprep.subr.bf16.mxu0 %v6018_v17  ;;  %v6226_v17 = vcombine.high %v379_v9, %v383_v10  ;;  %v223_v62 = vld [vmem:[#allocation5 + $0x2b0] sm:$0xff] }
 0x154   :  { %3266 = vmatpush1.bf16.msra.mxu1 %v6153_v15  ;;  %v594_v15 = vrot.slane %v7571_v2, %v7574_v6  ;;  %v211_v9 = vld [vmem:[#allocation5 + $0x250] sm:$0xff] }
 0x155   :  { %3267 = vmatprep.subr.bf16.mxu1 %v6146_v18  ;;  %v243_v18 = vld [vmem:[#allocation5 + $0x350] sm:$0xff] }
 0x156   :  { %3227 = vmatpush1.bf16.msra.mxu0 %v6017_v25  ;;  %v6090_v29 = vcombine.high %v243_v18, %v247_v20  ;;  %v6089_v43 = vcombine.low %v243_v18, %v247_v20  ;;  %v215_v10 = vld [vmem:[#allocation5 + $0x270] sm:$0xff] }
 0x157   :  { %3228 = vmatprep.subr.bf16.mxu0 %v6010_v53  ;;  %v6097_v53 = vcombine.low %v251_v7, %v255_v8  ;;  %v6066_v7 = vcombine.high %v219_v61, %v223_v62  ;;  %v203_v18 = vld [vmem:[#allocation5 + $0x210] sm:$0xff] }
 0x158   :  { %3268 = vmatpush1.bf16.msra.mxu1 %v6145_v26  ;;  %v207_v20 = vld [vmem:[#allocation5 + $0x230] sm:$0xff] }
 0x159   :  { %3269 = vmatprep.subr.bf16.mxu1 %v6138_v27 }
 0x15a   :  { %3229 = vmatpush1.bf16.msra.mxu0 %v6009_v32 }
 0x15b   :  { %3230 = vmatprep.subr.bf16.mxu0 %v6002_v34  ;;  %v235_v34 = vld [vmem:[#allocation5 + $0x310] sm:$0xff] }
 0x15c   :  { %3270 = vmatpush1.bf16.msra.mxu1 %v6137_v33  ;;  %v6218_v33 = vcombine.high %v371_v23, %v375_v24 }
 0x15d   :  { %3271 = vmatprep.subr.bf16.mxu1 %v6130_v37  ;;  %v239_v37 = vld [vmem:[#allocation5 + $0x330] sm:$0xff] }
 0x15e   :  { %3231 = vmatpush1.bf16.msra.mxu0 %v6001_v42 }
 0x15f   :  { %3232 = vmatprep.subr.bf16.mxu0 %v5994_v45  ;;  %v6217_v45 = vcombine.low %v371_v23, %v375_v24  ;;  %v335_v23 = vld [vmem:[#allocation5 + $0x630] sm:$0xff]  ;;  %v6057_v24 = vcombine.low %v211_v9, %v215_v10 }
 0x160   :  { %3272 = vmatpush1.bf16.msra.mxu1 %v6129_v44 }
 0x161   :  { %3273 = vmatprep.subr.bf16.mxu1 %v6122_v21  ;;  %v6082_v21 = vcombine.high %v235_v34, %v239_v37 }
 0x162   :  { %3233 = vmatpush1.bf16.msra.mxu0 %v5993_v50  ;;  %v355_v50 = vld [vmem:[#allocation5 + $0x6d0] sm:$0xff] }
 0x163   :  { %3234 = vmatprep.subr.bf16.mxu0 %v5986_v55  ;;  %v6081_v55 = vcombine.low %v235_v34, %v239_v37 }
 0x164   :  { %3274 = vmatpush1.bf16.msra.mxu1 %v6121_v52  ;;  %v359_v52 = vld [vmem:[#allocation5 + $0x6f0] sm:$0xff] }
 0x165   :  { %3275 = vmatprep.subr.bf16.mxu1 %v6114_v56  ;;  %v6209_v56 = vcombine.low %v363_v39, %v367_v40  ;;  %v6202_v60 = vcombine.high %v355_v50, %v359_v52  ;;  %v447_v39 = vld [vmem:[#allocation5 + $0x9b0] sm:$0xff] }
 0x166   :  { %3235 = vmatpush1.bf16.msra.mxu0 %v5985_v63  ;;  %v347_v63 = vld [vmem:[#allocation5 + $0x690] sm:$0xff] }
 0x167   :  { %3236 = vmatprep.subr.bf16.mxu0 %v6106_v4  ;;  %v6073_v4 = vcombine.low %v227_v48, %v231_v49  ;;  %v571_v40 = vld [vmem:[#allocation5 + $0xd90] sm:$0xff] }
 0x168   :  { %3276 = vmatpush1.bf16.msra.mxu1 %v6113_v1  ;;  %v351_v1 = vld [vmem:[#allocation5 + $0x6b0] sm:$0xff] }
 0x169   :  { %3277 = vmatprep.subr.bf16.mxu1 %v6234_v5  ;;  %v2926_v22 = vpop.f32.mrf.mxu0  ;;  %v6201_v5 = vcombine.low %v355_v50, %v359_v52  ;;  %v6194_v8 = vcombine.high %v347_v63, %v351_v1  ;;  %v563_v48 = vld [vmem:[#allocation5 + $0xd50] sm:$0xff] }
 0x16a   :  { %v2927_v25 = vadd.f32 %v2926_v22, %v590_v11  ;;  %3237 = vmatpush2.bf16.msra.mxu0 %v6105_v12  ;;  %v339_v11 = vld [vmem:[#allocation5 + $0x650] sm:$0xff] }
 0x16b   :  { %v2967_v26 = vpop.f32.mrf.mxu1  ;;  %v2928_v27 = vpop.f32.mrf.mxu0  ;;  %3238 = vmatprep.subr.bf16.mxu0 %v6098_v14  ;;  %v343_v12 = vld [vmem:[#allocation5 + $0x670] sm:$0xff]  ;;  %v6193_v14 = vcombine.low %v347_v63, %v351_v1 }
 0x16c   :  { %3278 = vmatpush2.bf16.msra.mxu1 %v6233_v13  ;;  %v7580_v30 = vadd.f32 %v2967_v26, %v2927_v25  ;;  %v2929_v31 = vadd.f32 %v2928_v27, %v594_v15  ;;  %v6065_v13 = vcombine.low %v219_v61, %v223_v62  ;;  %v6058_v15 = vcombine.high %v211_v9, %v215_v10  ;;  %v331_v22 = vld [vmem:[#allocation5 + $0x610] sm:$0xff] }
 0x16d   :  { %v2969_v32 = vpop.f32.mrf.mxu1  ;;  %3279 = vmatprep.subr.bf16.mxu1 %v6226_v17  ;;  %v2930_v38 = vpop.f32.mrf.mxu0  ;;  %v6186_v17 = vcombine.high %v339_v11, %v343_v12  ;;  %v6185_v25 = vcombine.low %v339_v11, %v343_v12  ;;  %v6050_v26 = vcombine.high %v203_v18, %v207_v20  ;;  %v451_v27 = vld [vmem:[#allocation5 + $0x9d0] sm:$0xff] }
 0x16e   :  { %v7582_v41 = vadd.f32 %v2969_v32, %v2929_v31  ;;  %3239 = vmatpush2.bf16.msra.mxu0 %v6097_v53  ;;  %v6178_v53 = vcombine.high %v331_v22, %v335_v23  ;;  %v583_v31 = vld [vmem:[#allocation5 + $0xdf0] sm:$0xff]  ;;  %v6049_v32 = vcombine.low %v203_v18, %v207_v20 }
 0x16f   :  { %v2971_v42 = vpop.f32.mrf.mxu1  ;;  %v2931_v44 = vpop.f32.mrf.mxu0  ;;  %3240 = vmatprep.subr.bf16.mxu0 %v6090_v29  ;;  %v579_v29 = vld [vmem:[#allocation5 + $0xdd0] sm:$0xff] }
 0x170   :  { %3280 = vmatpush2.bf16.msra.mxu1 %v6225_v54  ;;  %v455_v54 = vld [vmem:[#allocation5 + $0x9f0] sm:$0xff]  ;;  %v6426_v37 = vcombine.high %v579_v29, %v583_v31  ;;  %v6425_v44 = vcombine.low %v579_v29, %v583_v31 }
 0x171   :  { %v2972_v46 = vpop.f32.mrf.mxu1  ;;  %3281 = vmatprep.subr.bf16.mxu1 %v6218_v33  ;;  %v6177_v33 = vcombine.low %v331_v22, %v335_v23  ;;  %v6298_v34 = vcombine.high %v451_v27, %v455_v54  ;;  %v443_v38 = vld [vmem:[#allocation5 + $0x990] sm:$0xff] }
 0x172   :  { %3241 = vmatpush2.bf16.msra.mxu0 %v6089_v43  ;;  %v575_v42 = vld [vmem:[#allocation5 + $0xdb0] sm:$0xff]  ;;  %v6297_v43 = vcombine.low %v451_v27, %v455_v54  ;;  %v6289_v52 = vcombine.low %v443_v38, %v447_v39 }
 0x173   :  { %3242 = vmatprep.subr.bf16.mxu0 %v6082_v21  ;;  %v6418_v21 = vcombine.high %v571_v40, %v575_v42  ;;  %v435_v46 = vld [vmem:[#allocation5 + $0x950] sm:$0xff] }
 0x174   :  { %3282 = vmatpush2.bf16.msra.mxu1 %v6217_v45  ;;  %v6290_v45 = vcombine.high %v443_v38, %v447_v39  ;;  %v567_v49 = vld [vmem:[#allocation5 + $0xd70] sm:$0xff] }
 0x175   :  { %3283 = vmatprep.subr.bf16.mxu1 %v6210_v47  ;;  %v439_v47 = vld [vmem:[#allocation5 + $0x970] sm:$0xff] }
 0x176   :  { %3243 = vmatpush2.bf16.msra.mxu0 %v6081_v55  ;;  %v6417_v55 = vcombine.low %v571_v40, %v575_v42  ;;  %v427_v61 = vld [vmem:[#allocation5 + $0x910] sm:$0xff] }
 0x177   :  { %3244 = vmatprep.subr.bf16.mxu0 %v6074_v57  ;;  %v431_v62 = vld [vmem:[#allocation5 + $0x930] sm:$0xff] }
 0x178   :  { %3284 = vmatpush2.bf16.msra.mxu1 %v6209_v56  ;;  %v6282_v56 = vcombine.high %v435_v46, %v439_v47  ;;  %v555_v63 = vld [vmem:[#allocation5 + $0xd10] sm:$0xff] }
 0x179   :  { %3285 = vmatprep.subr.bf16.mxu1 %v6202_v60  ;;  %v6410_v60 = vcombine.high %v563_v48, %v567_v49  ;;  %v559_v1 = vld [vmem:[#allocation5 + $0xd30] sm:$0xff] }
 0x17a   :  { %3245 = vmatpush2.bf16.msra.mxu0 %v6073_v4  ;;  %v6402_v10 = vcombine.high %v555_v63, %v559_v1  ;;  %v419_v11 = vld [vmem:[#allocation5 + $0x8d0] sm:$0xff] }
 0x17b   :  { %3246 = vmatprep.subr.bf16.mxu0 %v6066_v7  ;;  %v6409_v7 = vcombine.low %v563_v48, %v567_v49  ;;  %v423_v12 = vld [vmem:[#allocation5 + $0x8f0] sm:$0xff] }
 0x17c   :  { %3286 = vmatpush2.bf16.msra.mxu1 %v6201_v5  ;;  %v6281_v5 = vcombine.low %v435_v46, %v439_v47  ;;  %v6266_v18 = vcombine.high %v419_v11, %v423_v12  ;;  %v411_v22 = vld [vmem:[#allocation5 + $0x890] sm:$0xff] }
 0x17d   :  { %3287 = vmatprep.subr.bf16.mxu1 %v6194_v8  ;;  %v6274_v8 = vcombine.high %v427_v61, %v431_v62  ;;  %v415_v23 = vld [vmem:[#allocation5 + $0x8b0] sm:$0xff] }
 0x17e   :  { %3247 = vmatpush2.bf16.msra.mxu0 %v6065_v13  ;;  %v547_v13 = vld [vmem:[#allocation5 + $0xcd0] sm:$0xff]  ;;  %v6258_v27 = vcombine.high %v411_v22, %v415_v23 }
 0x17f   :  { %3248 = vmatprep.subr.bf16.mxu0 %v6058_v15  ;;  %v6273_v15 = vcombine.low %v427_v61, %v431_v62  ;;  %v403_v29 = vld [vmem:[#allocation5 + $0x850] sm:$0xff] }
 0x180   :  { %3288 = vmatpush2.bf16.msra.mxu1 %v6193_v14  ;;  %v551_v14 = vld [vmem:[#allocation5 + $0xcf0] sm:$0xff] }
 0x181   :  { %3289 = vmatprep.subr.bf16.mxu1 %v6186_v17  ;;  %v6401_v17 = vcombine.low %v555_v63, %v559_v1  ;;  %v6394_v20 = vcombine.high %v547_v13, %v551_v14  ;;  %v407_v31 = vld [vmem:[#allocation5 + $0x870] sm:$0xff] }
 0x182   :  { %3249 = vmatpush2.bf16.msra.mxu0 %v6057_v24  ;;  %v539_v24 = vld [vmem:[#allocation5 + $0xc90] sm:$0xff]  ;;  %v6250_v38 = vcombine.high %v403_v29, %v407_v31 }
 0x183   :  { %3250 = vmatprep.subr.bf16.mxu0 %v6050_v26  ;;  %v6265_v26 = vcombine.low %v419_v11, %v423_v12  ;;  %v395_v40 = vld [vmem:[#allocation5 + $0x810] sm:$0xff] }
 0x184   :  { %3290 = vmatpush2.bf16.msra.mxu1 %v6185_v25  ;;  %v543_v25 = vld [vmem:[#allocation5 + $0xcb0] sm:$0xff] }
 0x185   :  { %3291 = vmatprep.subr.bf16.mxu1 %v6178_v53  ;;  %v6393_v53 = vcombine.low %v547_v13, %v551_v14  ;;  %v6386_v54 = vcombine.high %v539_v24, %v543_v25  ;;  %v399_v42 = vld [vmem:[#allocation5 + $0x830] sm:$0xff]  ;;  %v180_v14 = vld [vmem:[#allocation5 + $0x158] sm:$0xff] }
 0x186   :  { %3251 = vmatpush2.bf16.msra.mxu0 %v6049_v32  ;;  %v531_v32 = vld [vmem:[#allocation5 + $0xc50] sm:$0xff]  ;;  %v6242_v46 = vcombine.high %v395_v40, %v399_v42 }
 0x187   :  { %3302 = vmatprep.subr.bf16.mxu0 %v6298_v34  ;;  %v6257_v34 = vcombine.low %v411_v22, %v415_v23  ;;  %v515_v48 = vld [vmem:[#allocation5 + $0xbd0] sm:$0xff] }
 0x188   :  { %3292 = vmatpush2.bf16.msra.mxu1 %v6177_v33  ;;  %v535_v33 = vld [vmem:[#allocation5 + $0xc70] sm:$0xff] }
 0x189   :  { %3343 = vmatprep.subr.bf16.mxu1 %v6426_v37  ;;  %3253 = vmatmul.mubr.bf16.vlgmr.msra.gmra.mxu0 %v7533_v16  ;;  %v6385_v37 = vcombine.low %v539_v24, %v543_v25  ;;  %v6378_v39 = vcombine.high %v531_v32, %v535_v33  ;;  %v519_v49 = vld [vmem:[#allocation5 + $0xbf0] sm:$0xff] }
 0x18a   :  { %3303 = vmatpush1.bf16.msra.mxu0 %v6297_v43  ;;  %3334 = vmatprep.mubr.bf16.mxu0 %v7544_v28  ;;  %v523_v43 = vld [vmem:[#allocation5 + $0xc10] sm:$0xff]  ;;  %v6362_v61 = vcombine.high %v515_v48, %v519_v49 }
 0x18b   :  { %v7585_v50 = vpop.f32.mrf.mxu1  ;;  %3294 = vmatmul.mubr.bf16.vlgmr.msra.gmra.mxu1 %v7537_v19  ;;  %3304 = vmatprep.subr.bf16.mxu0 %v6290_v45  ;;  %v6249_v45 = vcombine.low %v403_v29, %v407_v31  ;;  %v507_v63 = vld [vmem:[#allocation5 + $0xb90] sm:$0xff] }
 0x18c   :  { %3344 = vmatpush1.bf16.msra.mxu1 %v6425_v44  ;;  %3375 = vmatprep.mubr.bf16.mxu1 %v7442_v36  ;;  %v527_v44 = vld [vmem:[#allocation5 + $0xc30] sm:$0xff] }
 0x18d   :  { %v7588_v57 = vpop.f32.mrf.mxu1  ;;  %3345 = vmatprep.subr.bf16.mxu1 %v6418_v21  ;;  %v6377_v21 = vcombine.low %v531_v32, %v535_v33  ;;  %v6370_v47 = vcombine.high %v523_v43, %v527_v44  ;;  %v511_v1 = vld [vmem:[#allocation5 + $0xbb0] sm:$0xff] }
 0x18e   :  { %3305 = vmatpush1.bf16.msra.mxu0 %v6289_v52  ;;  %v196_v52 = vld [vmem:[#allocation5 + $0x1d8] sm:$0xff]  ;;  %v499_v11 = vld [vmem:[#allocation5 + $0xb50] sm:$0xff] }
 0x18f   :  { %v3053_v4 = vpop.f32.mrf.mxu1  ;;  %3306 = vmatprep.subr.bf16.mxu0 %v6282_v56  ;;  %v6241_v56 = vcombine.low %v395_v40, %v399_v42  ;;  %v503_v12 = vld [vmem:[#allocation5 + $0xb70] sm:$0xff] }
 0x190   :  { %3346 = vmatpush1.bf16.msra.mxu1 %v6417_v55  ;;  %v200_v55 = vld [vmem:[#allocation5 + $0x1f8] sm:$0xff]  ;;  %v6346_v23 = vcombine.high %v499_v11, %v503_v12  ;;  %v6345_v31 = vcombine.low %v499_v11, %v503_v12 }
 0x191   :  { %v3054_v9 = vpop.f32.mrf.mxu1  ;;  %3347 = vmatprep.subr.bf16.mxu1 %v6410_v60  ;;  %v6369_v60 = vcombine.low %v523_v43, %v527_v44  ;;  %v6044_v62 = vcombine.high %v196_v52, %v200_v55  ;;  %v188_v4 = vld [vmem:[#allocation5 + $0x198] sm:$0xff]  ;;  %v475_v43 = vld [vmem:[#allocation5 + $0xa90] sm:$0xff] }
 0x192   :  { %3307 = vmatpush1.bf16.msra.mxu0 %v6281_v5  ;;  %v192_v5 = vld [vmem:[#allocation5 + $0x1b8] sm:$0xff]  ;;  %v6354_v9 = vcombine.high %v507_v63, %v511_v1  ;;  %v479_v44 = vld [vmem:[#allocation5 + $0xab0] sm:$0xff] }
 0x193   :  { %3308 = vmatprep.subr.bf16.mxu0 %v6274_v8  ;;  %v6043_v8 = vcombine.low %v196_v52, %v200_v55  ;;  %v6035_v22 = vcombine.low %v188_v4, %v192_v5  ;;  %v467_v52 = vld [vmem:[#allocation5 + $0xa50] sm:$0xff] }
 0x194   :  { %3348 = vmatpush1.bf16.msra.mxu1 %v6409_v7  ;;  %v6361_v7 = vcombine.low %v515_v48, %v519_v49  ;;  %v6322_v48 = vcombine.high %v475_v43, %v479_v44  ;;  %v471_v55 = vld [vmem:[#allocation5 + $0xa70] sm:$0xff] }
 0x195   :  { %3349 = vmatprep.subr.bf16.mxu1 %v6402_v10  ;;  %v6036_v10 = vcombine.high %v188_v4, %v192_v5  ;;  %v459_v4 = vld [vmem:[#allocation5 + $0xa10] sm:$0xff] }
 0x196   :  { %3309 = vmatpush1.bf16.msra.mxu0 %v6273_v15  ;;  %v184_v15 = vld [vmem:[#allocation5 + $0x178] sm:$0xff]  ;;  %v463_v5 = vld [vmem:[#allocation5 + $0xa30] sm:$0xff] }
 0x197   :  { %3310 = vmatprep.subr.bf16.mxu0 %v6266_v18  ;;  %v6353_v18 = vcombine.low %v507_v63, %v511_v1  ;;  %v6314_v63 = vcombine.high %v467_v52, %v471_v55  ;;  %v6306_v11 = vcombine.high %v459_v4, %v463_v5 }
 0x198   :  { %3350 = vmatpush1.bf16.msra.mxu1 %v6401_v17 }
 0x199   :  { %3351 = vmatprep.subr.bf16.mxu1 %v6394_v20 }
 0x19a   :  { %3311 = vmatpush1.bf16.msra.mxu0 %v6265_v26  ;;  %v6028_v26 = vcombine.high %v180_v14, %v184_v15 }
 0x19b   :  { %3312 = vmatprep.subr.bf16.mxu0 %v6258_v27  ;;  %v495_v27 = vld [vmem:[#allocation5 + $0xb30] sm:$0xff] }
 0x19c   :  { %3352 = vmatpush1.bf16.msra.mxu1 %v6393_v53  ;;  %v491_v53 = vld [vmem:[#allocation5 + $0xb10] sm:$0xff] }
 0x19d   :  { %3353 = vmatprep.subr.bf16.mxu1 %v6386_v54  ;;  %v176_v54 = vld [vmem:[#allocation5 + $0x138] sm:$0xff]  ;;  %v6338_v33 = vcombine.high %v491_v53, %v495_v27 }
 0x19e   :  { %3313 = vmatpush1.bf16.msra.mxu0 %v6257_v34  ;;  %v483_v34 = vld [vmem:[#allocation5 + $0xad0] sm:$0xff] }
 0x19f   :  { %3314 = vmatprep.subr.bf16.mxu0 %v6250_v38  ;;  %v164_v38 = vld [vmem:[#allocation5 + $0xd8] sm:$0xff] }
 0x1a0   :  { %3354 = vmatpush1.bf16.msra.mxu1 %v6385_v37  ;;  %v487_v37 = vld [vmem:[#allocation5 + $0xaf0] sm:$0xff] }
 0x1a1   :  { %3355 = vmatprep.subr.bf16.mxu1 %v6378_v39  ;;  %v168_v39 = vld [vmem:[#allocation5 + $0xf8] sm:$0xff] }
 0x1a2   :  { %3315 = vmatpush1.bf16.msra.mxu0 %v6249_v45  ;;  %v6012_v42 = vcombine.high %v164_v38, %v168_v39  ;;  %v156_v45 = vld [vmem:[#allocation5 + $0x98] sm:$0xff] }
 0x1a3   :  { %3316 = vmatprep.subr.bf16.mxu0 %v6242_v46  ;;  %v6329_v46 = vcombine.low %v483_v34, %v487_v37 }
 0x1a4   :  { %3356 = vmatpush1.bf16.msra.mxu1 %v6377_v21  ;;  %v160_v21 = vld [vmem:[#allocation5 + $0xb8] sm:$0xff] }
 0x1a5   :  { %3357 = vmatprep.subr.bf16.mxu1 %v6370_v47  ;;  %v6011_v47 = vcombine.low %v164_v38, %v168_v39  ;;  %v6004_v49 = vcombine.high %v156_v45, %v160_v21 }
 0x1a6   :  { %3317 = vmatpush1.bf16.msra.mxu0 %v6241_v56  ;;  %v148_v56 = vld [vmem:[#allocation5 + $0x58] sm:$0xff] }
 0x1a7   :  { %3318 = vmatprep.subr.bf16.mxu0 %v6362_v61  ;;  %v6321_v61 = vcombine.low %v475_v43, %v479_v44  ;;  %v236_v43 = vld [vmem:[#allocation5 + $0x318] sm:$0xff] }
 0x1a8   :  { %3358 = vmatpush1.bf16.msra.mxu1 %v6369_v60  ;;  %v152_v60 = vld [vmem:[#allocation5 + $0x78] sm:$0xff] }
 0x1a9   :  { %3384 = vmatprep.subr.bf16.mxu1 %v6044_v62  ;;  %v3008_v13 = vpop.f32.mrf.mxu0  ;;  %v6003_v62 = vcombine.low %v156_v45, %v160_v21  ;;  %v5996_v1 = vcombine.high %v148_v56, %v152_v60  ;;  %v240_v44 = vld [vmem:[#allocation5 + $0x338] sm:$0xff] }
 0x1aa   :  { %v3009_v17 = vadd.f32 %v3008_v13, %v7580_v30  ;;  %3319 = vmatpush2.bf16.msra.mxu0 %v6361_v7  ;;  %v140_v7 = vld [vmem:[#allocation5 + $0x18] sm:$0xff] }
 0x1ab   :  { %3376 = vmatmul.mubr.bf16.vlgmr.msra.gmra.mxu1 %v7560_v3  ;;  %v3010_v20 = vpop.f32.mrf.mxu0  ;;  %3320 = vmatprep.subr.bf16.mxu0 %v6354_v9  ;;  %v172_v3 = vld [vmem:[#allocation5 + $0x118] sm:$0xff]  ;;  %v6313_v9 = vcombine.low %v467_v52, %v471_v55 }
 0x1ac   :  { %3385 = vmatpush1.bf16.msra.mxu1 %v6043_v8  ;;  %v7595_v24 = vadd.f32 %v7585_v50, %v3009_v17  ;;  %v3011_v25 = vadd.f32 %v3010_v20, %v7582_v41  ;;  %3416 = vmatprep.mubr.bf16.mxu1 %v7523_v58  ;;  %v6027_v50 = vcombine.low %v180_v14, %v184_v15  ;;  %v144_v8 = vld [vmem:[#allocation5 + $0x38] sm:$0xff] }
 0x1ad   :  { %3386 = vmatprep.subr.bf16.mxu1 %v6036_v10  ;;  %v3012_v30 = vpop.f32.mrf.mxu0  ;;  %v6020_v41 = vcombine.high %v172_v3, %v176_v54  ;;  %v6337_v58 = vcombine.low %v491_v53, %v495_v27  ;;  %v6019_v40 = vcombine.low %v172_v3, %v176_v54  ;;  %v5995_v10 = vcombine.low %v148_v56, %v152_v60  ;;  %v324_v13 = vld [vmem:[#allocation5 + $0x5d8] sm:$0xff] }
 0x1ae   :  { %v7600_v29 = vadd.f32 %v7588_v57, %v3011_v25  ;;  %3321 = vmatpush2.bf16.msra.mxu0 %v6353_v18  ;;  %v6330_v57 = vcombine.high %v483_v34, %v487_v37  ;;  %v5988_v12 = vcombine.high %v140_v7, %v144_v8  ;;  %v328_v14 = vld [vmem:[#allocation5 + $0x5f8] sm:$0xff]  ;;  %v6305_v18 = vcombine.low %v459_v4, %v463_v5 }
 0x1af   :  { %v3013_v32 = vpop.f32.mrf.mxu0  ;;  %3322 = vmatprep.subr.bf16.mxu0 %v6346_v23  ;;  %v260_v15 = vld [vmem:[#allocation5 + $0x3d8] sm:$0xff]  ;;  %v5987_v20 = vcombine.low %v140_v7, %v144_v8  ;;  %v6171_v30 = vcombine.low %v324_v13, %v328_v14 }
 0x1b0   :  { %3387 = vmatpush1.bf16.msra.mxu1 %v6035_v22  ;;  %v264_v17 = vld [vmem:[#allocation5 + $0x3f8] sm:$0xff]  ;;  %v6172_v22 = vcombine.high %v324_v13, %v328_v14 }
 0x1b1   :  { %3388 = vmatprep.subr.bf16.mxu1 %v6028_v26  ;;  %v6108_v23 = vcombine.high %v260_v15, %v264_v17  ;;  %v316_v25 = vld [vmem:[#allocation5 + $0x598] sm:$0xff]  ;;  %v6107_v3 = vcombine.low %v260_v15, %v264_v17 }
 0x1b2   :  { %3323 = vmatpush2.bf16.msra.mxu0 %v6345_v31  ;;  %v320_v26 = vld [vmem:[#allocation5 + $0x5b8] sm:$0xff] }
 0x1b3   :  { %3324 = vmatprep.subr.bf16.mxu0 %v6338_v33  ;;  %v252_v53 = vld [vmem:[#allocation5 + $0x398] sm:$0xff]  ;;  %v6164_v54 = vcombine.high %v316_v25, %v320_v26  ;;  %v6163_v37 = vcombine.low %v316_v25, %v320_v26 }
 0x1b4   :  { %3389 = vmatpush1.bf16.msra.mxu1 %v6027_v50  ;;  %v256_v27 = vld [vmem:[#allocation5 + $0x3b8] sm:$0xff] }
 0x1b5   :  { %3390 = vmatprep.subr.bf16.mxu1 %v6020_v41  ;;  %v6100_v31 = vcombine.high %v252_v53, %v256_v27  ;;  %v308_v32 = vld [vmem:[#allocation5 + $0x558] sm:$0xff]  ;;  %v6099_v38 = vcombine.low %v252_v53, %v256_v27 }
 0x1b6   :  { %3325 = vmatpush2.bf16.msra.mxu0 %v6337_v58  ;;  %v312_v50 = vld [vmem:[#allocation5 + $0x578] sm:$0xff] }
 0x1b7   :  { %3326 = vmatprep.subr.bf16.mxu0 %v6330_v57  ;;  %v244_v33 = vld [vmem:[#allocation5 + $0x358] sm:$0xff]  ;;  %v6156_v39 = vcombine.high %v308_v32, %v312_v50  ;;  %v6155_v21 = vcombine.low %v308_v32, %v312_v50 }
 0x1b8   :  { %3391 = vmatpush1.bf16.msra.mxu1 %v6019_v40  ;;  %v248_v41 = vld [vmem:[#allocation5 + $0x378] sm:$0xff] }
 0x1b9   :  { %3392 = vmatprep.subr.bf16.mxu1 %v6012_v42  ;;  %v6092_v40 = vcombine.high %v244_v33, %v248_v41  ;;  %v300_v57 = vld [vmem:[#allocation5 + $0x518] sm:$0xff] }
 0x1ba   :  { %3327 = vmatpush2.bf16.msra.mxu0 %v6329_v46  ;;  %v304_v42 = vld [vmem:[#allocation5 + $0x538] sm:$0xff]  ;;  %v6091_v46 = vcombine.low %v244_v33, %v248_v41 }
 0x1bb   :  { %3328 = vmatprep.subr.bf16.mxu0 %v6322_v48  ;;  %v6084_v48 = vcombine.high %v236_v43, %v240_v44  ;;  %v296_v52 = vld [vmem:[#allocation5 + $0x4f8] sm:$0xff]  ;;  %v6147_v60 = vcombine.low %v300_v57, %v304_v42 }
 0x1bc   :  { %3393 = vmatpush1.bf16.msra.mxu1 %v6011_v47  ;;  %v6148_v47 = vcombine.high %v300_v57, %v304_v42  ;;  %v228_v55 = vld [vmem:[#allocation5 + $0x2d8] sm:$0xff] }
 0x1bd   :  { %3394 = vmatprep.subr.bf16.mxu1 %v6004_v49  ;;  %v292_v49 = vld [vmem:[#allocation5 + $0x4d8] sm:$0xff] }
 0x1be   :  { %3329 = vmatpush2.bf16.msra.mxu0 %v6321_v61  ;;  %v232_v56 = vld [vmem:[#allocation5 + $0x2f8] sm:$0xff]  ;;  %v6083_v61 = vcombine.low %v236_v43, %v240_v44  ;;  %v6139_v8 = vcombine.low %v292_v49, %v296_v52 }
 0x1bf   :  { %3330 = vmatprep.subr.bf16.mxu0 %v6314_v63  ;;  %v6076_v63 = vcombine.high %v228_v55, %v232_v56  ;;  %v288_v4 = vld [vmem:[#allocation5 + $0x4b8] sm:$0xff] }
 0x1c0   :  { %3395 = vmatpush1.bf16.msra.mxu1 %v6003_v62  ;;  %v6140_v62 = vcombine.high %v292_v49, %v296_v52  ;;  %v220_v5 = vld [vmem:[#allocation5 + $0x298] sm:$0xff] }
 0x1c1   :  { %3396 = vmatprep.subr.bf16.mxu1 %v5996_v1  ;;  %v284_v1 = vld [vmem:[#allocation5 + $0x498] sm:$0xff] }
 0x1c2   :  { %3331 = vmatpush2.bf16.msra.mxu0 %v6313_v9  ;;  %v224_v7 = vld [vmem:[#allocation5 + $0x2b8] sm:$0xff]  ;;  %v6075_v9 = vcombine.low %v228_v55, %v232_v56  ;;  %v6131_v17 = vcombine.low %v284_v1, %v288_v4 }
 0x1c3   :  { %3332 = vmatprep.subr.bf16.mxu0 %v6306_v11  ;;  %v6068_v11 = vcombine.high %v220_v5, %v224_v7  ;;  %v280_v13 = vld [vmem:[#allocation5 + $0x478] sm:$0xff] }
 0x1c4   :  { %3397 = vmatpush1.bf16.msra.mxu1 %v5995_v10  ;;  %v6132_v10 = vcombine.high %v284_v1, %v288_v4  ;;  %v212_v14 = vld [vmem:[#allocation5 + $0x258] sm:$0xff] }
 0x1c5   :  { %3398 = vmatprep.subr.bf16.mxu1 %v5988_v12  ;;  %v276_v12 = vld [vmem:[#allocation5 + $0x458] sm:$0xff] }
 0x1c6   :  { %3333 = vmatpush2.bf16.msra.mxu0 %v6305_v18  ;;  %v216_v15 = vld [vmem:[#allocation5 + $0x278] sm:$0xff]  ;;  %v6067_v18 = vcombine.low %v220_v5, %v224_v7  ;;  %v6123_v27 = vcombine.low %v276_v12, %v280_v13 }
 0x1c7   :  { %3425 = vmatprep.subr.bf16.mxu0 %v6172_v22  ;;  %v6060_v22 = vcombine.high %v212_v14, %v216_v15  ;;  %v272_v25 = vld [vmem:[#allocation5 + $0x438] sm:$0xff] }
 0x1c8   :  { %3399 = vmatpush1.bf16.msra.mxu1 %v5987_v20  ;;  %v6124_v20 = vcombine.high %v276_v12, %v280_v13  ;;  %v204_v26 = vld [vmem:[#allocation5 + $0x218] sm:$0xff] }
 0x1c9   :  { %3400 = vmatprep.subr.bf16.mxu1 %v6108_v23  ;;  %3335 = vmatmul.mubr.bf16.vlgmr.msra.gmra.mxu0 %v7552_v35  ;;  %v268_v23 = vld [vmem:[#allocation5 + $0x418] sm:$0xff] }
 0x1ca   :  { %3426 = vmatpush1.bf16.msra.mxu0 %v6171_v30  ;;  %3457 = vmatprep.mubr.bf16.mxu0 %v7527_v59  ;;  %v208_v53 = vld [vmem:[#allocation5 + $0x238] sm:$0xff]  ;;  %v6059_v30 = vcombine.low %v212_v14, %v216_v15 }
 0x1cb   :  { %v7603_v34 = vpop.f32.mrf.mxu1  ;;  %3427 = vmatprep.subr.bf16.mxu0 %v6164_v54  ;;  %v597_v54 = vsub.s32 2, %v7566_v51  ;;  %v388_v32 = vld [vmem:[#allocation5 + $0x7d8] sm:$0xff] }
 0x1cc   :  { %3401 = vmatpush2.bf16.msra.mxu1 %v6107_v3  ;;  %v6116_v3 = vcombine.high %v268_v23, %v272_v25  ;;  %v392_v50 = vld [vmem:[#allocation5 + $0x7f8] sm:$0xff] }
 0x1cd   :  { %v7606_v58 = vpop.f32.mrf.mxu1  ;;  %3402 = vmatprep.subr.bf16.mxu1 %v6100_v31  ;;  %v6052_v31 = vcombine.high %v204_v26, %v208_v53  ;;  %v452_v33 = vld [vmem:[#allocation5 + $0x9d8] sm:$0xff] }
 0x1ce   :  { %3428 = vmatpush1.bf16.msra.mxu0 %v6163_v37  ;;  %v456_v41 = vld [vmem:[#allocation5 + $0x9f8] sm:$0xff]  ;;  %v6115_v37 = vcombine.low %v268_v23, %v272_v25 }
 0x1cf   :  { %v3094_v45 = vpop.f32.mrf.mxu1  ;;  %3429 = vmatprep.subr.bf16.mxu0 %v6156_v39  ;;  %v6236_v39 = vcombine.high %v388_v32, %v392_v50  ;;  %v6300_v57 = vcombine.high %v452_v33, %v456_v41  ;;  %v380_v42 = vld [vmem:[#allocation5 + $0x798] sm:$0xff] }
 0x1d0   :  { %3403 = vmatpush2.bf16.msra.mxu1 %v6099_v38  ;;  %v6051_v38 = vcombine.low %v204_v26, %v208_v53  ;;  %v384_v43 = vld [vmem:[#allocation5 + $0x7b8] sm:$0xff] }
 0x1d1   :  { %v3095_v59 = vpop.f32.mrf.mxu1  ;;  %3404 = vmatprep.subr.bf16.mxu1 %v6092_v40  ;;  %v598_v40 = vrot.slane %v7571_v2, %v597_v54  ;;  %v444_v44 = vld [vmem:[#allocation5 + $0x998] sm:$0xff] }
 0x1d2   :  { %3430 = vmatpush1.bf16.msra.mxu0 %v6155_v21  ;;  %v448_v45 = vld [vmem:[#allocation5 + $0x9b8] sm:$0xff]  ;;  %v6235_v21 = vcombine.low %v388_v32, %v392_v50 }
 0x1d3   :  { %3431 = vmatprep.subr.bf16.mxu0 %v6148_v47  ;;  %v6228_v47 = vcombine.high %v380_v42, %v384_v43  ;;  %v3091_v59 = vadd.f32 %v7603_v34, %v598_v40  ;;  %v372_v49 = vld [vmem:[#allocation5 + $0x758] sm:$0xff] }
 0x1d4   :  { %3405 = vmatpush2.bf16.msra.mxu1 %v6091_v46  ;;  %v6299_v46 = vcombine.low %v452_v33, %v456_v41  ;;  %v376_v52 = vld [vmem:[#allocation5 + $0x778] sm:$0xff] }
 0x1d5   :  { %3406 = vmatprep.subr.bf16.mxu1 %v6084_v48  ;;  %v6292_v48 = vcombine.high %v444_v44, %v448_v45  ;;  %v436_v2 = vld [vmem:[#allocation5 + $0x958] sm:$0xff]  ;;  %v6220_v1 = vcombine.high %v372_v49, %v376_v52 }
 0x1d6   :  { %3432 = vmatpush1.bf16.msra.mxu0 %v6147_v60  ;;  %v440_v56 = vld [vmem:[#allocation5 + $0x978] sm:$0xff] }
 0x1d7   :  { %3433 = vmatprep.subr.bf16.mxu0 %v6140_v62  ;;  %v6284_v34 = vcombine.high %v436_v2, %v440_v56  ;;  %v364_v4 = vld [vmem:[#allocation5 + $0x718] sm:$0xff] }
 0x1d8   :  { %3407 = vmatpush2.bf16.msra.mxu1 %v6083_v61  ;;  %v6227_v61 = vcombine.low %v380_v42, %v384_v43  ;;  %v368_v5 = vld [vmem:[#allocation5 + $0x738] sm:$0xff] }
 0x1d9   :  { %3408 = vmatprep.subr.bf16.mxu1 %v6076_v63  ;;  %v6291_v63 = vcombine.low %v444_v44, %v448_v45  ;;  %v6212_v12 = vcombine.high %v364_v4, %v368_v5  ;;  %v356_v14 = vld [vmem:[#allocation5 + $0x6d8] sm:$0xff] }
 0x1da   :  { %3434 = vmatpush1.bf16.msra.mxu0 %v6139_v8  ;;  %v428_v8 = vld [vmem:[#allocation5 + $0x918] sm:$0xff] }
 0x1db   :  { %3435 = vmatprep.subr.bf16.mxu0 %v6132_v10  ;;  %v6219_v10 = vcombine.low %v372_v49, %v376_v52  ;;  %v360_v15 = vld [vmem:[#allocation5 + $0x6f8] sm:$0xff] }
 0x1dc   :  { %3409 = vmatpush2.bf16.msra.mxu1 %v6075_v9  ;;  %v432_v9 = vld [vmem:[#allocation5 + $0x938] sm:$0xff] }
 0x1dd   :  { %3410 = vmatprep.subr.bf16.mxu1 %v6068_v11  ;;  %v6283_v11 = vcombine.low %v436_v2, %v440_v56  ;;  %v6276_v13 = vcombine.high %v428_v8, %v432_v9  ;;  %v348_v25 = vld [vmem:[#allocation5 + $0x698] sm:$0xff] }
 0x1de   :  { %3436 = vmatpush1.bf16.msra.mxu0 %v6131_v17  ;;  %v420_v17 = vld [vmem:[#allocation5 + $0x8d8] sm:$0xff] }
 0x1df   :  { %3437 = vmatprep.subr.bf16.mxu0 %v6124_v20  ;;  %v6211_v20 = vcombine.low %v364_v4, %v368_v5  ;;  %v352_v26 = vld [vmem:[#allocation5 + $0x6b8] sm:$0xff] }
 0x1e0   :  { %3411 = vmatpush2.bf16.msra.mxu1 %v6067_v18  ;;  %v424_v18 = vld [vmem:[#allocation5 + $0x8f8] sm:$0xff] }
 0x1e1   :  { %3412 = vmatprep.subr.bf16.mxu1 %v6060_v22  ;;  %v6204_v22 = vcombine.high %v356_v14, %v360_v15  ;;  %v6268_v23 = vcombine.high %v420_v17, %v424_v18  ;;  %v412_v53 = vld [vmem:[#allocation5 + $0x898] sm:$0xff] }
 0x1e2   :  { %3438 = vmatpush1.bf16.msra.mxu0 %v6123_v27  ;;  %v416_v27 = vld [vmem:[#allocation5 + $0x8b8] sm:$0xff] }
 0x1e3   :  { %3439 = vmatprep.subr.bf16.mxu0 %v6116_v3  ;;  %v6267_v3 = vcombine.low %v420_v17, %v424_v18  ;;  %v6260_v32 = vcombine.high %v412_v53, %v416_v27  ;;  %v340_v50 = vld [vmem:[#allocation5 + $0x658] sm:$0xff] }
 0x1e4   :  { %3413 = vmatpush2.bf16.msra.mxu1 %v6059_v30  ;;  %v6203_v30 = vcombine.low %v356_v14, %v360_v15  ;;  %v344_v33 = vld [vmem:[#allocation5 + $0x678] sm:$0xff] }
 0x1e5   :  { %3414 = vmatprep.subr.bf16.mxu1 %v6052_v31  ;;  %v6196_v31 = vcombine.high %v348_v25, %v352_v26  ;;  %v404_v41 = vld [vmem:[#allocation5 + $0x858] sm:$0xff]  ;;  %v6188_v40 = vcombine.high %v340_v50, %v344_v33 }
 0x1e6   :  { %3440 = vmatpush1.bf16.msra.mxu0 %v6115_v37  ;;  %v408_v37 = vld [vmem:[#allocation5 + $0x878] sm:$0xff] }
 0x1e7   :  { %3441 = vmatprep.subr.bf16.mxu0 %v6236_v39  ;;  %v6259_v39 = vcombine.low %v412_v53, %v416_v27  ;;  %v332_v42 = vld [vmem:[#allocation5 + $0x618] sm:$0xff] }
 0x1e8   :  { %3415 = vmatpush2.bf16.msra.mxu1 %v6051_v38  ;;  %v6195_v38 = vcombine.low %v348_v25, %v352_v26  ;;  %v336_v43 = vld [vmem:[#allocation5 + $0x638] sm:$0xff] }
 0x1e9   :  { %3466 = vmatprep.subr.bf16.mxu1 %v6300_v57  ;;  %v3131_v55 = vpop.f32.mrf.mxu0  ;;  %v6252_v57 = vcombine.high %v404_v41, %v408_v37  ;;  %v396_v44 = vld [vmem:[#allocation5 + $0x818] sm:$0xff]  ;;  %v6179_v2 = vcombine.low %v332_v42, %v336_v43 }
 0x1ea   :  { %v7613_v60 = vadd.f32 %v3131_v55, %v3091_v59  ;;  %3442 = vmatpush2.bf16.msra.mxu0 %v6235_v21  ;;  %v400_v45 = vld [vmem:[#allocation5 + $0x838] sm:$0xff]  ;;  %v6187_v21 = vcombine.low %v340_v50, %v344_v33 }
 0x1eb   :  { %3417 = vmatmul.mubr.bf16.vlgmr.msra.gmra.mxu1 %v7533_v16  ;;  %v7616_v62 = vpop.f32.mrf.mxu0  ;;  %3443 = vmatprep.subr.bf16.mxu0 %v6228_v47  ;;  %v6180_v47 = vcombine.high %v332_v42, %v336_v43  ;;  %v6244_v59 = vcombine.high %v396_v44, %v400_v45  ;;  %v584_v49 = vld [vmem:[#allocation5 + $0xdf8] sm:$0xff]  ;;  %v6243_v56 = vcombine.low %v396_v44, %v400_v45 }
 0x1ec   :  { %3467 = vmatpush1.bf16.msra.mxu1 %v6299_v46  ;;  %3498 = vmatprep.mubr.bf16.mxu1 %v7544_v28  ;;  %v6275_v28 = vcombine.low %v428_v8, %v432_v9  ;;  %v6251_v46 = vcombine.low %v404_v41, %v408_v37  ;;  %v516_v52 = vld [vmem:[#allocation5 + $0xbd8] sm:$0xff] }
 0x1ed   :  { %3468 = vmatprep.subr.bf16.mxu1 %v6292_v48  ;;  %v3135_v7 = vpop.f32.mrf.mxu0  ;;  %v580_v48 = vld [vmem:[#allocation5 + $0xdd8] sm:$0xff] }
 0x1ee   :  { %3444 = vmatpush2.bf16.msra.mxu0 %v6227_v61  ;;  %v520_v55 = vld [vmem:[#allocation5 + $0xbf8] sm:$0xff]  ;;  %v6428_v61 = vcombine.high %v580_v48, %v584_v49  ;;  %v6427_v7 = vcombine.low %v580_v48, %v584_v49  ;;  %v7629_v48 = vld [vmem:[#allocation7] sm:$0xff] }
 0x1ef   :  { %v3136_v16 = vpop.f32.mrf.mxu0  ;;  %3445 = vmatprep.subr.bf16.mxu0 %v6220_v1  ;;  %v572_v1 = vld [vmem:[#allocation5 + $0xd98] sm:$0xff]  ;;  %v6363_v8 = vcombine.low %v516_v52, %v520_v55 }
 0x1f0   :  { %3469 = vmatpush1.bf16.msra.mxu1 %v6291_v63  ;;  %v6364_v63 = vcombine.high %v516_v52, %v520_v55  ;;  %v508_v4 = vld [vmem:[#allocation5 + $0xb98] sm:$0xff] }
 0x1f1   :  { %3470 = vmatprep.subr.bf16.mxu1 %v6284_v34  ;;  %v576_v34 = vld [vmem:[#allocation5 + $0xdb8] sm:$0xff] }
 0x1f2   :  { %3446 = vmatpush2.bf16.msra.mxu0 %v6219_v10  ;;  %v512_v5 = vld [vmem:[#allocation5 + $0xbb8] sm:$0xff]  ;;  %v6420_v9 = vcombine.high %v572_v1, %v576_v34  ;;  %v6419_v17 = vcombine.low %v572_v1, %v576_v34 }
 0x1f3   :  { %3447 = vmatprep.subr.bf16.mxu0 %v6212_v12  ;;  %v6356_v10 = vcombine.high %v508_v4, %v512_v5  ;;  %v564_v16 = vld [vmem:[#allocation5 + $0xd58] sm:$0xff] }
 0x1f4   :  { %3471 = vmatpush1.bf16.msra.mxu1 %v6283_v11  ;;  %v568_v11 = vld [vmem:[#allocation5 + $0xd78] sm:$0xff] }
 0x1f5   :  { %3472 = vmatprep.subr.bf16.mxu1 %v6276_v13  ;;  %v500_v13 = vld [vmem:[#allocation5 + $0xb58] sm:$0xff] }
 0x1f6   :  { %3448 = vmatpush2.bf16.msra.mxu0 %v6211_v20  ;;  %v504_v14 = vld [vmem:[#allocation5 + $0xb78] sm:$0xff] }
 0x1f7   :  { %3449 = vmatprep.subr.bf16.mxu0 %v6204_v22  ;;  %v6412_v22 = vcombine.high %v564_v16, %v568_v11  ;;  %v6348_v25 = vcombine.high %v500_v13, %v504_v14  ;;  %v560_v26 = vld [vmem:[#allocation5 + $0xd38] sm:$0xff] }
 0x1f8   :  { %3473 = vmatpush1.bf16.msra.mxu1 %v6275_v28  ;;  %v6355_v28 = vcombine.low %v508_v4, %v512_v5  ;;  %v548_v37 = vld [vmem:[#allocation5 + $0xcd8] sm:$0xff] }
 0x1f9   :  { %3474 = vmatprep.subr.bf16.mxu1 %v6268_v23  ;;  %v468_v1 = vld [vmem:[#allocation5 + $0xa58] sm:$0xff] }
 0x1fa   :  { %3450 = vmatpush2.bf16.msra.mxu0 %v6203_v30  ;;  %v492_v30 = vld [vmem:[#allocation5 + $0xb18] sm:$0xff] }
 0x1fb   :  { %3451 = vmatprep.subr.bf16.mxu0 %v6196_v31  ;;  %v472_v34 = vld [vmem:[#allocation5 + $0xa78] sm:$0xff] }
 0x1fc   :  { %3475 = vmatpush1.bf16.msra.mxu1 %v6267_v3  ;;  %v496_v3 = vld [vmem:[#allocation5 + $0xb38] sm:$0xff] }
 0x1fd   :  { %3476 = vmatprep.subr.bf16.mxu1 %v6260_v32  ;;  %v6347_v32 = vcombine.low %v500_v13, %v504_v14  ;;  %v6340_v41 = vcombine.high %v492_v30, %v496_v3  ;;  %v6339_v43 = vcombine.low %v492_v30, %v496_v3  ;;  %v464_v13 = vld [vmem:[#allocation5 + $0xa38] sm:$0xff] }
 0x1fe   :  { %3452 = vmatpush2.bf16.msra.mxu0 %v6195_v38  ;;  %v552_v38 = vld [vmem:[#allocation5 + $0xcf8] sm:$0xff] }
 0x1ff   :  { %3453 = vmatprep.subr.bf16.mxu0 %v6188_v40  ;;  %v488_v40 = vld [vmem:[#allocation5 + $0xaf8] sm:$0xff]  ;;  %v6396_v44 = vcombine.high %v548_v37, %v552_v38  ;;  %v6395_v52 = vcombine.low %v548_v37, %v552_v38 }
 0x200   :  { %3477 = vmatpush1.bf16.msra.mxu1 %v6259_v39  ;;  %v484_v39 = vld [vmem:[#allocation5 + $0xad8] sm:$0xff] }
 0x201   :  { %3478 = vmatprep.subr.bf16.mxu1 %v6252_v57  ;;  %v601_v57 = vsub.s32 3, %v7566_v51  ;;  %v6332_v45 = vcombine.high %v484_v39, %v488_v40  ;;  %v6331_v55 = vcombine.low %v484_v39, %v488_v40  ;;  %v6774_v30 = vld [vmem:[#allocation8 + $0x2e0] ss:$16 sps:$4 sm:$0xff]   ;;  %v6779_v3 = vld [vmem:[#allocation8 + $0xc4] ss:$16 sps:$4 sm:$0xff]  }
 0x202   :  { %3454 = vmatpush2.bf16.msra.mxu0 %v6187_v21  ;;  %v540_v21 = vld [vmem:[#allocation5 + $0xc98] sm:$0xff] }
 0x203   :  { %3455 = vmatprep.subr.bf16.mxu0 %v6180_v47  ;;  %v476_v47 = vld [vmem:[#allocation5 + $0xa98] sm:$0xff]  ;;  %v602_v49 = vrot.slane %v7629_v48, %v601_v57 }
 0x204   :  { %3479 = vmatpush1.bf16.msra.mxu1 %v6251_v46  ;;  %v544_v46 = vld [vmem:[#allocation5 + $0xcb8] sm:$0xff] }
 0x205   :  { %3480 = vmatprep.subr.bf16.mxu1 %v6244_v59  ;;  %v480_v59 = vld [vmem:[#allocation5 + $0xab8] sm:$0xff]  ;;  %v3093_v4 = vadd.f32 %v7606_v58, %v602_v49  ;;  %v6387_v5 = vcombine.low %v540_v21, %v544_v46  ;;  %v6315_v58 = vcombine.low %v468_v1, %v472_v34 }
 0x206   :  { %3456 = vmatpush2.bf16.msra.mxu0 %v6179_v2  ;;  %v6388_v2 = vcombine.high %v540_v21, %v544_v46  ;;  %v6786_v37 = vld [vmem:[#allocation8 + $0x2a0] ss:$16 sps:$4 sm:$0xff]   ;;  %v6791_v38 = vld [vmem:[#allocation8 + $0x84] ss:$16 sps:$4 sm:$0xff]  }
 0x207   :  { %3507 = vmatprep.subr.bf16.mxu0 %v6428_v61  ;;  %v532_v61 = vld [vmem:[#allocation5 + $0xc58] sm:$0xff] }
 0x208   :  { %3481 = vmatpush1.bf16.msra.mxu1 %v6243_v56  ;;  %v6324_v56 = vcombine.high %v476_v47, %v480_v59  ;;  %v6789_v39 = vld [vmem:[#allocation8 + $0x80] ss:$16 sps:$4 sm:$0xff]   ;;  %v6803_v21 = vld [vmem:[#allocation8 + $0x44] ss:$16 sps:$4 sm:$0xff]  }
 0x209   :  { %3482 = vmatprep.subr.bf16.mxu1 %v6364_v63  ;;  %v3213_v12 = vpop.f32.mrf.mxu0  ;;  %3458 = vmatmul.mubr.bf16.vlgmr.msra.gmra.mxu0 %v7537_v19  ;;  %v556_v19 = vld [vmem:[#allocation5 + $0xd18] sm:$0xff] }
 0x20a   :  { %3508 = vmatpush1.bf16.msra.mxu0 %v6427_v7  ;;  %3539 = vmatprep.mubr.bf16.mxu0 %v7442_v36  ;;  %v6404_v50 = vcombine.high %v556_v19, %v560_v26  ;;  %v6403_v42 = vcombine.low %v556_v19, %v560_v26  ;;  %v536_v63 = vld [vmem:[#allocation5 + $0xc78] sm:$0xff]  ;;  %v6323_v7 = vcombine.low %v476_v47, %v480_v59 }
 0x20b   :  { %v3172_v15 = vpop.f32.mrf.mxu1  ;;  %v7622_v20 = vpop.f32.mrf.mxu0  ;;  %3509 = vmatprep.subr.bf16.mxu0 %v6420_v9  ;;  %v3134_v9 = vadd.f32 %v7616_v62, %v3093_v4  ;;  %v6776_v19 = vld [vmem:[#allocation8 + $0x2e4] ss:$16 sps:$4 sm:$0xff]   ;;  %v6792_v40 = vld [vmem:[#allocation8 + $0x280] ss:$16 sps:$4 sm:$0xff]  }
 0x20c   :  { %v3173_v18 = vadd.f32 %v3172_v15, %v7613_v60  ;;  %3483 = vmatpush2.bf16.msra.mxu1 %v6363_v8  ;;  %v6411_v60 = vcombine.low %v564_v16, %v568_v11  ;;  %v6380_v8 = vcombine.high %v532_v61, %v536_v63  ;;  %v524_v16 = vld [vmem:[#allocation5 + $0xc18] sm:$0xff]  ;;  %v6379_v15 = vcombine.low %v532_v61, %v536_v63 }
 0x20d   :  { %v7624_v23 = vpop.f32.mrf.mxu1  ;;  %3484 = vmatprep.subr.bf16.mxu1 %v6356_v10  ;;  %v3217_v27 = vpop.f32.mrf.mxu0  ;;  %v6316_v10 = vcombine.high %v468_v1, %v472_v34  ;;  %v528_v11 = vld [vmem:[#allocation5 + $0xc38] sm:$0xff]  ;;  %v605_v1 = vsub.s32 4, %v7566_v51 }
 0x20e   :  { %v7626_v53 = vadd.f32 %v3213_v12, %v3173_v18  ;;  %3510 = vmatpush1.bf16.msra.mxu0 %v6419_v17  ;;  %v460_v12 = vld [vmem:[#allocation5 + $0xa18] sm:$0xff]  ;;  %v3175_v14 = vadd.f32 %v7624_v23, %v3134_v9  ;;  %v6372_v17 = vcombine.high %v524_v16, %v528_v11  ;;  %v6371_v62 = vcombine.low %v524_v16, %v528_v11 }
 0x20f   :  { %v3176_v36 = vpop.f32.mrf.mxu1  ;;  %v3218_v31 = vpop.f32.mrf.mxu0  ;;  %3511 = vmatprep.subr.bf16.mxu0 %v6412_v22  ;;  %v6308_v18 = vcombine.high %v460_v12, %v464_v13  ;;  %v6307_v22 = vcombine.low %v460_v12, %v464_v13  ;;  %v3549_v23 = vmax.f32 %v7600_v29, 0.0  ;;  %v6771_v27 = vld [vmem:[#allocation8 + $0xe0] ss:$16 sps:$4 sm:$0xff]   ;;  %v6806_v46 = vld [vmem:[#allocation8 + $0x244] ss:$16 sps:$4 sm:$0xff]  }
 0x210   :  { %3485 = vmatpush2.bf16.msra.mxu1 %v6355_v28  ;;  %v3216_v28 = vadd.f32 %v7622_v20, %v3175_v14  ;;  %v7257_v20 = vld [vmem:[#allocation3 + $0x18] ss:$0 sps:$4 sm:$0xff]   ;;  %v6780_v29 = vld [vmem:[#allocation8 + $0x2c0] ss:$16 sps:$4 sm:$0xff]  }
 0x211   :  { %v3177_v33 = vpop.f32.mrf.mxu1  ;;  %3486 = vmatprep.subr.bf16.mxu1 %v6348_v25  ;;  %v6773_v25 = vld [vmem:[#allocation8 + $0xe4] ss:$16 sps:$4 sm:$0xff]   ;;  %v7639_v36 = vpack.c.bf16 %v3549_v23, %v3549_v23  ;;  %v6801_v47 = vld [vmem:[#allocation8 + $0x40] ss:$16 sps:$4 sm:$0xff]  }
 0x212   :  { %3512 = vmatpush1.bf16.msra.mxu0 %v6411_v60  ;;  %v3551_v26 = vmax.f32 %v3216_v28, 0.0  ;;  %v6782_v60 = vld [vmem:[#allocation8 + $0x2c4] ss:$16 sps:$4 sm:$0xff]   ;;  %v6804_v59 = vld [vmem:[#allocation8 + $0x240] ss:$16 sps:$4 sm:$0xff]  }
 0x213   :  { %3513 = vmatprep.subr.bf16.mxu0 %v6404_v50  ;;  %v6785_v50 = vld [vmem:[#allocation8 + $0xa4] ss:$16 sps:$4 sm:$0xff]   ;;  %v6813_v63 = vld [vmem:[#allocation8] ss:$16 sps:$4 sm:$0xff]  }
 0x214   :  { %3487 = vmatpush2.bf16.msra.mxu1 %v6347_v32  ;;  %v7641_v31 = vpack.c.bf16 %v3551_v26, %v3551_v26  ;;  %v6777_v32 = vld [vmem:[#allocation8 + $0xc0] ss:$16 sps:$4 sm:$0xff]   ;;  %v6788_v33 = vld [vmem:[#allocation8 + $0x2a4] ss:$16 sps:$4 sm:$0xff]  }
 0x215   :  { %3488 = vmatprep.subr.bf16.mxu1 %v6340_v41  ;;  %v6783_v41 = vld [vmem:[#allocation8 + $0xa0] ss:$16 sps:$4 sm:$0xff]   ;;  %v6809_v49 = vld [vmem:[#allocation8 + $0x24] ss:$16 sps:$4 sm:$0xff]  }
 0x216   :  { %3514 = vmatpush1.bf16.msra.mxu0 %v6403_v42  ;;  %v6797_v42 = vld [vmem:[#allocation8 + $0x64] ss:$16 sps:$4 sm:$0xff]   ;;  %v6816_v34 = vld [vmem:[#allocation8 + $0x200] ss:$16 sps:$4 sm:$0xff]  }
 0x217   :  { %3515 = vmatprep.subr.bf16.mxu0 %v6396_v44  ;;  %v6795_v44 = vld [vmem:[#allocation8 + $0x60] ss:$16 sps:$4 sm:$0xff]   ;;  %v6818_v61 = vld [vmem:[#allocation8 + $0x204] ss:$16 sps:$4 sm:$0xff]  }
 0x218   :  { %3489 = vmatpush2.bf16.msra.mxu1 %v6339_v43  ;;  %v6800_v43 = vld [vmem:[#allocation8 + $0x264] ss:$16 sps:$4 sm:$0xff]   ;;  %v6822_v9 = vld [vmem:[#allocation8 + $0x3e0] ss:$16 sps:$4 sm:$0xff]  }
 0x219   :  { %3490 = vmatprep.subr.bf16.mxu1 %v6332_v45  ;;  %v6798_v45 = vld [vmem:[#allocation8 + $0x260] ss:$16 sps:$4 sm:$0xff]   ;;  %v6821_v4 = vld [vmem:[#allocation8 + $0x1e4] ss:$16 sps:$4 sm:$0xff]  }
 0x21a   :  { %3516 = vmatpush1.bf16.msra.mxu0 %v6395_v52  ;;  %v6812_v52 = vld [vmem:[#allocation8 + $0x224] ss:$16 sps:$4 sm:$0xff]   ;;  %v6825_v14 = vld [vmem:[#allocation8 + $0x1c0] ss:$16 sps:$4 sm:$0xff]  }
 0x21b   :  { %3517 = vmatprep.subr.bf16.mxu0 %v6388_v2  ;;  %v6810_v2 = vld [vmem:[#allocation8 + $0x220] ss:$16 sps:$4 sm:$0xff]   ;;  %v6830_v16 = vld [vmem:[#allocation8 + $0x3c4] ss:$16 sps:$4 sm:$0xff]  }
 0x21c   :  { %3491 = vmatpush2.bf16.msra.mxu1 %v6331_v55  ;;  %v6807_v55 = vld [vmem:[#allocation8 + $0x20] ss:$16 sps:$4 sm:$0xff]  }
 0x21d   :  { %3492 = vmatprep.subr.bf16.mxu1 %v6324_v56  ;;  %v6815_v56 = vld [vmem:[#allocation8 + $0x4] ss:$16 sps:$4 sm:$0xff]   ;;  %v6834_v26 = vld [vmem:[#allocation8 + $0x3a0] ss:$16 sps:$4 sm:$0xff]  }
 0x21e   :  { %3518 = vmatpush1.bf16.msra.mxu0 %v6387_v5  ;;  %v6824_v5 = vld [vmem:[#allocation8 + $0x3e4] ss:$16 sps:$4 sm:$0xff]  }
 0x21f   :  { %3519 = vmatprep.subr.bf16.mxu0 %v6380_v8  ;;  %v6819_v8 = vld [vmem:[#allocation8 + $0x1e0] ss:$16 sps:$4 sm:$0xff]  }
 0x220   :  { %3493 = vmatpush2.bf16.msra.mxu1 %v6323_v7  ;;  %v606_v7 = vrot.slane %v7629_v48, %v605_v1 }
 0x221   :  { %3494 = vmatprep.subr.bf16.mxu1 %v6316_v10  ;;  %v6827_v10 = vld [vmem:[#allocation8 + $0x1c4] ss:$16 sps:$4 sm:$0xff]  }
 0x222   :  { %3520 = vmatpush1.bf16.msra.mxu0 %v6379_v15 }
 0x223   :  { %3521 = vmatprep.subr.bf16.mxu0 %v6372_v17  ;;  %v6833_v17 = vld [vmem:[#allocation8 + $0x1a4] ss:$16 sps:$4 sm:$0xff]  }
 0x224   :  { %3495 = vmatpush2.bf16.msra.mxu1 %v6315_v58  ;;  %v6828_v58 = vld [vmem:[#allocation8 + $0x3c0] ss:$16 sps:$4 sm:$0xff]  }
 0x225   :  { %3496 = vmatprep.subr.bf16.mxu1 %v6308_v18 }
 0x226   :  { %3522 = vmatpush1.bf16.msra.mxu0 %v6371_v62  ;;  %v6836_v62 = vld [vmem:[#allocation8 + $0x3a4] ss:$16 sps:$4 sm:$0xff]  }
 0x227   :  { %5122 = vmatprep.subr.bf16.mxu0 %v6773_v25 }
 0x228   :  { %3497 = vmatpush2.bf16.msra.mxu1 %v6307_v22 }
 0x229   :  { %5163 = vmatprep.subr.bf16.mxu1 %v6776_v19  ;;  %3540 = vmatmul.mubr.bf16.vlgmr.msra.gmra.mxu0 %v7257_v20  ;;  %v6831_v19 = vld [vmem:[#allocation8 + $0x1a0] ss:$16 sps:$4 sm:$0xff]  }
 0x22a   :  { %5123 = vmatpush1.bf16.msra.mxu0 %v6771_v27  ;;  %5154 = vmatprep.mubr.bf16.mxu0 %v7639_v36  ;;  %v6839_v27 = vld [vmem:[#allocation8 + $0x184] ss:$16 sps:$4 sm:$0xff]   ;;  %v6837_v20 = vld [vmem:[#allocation8 + $0x180] ss:$16 sps:$4 sm:$0xff]  }
 0x22b   :  { %3499 = vmatmul.mubr.bf16.vlgmr.msra.gmra.mxu1 %v7552_v35  ;;  %5124 = vmatprep.subr.bf16.mxu0 %v6779_v3  ;;  %v6794_v35 = vld [vmem:[#allocation8 + $0x284] ss:$16 sps:$4 sm:$0xff]  }
 0x22c   :  { %5164 = vmatpush1.bf16.msra.mxu1 %v6774_v30  ;;  %5195 = vmatprep.mubr.bf16.mxu1 %v7641_v31  ;;  %v6842_v3 = vld [vmem:[#allocation8 + $0x384] ss:$16 sps:$4 sm:$0xff]  }
 0x22d   :  { %5165 = vmatprep.subr.bf16.mxu1 %v6782_v60  ;;  %v6840_v60 = vld [vmem:[#allocation8 + $0x380] ss:$16 sps:$4 sm:$0xff]  }
 0x22e   :  { %5125 = vmatpush1.bf16.msra.mxu0 %v6777_v32  ;;  %v6845_v32 = vld [vmem:[#allocation8 + $0x164] ss:$16 sps:$4 sm:$0xff]  }
 0x22f   :  { %5126 = vmatprep.subr.bf16.mxu0 %v6785_v50  ;;  %v6843_v50 = vld [vmem:[#allocation8 + $0x160] ss:$16 sps:$4 sm:$0xff]  }
 0x230   :  { %5166 = vmatpush1.bf16.msra.mxu1 %v6780_v29  ;;  %v6848_v29 = vld [vmem:[#allocation8 + $0x364] ss:$16 sps:$4 sm:$0xff]  }
 0x231   :  { %5167 = vmatprep.subr.bf16.mxu1 %v6788_v33  ;;  %v6846_v33 = vld [vmem:[#allocation8 + $0x360] ss:$16 sps:$4 sm:$0xff]  }
 0x232   :  { %5127 = vmatpush1.bf16.msra.mxu0 %v6783_v41  ;;  %v6851_v41 = vld [vmem:[#allocation8 + $0x144] ss:$16 sps:$4 sm:$0xff]  }
 0x233   :  { %5128 = vmatprep.subr.bf16.mxu0 %v6791_v38  ;;  %v6849_v38 = vld [vmem:[#allocation8 + $0x140] ss:$16 sps:$4 sm:$0xff]  }
 0x234   :  { %5168 = vmatpush1.bf16.msra.mxu1 %v6786_v37  ;;  %v6854_v37 = vld [vmem:[#allocation8 + $0x344] ss:$16 sps:$4 sm:$0xff]  }
 0x235   :  { %5169 = vmatprep.subr.bf16.mxu1 %v6794_v35  ;;  %v6852_v35 = vld [vmem:[#allocation8 + $0x340] ss:$16 sps:$4 sm:$0xff]  }
 0x236   :  { %5129 = vmatpush1.bf16.msra.mxu0 %v6789_v39  ;;  %v6857_v39 = vld [vmem:[#allocation8 + $0x124] ss:$16 sps:$4 sm:$0xff]  }
 0x237   :  { %5130 = vmatprep.subr.bf16.mxu0 %v6797_v42  ;;  %v6855_v42 = vld [vmem:[#allocation8 + $0x120] ss:$16 sps:$4 sm:$0xff]  }
 0x238   :  { %5170 = vmatpush1.bf16.msra.mxu1 %v6792_v40  ;;  %v6860_v40 = vld [vmem:[#allocation8 + $0x324] ss:$16 sps:$4 sm:$0xff]  }
 0x239   :  { %5171 = vmatprep.subr.bf16.mxu1 %v6800_v43  ;;  %v6858_v43 = vld [vmem:[#allocation8 + $0x320] ss:$16 sps:$4 sm:$0xff]  }
 0x23a   :  { %5131 = vmatpush1.bf16.msra.mxu0 %v6795_v44  ;;  %v6863_v44 = vld [vmem:[#allocation8 + $0x104] ss:$16 sps:$4 sm:$0xff]  }
 0x23b   :  { %5132 = vmatprep.subr.bf16.mxu0 %v6803_v21  ;;  %v6861_v21 = vld [vmem:[#allocation8 + $0x100] ss:$16 sps:$4 sm:$0xff]  }
 0x23c   :  { %5172 = vmatpush1.bf16.msra.mxu1 %v6798_v45  ;;  %v6866_v45 = vld [vmem:[#allocation8 + $0x304] ss:$16 sps:$4 sm:$0xff]  }
 0x23d   :  { %5173 = vmatprep.subr.bf16.mxu1 %v6806_v46  ;;  %v3548_v46 = vmax.f32 %v7595_v24, 0.0  ;;  %v6932_v24 = vld [vmem:[#allocation8 + $0x6c4] ss:$16 sps:$4 sm:$0xff]  }
 0x23e   :  { %5133 = vmatpush1.bf16.msra.mxu0 %v6801_v47  ;;  %v6864_v47 = vld [vmem:[#allocation8 + $0x300] ss:$16 sps:$4 sm:$0xff]  }
 0x23f   :  { %5134 = vmatprep.subr.bf16.mxu0 %v6809_v49  ;;  %v3550_v49 = vmax.f32 %v7626_v53, 0.0  ;;  %v6870_v53 = vld [vmem:[#allocation8 + $0x4c0] ss:$16 sps:$4 sm:$0xff]  }
 0x240   :  { %5174 = vmatpush1.bf16.msra.mxu1 %v6804_v59  ;;  %v6869_v59 = vld [vmem:[#allocation8 + $0x4e4] ss:$16 sps:$4 sm:$0xff]  }
 0x241   :  { %5175 = vmatprep.subr.bf16.mxu1 %v6812_v52  ;;  %v6926_v52 = vld [vmem:[#allocation8 + $0x6e4] ss:$16 sps:$4 sm:$0xff]  }
 0x242   :  { %5135 = vmatpush1.bf16.msra.mxu0 %v6807_v55  ;;  %v6867_v55 = vld [vmem:[#allocation8 + $0x4e0] ss:$16 sps:$4 sm:$0xff]  }
 0x243   :  { %5136 = vmatprep.subr.bf16.mxu0 %v6815_v56  ;;  %v6872_v56 = vld [vmem:[#allocation8 + $0x4c4] ss:$16 sps:$4 sm:$0xff]  }
 0x244   :  { %5176 = vmatpush1.bf16.msra.mxu1 %v6810_v2  ;;  %v7656_v2 = vpack.c.bf16 %v3548_v46, %v3548_v46 }
 0x245   :  { %5177 = vmatprep.subr.bf16.mxu1 %v6818_v61  ;;  %v6924_v61 = vld [vmem:[#allocation8 + $0x6e0] ss:$16 sps:$4 sm:$0xff]  }
 0x246   :  { %5137 = vmatpush1.bf16.msra.mxu0 %v6813_v63  ;;  %v7658_v63 = vpack.c.bf16 %v3550_v49, %v3550_v49 }
 0x247   :  { %5138 = vmatprep.subr.bf16.mxu0 %v6821_v4  ;;  %v6930_v4 = vld [vmem:[#allocation8 + $0x6c0] ss:$16 sps:$4 sm:$0xff]  }
 0x248   :  { %5178 = vmatpush1.bf16.msra.mxu1 %v6816_v34  ;;  %v6875_v34 = vld [vmem:[#allocation8 + $0x4a4] ss:$16 sps:$4 sm:$0xff]  }
 0x249   :  { %5179 = vmatprep.subr.bf16.mxu1 %v6824_v5  ;;  %v3254_v11 = vpop.f32.mrf.mxu0 }
 0x24a   :  { %v3255_v12 = vadd.f32 %v3254_v11, %v606_v7  ;;  %5139 = vmatpush2.bf16.msra.mxu0 %v6819_v8  ;;  %v6938_v7 = vld [vmem:[#allocation8 + $0x6a4] ss:$16 sps:$4 sm:$0xff]  }
 0x24b   :  { %v3295_v13 = vpop.f32.mrf.mxu1  ;;  %v7648_v15 = vpop.f32.mrf.mxu0  ;;  %5140 = vmatprep.subr.bf16.mxu0 %v6827_v10  ;;  %v6878_v10 = vld [vmem:[#allocation8 + $0x484] ss:$16 sps:$4 sm:$0xff]  }
 0x24c   :  { %5180 = vmatpush2.bf16.msra.mxu1 %v6822_v9  ;;  %v7650_v18 = vadd.f32 %v3295_v13, %v3255_v12  ;;  %v6873_v9 = vld [vmem:[#allocation8 + $0x4a0] ss:$16 sps:$4 sm:$0xff]   ;;  %v6944_v12 = vld [vmem:[#allocation8 + $0x684] ss:$16 sps:$4 sm:$0xff]  }
 0x24d   :  { %v7652_v28 = vpop.f32.mrf.mxu1  ;;  %5181 = vmatprep.subr.bf16.mxu1 %v6830_v16  ;;  %v3258_v22 = vpop.f32.mrf.mxu0  ;;  %v6936_v16 = vld [vmem:[#allocation8 + $0x6a0] ss:$16 sps:$4 sm:$0xff]  }
 0x24e   :  { %5141 = vmatpush2.bf16.msra.mxu0 %v6825_v14  ;;  %v6876_v13 = vld [vmem:[#allocation8 + $0x480] ss:$16 sps:$4 sm:$0xff]   ;;  %v6881_v14 = vld [vmem:[#allocation8 + $0x464] ss:$16 sps:$4 sm:$0xff]  }
 0x24f   :  { %v3299_v25 = vpop.f32.mrf.mxu1  ;;  %v3259_v23 = vpop.f32.mrf.mxu0  ;;  %5142 = vmatprep.subr.bf16.mxu0 %v6833_v17  ;;  %v6950_v17 = vld [vmem:[#allocation8 + $0x664] ss:$16 sps:$4 sm:$0xff]  }
 0x250   :  { %5182 = vmatpush2.bf16.msra.mxu1 %v6828_v58  ;;  %v6942_v58 = vld [vmem:[#allocation8 + $0x680] ss:$16 sps:$4 sm:$0xff]   ;;  %v6884_v22 = vld [vmem:[#allocation8 + $0x444] ss:$16 sps:$4 sm:$0xff]  }
 0x251   :  { %v3300_v30 = vpop.f32.mrf.mxu1  ;;  %5183 = vmatprep.subr.bf16.mxu1 %v6836_v62  ;;  %v6879_v62 = vld [vmem:[#allocation8 + $0x460] ss:$16 sps:$4 sm:$0xff]  }
 0x252   :  { %5143 = vmatpush2.bf16.msra.mxu0 %v6831_v19  ;;  %v6948_v25 = vld [vmem:[#allocation8 + $0x660] ss:$16 sps:$4 sm:$0xff]   ;;  %v6956_v19 = vld [vmem:[#allocation8 + $0x644] ss:$16 sps:$4 sm:$0xff]  }
 0x253   :  { %5144 = vmatprep.subr.bf16.mxu0 %v6839_v27  ;;  %v6882_v23 = vld [vmem:[#allocation8 + $0x440] ss:$16 sps:$4 sm:$0xff]   ;;  %v6962_v30 = vld [vmem:[#allocation8 + $0x624] ss:$16 sps:$4 sm:$0xff]  }
 0x254   :  { %5184 = vmatpush2.bf16.msra.mxu1 %v6834_v26  ;;  %v6887_v26 = vld [vmem:[#allocation8 + $0x424] ss:$16 sps:$4 sm:$0xff]   ;;  %v6954_v27 = vld [vmem:[#allocation8 + $0x640] ss:$16 sps:$4 sm:$0xff]  }
 0x255   :  { %5185 = vmatprep.subr.bf16.mxu1 %v6842_v3  ;;  %v609_v3 = vsub.s32 5, %v7566_v51 }
 0x256   :  { %5145 = vmatpush2.bf16.msra.mxu0 %v6837_v20  ;;  %v6885_v20 = vld [vmem:[#allocation8 + $0x420] ss:$16 sps:$4 sm:$0xff]  }
 0x257   :  { %5146 = vmatprep.subr.bf16.mxu0 %v6845_v32  ;;  %v6960_v32 = vld [vmem:[#allocation8 + $0x620] ss:$16 sps:$4 sm:$0xff]  }
 0x258   :  { %5186 = vmatpush2.bf16.msra.mxu1 %v6840_v60  ;;  %v6890_v60 = vld [vmem:[#allocation8 + $0x404] ss:$16 sps:$4 sm:$0xff]  }
 0x259   :  { %5187 = vmatprep.subr.bf16.mxu1 %v6848_v29  ;;  %v6968_v29 = vld [vmem:[#allocation8 + $0x604] ss:$16 sps:$4 sm:$0xff]  }
 0x25a   :  { %5147 = vmatpush2.bf16.msra.mxu0 %v6843_v50  ;;  %v610_v50 = vrot.slane %v7629_v48, %v609_v3  ;;  %v7014_v3 = vld [vmem:[#allocation8 + $0x700] ss:$16 sps:$4 sm:$0xff]  }
 0x25b   :  { %5148 = vmatprep.subr.bf16.mxu0 %v6851_v41  ;;  %v6893_v41 = vld [vmem:[#allocation8 + $0x5e4] ss:$16 sps:$4 sm:$0xff]  }
 0x25c   :  { %5188 = vmatpush2.bf16.msra.mxu1 %v6846_v33  ;;  %v6888_v33 = vld [vmem:[#allocation8 + $0x400] ss:$16 sps:$4 sm:$0xff]  }
 0x25d   :  { %5189 = vmatprep.subr.bf16.mxu1 %v6854_v37  ;;  %v6966_v37 = vld [vmem:[#allocation8 + $0x600] ss:$16 sps:$4 sm:$0xff]  }
 0x25e   :  { %5149 = vmatpush2.bf16.msra.mxu0 %v6849_v38  ;;  %v6974_v38 = vld [vmem:[#allocation8 + $0x7e4] ss:$16 sps:$4 sm:$0xff]  }
 0x25f   :  { %5150 = vmatprep.subr.bf16.mxu0 %v6857_v39  ;;  %v6891_v39 = vld [vmem:[#allocation8 + $0x5e0] ss:$16 sps:$4 sm:$0xff]  }
 0x260   :  { %5190 = vmatpush2.bf16.msra.mxu1 %v6852_v35  ;;  %v3257_v35 = vadd.f32 %v7648_v15, %v610_v50  ;;  %v6986_v15 = vld [vmem:[#allocation8 + $0x7a4] ss:$16 sps:$4 sm:$0xff]   ;;  %v6918_v50 = vld [vmem:[#allocation8 + $0xc8] ss:$16 sps:$4 sm:$0xff]  }
 0x261   :  { %5191 = vmatprep.subr.bf16.mxu1 %v6860_v40  ;;  %v6896_v40 = vld [vmem:[#allocation8 + $0x5c4] ss:$16 sps:$4 sm:$0xff]  }
 0x262   :  { %5151 = vmatpush2.bf16.msra.mxu0 %v6855_v42  ;;  %v6972_v42 = vld [vmem:[#allocation8 + $0x7e0] ss:$16 sps:$4 sm:$0xff]  }
 0x263   :  { %5152 = vmatprep.subr.bf16.mxu0 %v6863_v44 }
 0x264   :  { %5192 = vmatpush2.bf16.msra.mxu1 %v6858_v43  ;;  %v6980_v43 = vld [vmem:[#allocation8 + $0x7c4] ss:$16 sps:$4 sm:$0xff]  }
 0x265   :  { %5193 = vmatprep.subr.bf16.mxu1 %v6866_v45  ;;  %v3298_v45 = vadd.f32 %v7652_v28, %v3257_v35  ;;  %v6984_v28 = vld [vmem:[#allocation8 + $0x7a0] ss:$16 sps:$4 sm:$0xff]   ;;  %v6929_v35 = vld [vmem:[#allocation8 + $0x8c] ss:$16 sps:$4 sm:$0xff]  }
 0x266   :  { %5153 = vmatpush2.bf16.msra.mxu0 %v6861_v21  ;;  %v6894_v21 = vld [vmem:[#allocation8 + $0x5c0] ss:$16 sps:$4 sm:$0xff]  }
 0x267   :  { %5204 = vmatprep.subr.bf16.mxu0 %v6869_v59  ;;  %v6978_v59 = vld [vmem:[#allocation8 + $0x7c0] ss:$16 sps:$4 sm:$0xff]  }
 0x268   :  { %5194 = vmatpush2.bf16.msra.mxu1 %v6864_v47  ;;  %v6899_v47 = vld [vmem:[#allocation8 + $0x5a4] ss:$16 sps:$4 sm:$0xff]  }
 0x269   :  { %5245 = vmatprep.subr.bf16.mxu1 %v6926_v52  ;;  %5155 = vmatmul.mubr.bf16.vlgmr.msra.gmra.mxu0 %v7656_v2 }
 0x26a   :  { %5205 = vmatpush1.bf16.msra.mxu0 %v6867_v55 }
 0x26b   :  { %v7661_v1 = vpop.f32.mrf.mxu1  ;;  %5196 = vmatmul.mubr.bf16.vlgmr.msra.gmra.mxu1 %v7658_v63  ;;  %5206 = vmatprep.subr.bf16.mxu0 %v6872_v56  ;;  %v6897_v56 = vld [vmem:[#allocation8 + $0x5a0] ss:$16 sps:$4 sm:$0xff]  }
 0x26c   :  { %5246 = vmatpush1.bf16.msra.mxu1 %v6924_v61 }
 0x26d   :  { %v7664_v5 = vpop.f32.mrf.mxu1  ;;  %5247 = vmatprep.subr.bf16.mxu1 %v6932_v24  ;;  %v6902_v24 = vld [vmem:[#allocation8 + $0x584] ss:$16 sps:$4 sm:$0xff]  }
 0x26e   :  { %5207 = vmatpush1.bf16.msra.mxu0 %v6870_v53 }
 0x26f   :  { %v3381_v8 = vpop.f32.mrf.mxu1  ;;  %5208 = vmatprep.subr.bf16.mxu0 %v6875_v34  ;;  %v6992_v34 = vld [vmem:[#allocation8 + $0x784] ss:$16 sps:$4 sm:$0xff]  }
 0x270   :  { %5248 = vmatpush1.bf16.msra.mxu1 %v6930_v4  ;;  %v6905_v8 = vld [vmem:[#allocation8 + $0x564] ss:$16 sps:$4 sm:$0xff]  }
 0x271   :  { %v3382_v11 = vpop.f32.mrf.mxu1  ;;  %5249 = vmatprep.subr.bf16.mxu1 %v6938_v7  ;;  %v6900_v7 = vld [vmem:[#allocation8 + $0x580] ss:$16 sps:$4 sm:$0xff]  }
 0x272   :  { %5209 = vmatpush1.bf16.msra.mxu0 %v6873_v9  ;;  %v6990_v9 = vld [vmem:[#allocation8 + $0x780] ss:$16 sps:$4 sm:$0xff]  }
 0x273   :  { %5210 = vmatprep.subr.bf16.mxu0 %v6878_v10  ;;  %v6903_v10 = vld [vmem:[#allocation8 + $0x560] ss:$16 sps:$4 sm:$0xff]  }
 0x274   :  { %5250 = vmatpush1.bf16.msra.mxu1 %v6936_v16  ;;  %v6908_v16 = vld [vmem:[#allocation8 + $0x544] ss:$16 sps:$4 sm:$0xff]   ;;  %v6996_v11 = vld [vmem:[#allocation8 + $0x760] ss:$16 sps:$4 sm:$0xff]  }
 0x275   :  { %5251 = vmatprep.subr.bf16.mxu1 %v6944_v12  ;;  %v7004_v12 = vld [vmem:[#allocation8 + $0x744] ss:$16 sps:$4 sm:$0xff]  }
 0x276   :  { %5211 = vmatpush1.bf16.msra.mxu0 %v6876_v13  ;;  %v6906_v13 = vld [vmem:[#allocation8 + $0x540] ss:$16 sps:$4 sm:$0xff]  }
 0x277   :  { %5212 = vmatprep.subr.bf16.mxu0 %v6881_v14 }
 0x278   :  { %5252 = vmatpush1.bf16.msra.mxu1 %v6942_v58  ;;  %v6911_v58 = vld [vmem:[#allocation8 + $0x524] ss:$16 sps:$4 sm:$0xff]  }
 0x279   :  { %5253 = vmatprep.subr.bf16.mxu1 %v6950_v17  ;;  %v7002_v17 = vld [vmem:[#allocation8 + $0x740] ss:$16 sps:$4 sm:$0xff]  }
 0x27a   :  { %5213 = vmatpush1.bf16.msra.mxu0 %v6879_v62  ;;  %v7010_v62 = vld [vmem:[#allocation8 + $0x724] ss:$16 sps:$4 sm:$0xff]  }
 0x27b   :  { %5214 = vmatprep.subr.bf16.mxu0 %v6884_v22  ;;  %v6909_v22 = vld [vmem:[#allocation8 + $0x520] ss:$16 sps:$4 sm:$0xff]  }
 0x27c   :  { %5254 = vmatpush1.bf16.msra.mxu1 %v6948_v25 }
 0x27d   :  { %5255 = vmatprep.subr.bf16.mxu1 %v6956_v19  ;;  %v6914_v19 = vld [vmem:[#allocation8 + $0x504] ss:$16 sps:$4 sm:$0xff]  }
 0x27e   :  { %5215 = vmatpush1.bf16.msra.mxu0 %v6882_v23  ;;  %v7008_v23 = vld [vmem:[#allocation8 + $0x720] ss:$16 sps:$4 sm:$0xff]  }
 0x27f   :  { %5216 = vmatprep.subr.bf16.mxu0 %v6887_v26  ;;  %v7016_v26 = vld [vmem:[#allocation8 + $0x704] ss:$16 sps:$4 sm:$0xff]  }
 0x280   :  { %5256 = vmatpush1.bf16.msra.mxu1 %v6954_v27  ;;  %v6912_v27 = vld [vmem:[#allocation8 + $0x500] ss:$16 sps:$4 sm:$0xff]  }
 0x281   :  { %5257 = vmatprep.subr.bf16.mxu1 %v6962_v30 }
 0x282   :  { %5217 = vmatpush1.bf16.msra.mxu0 %v6885_v20  ;;  %v7022_v20 = vld [vmem:[#allocation8 + $0x2ec] ss:$16 sps:$4 sm:$0xff]  }
 0x283   :  { %5218 = vmatprep.subr.bf16.mxu0 %v6890_v60  ;;  %v6915_v60 = vld [vmem:[#allocation8 + $0xe8] ss:$16 sps:$4 sm:$0xff]  }
 0x284   :  { %5258 = vmatpush1.bf16.msra.mxu1 %v6960_v32 }
 0x285   :  { %5259 = vmatprep.subr.bf16.mxu1 %v6968_v29 }
 0x286   :  { %5219 = vmatpush1.bf16.msra.mxu0 %v6888_v33  ;;  %v6923_v33 = vld [vmem:[#allocation8 + $0xac] ss:$16 sps:$4 sm:$0xff]  }
 0x287   :  { %5220 = vmatprep.subr.bf16.mxu0 %v6893_v41 }
 0x288   :  { %5260 = vmatpush1.bf16.msra.mxu1 %v6966_v37 }
 0x289   :  { %5261 = vmatprep.subr.bf16.mxu1 %v6974_v38  ;;  %v3336_v44 = vpop.f32.mrf.mxu0  ;;  %v6921_v38 = vld [vmem:[#allocation8 + $0xa8] ss:$16 sps:$4 sm:$0xff]  }
 0x28a   :  { %5221 = vmatpush2.bf16.msra.mxu0 %v6891_v39  ;;  %v3337_v14 = vadd.f32 %v3336_v44, %v7650_v18  ;;  %v6917_v18 = vld [vmem:[#allocation8 + $0xec] ss:$16 sps:$4 sm:$0xff]  }
 0x28b   :  { %v3338_v46 = vpop.f32.mrf.mxu0  ;;  %5222 = vmatprep.subr.bf16.mxu0 %v6896_v40  ;;  %v6927_v40 = vld [vmem:[#allocation8 + $0x88] ss:$16 sps:$4 sm:$0xff]   ;;  %v6941_v44 = vld [vmem:[#allocation8 + $0x4c] ss:$16 sps:$4 sm:$0xff]  }
 0x28c   :  { %5262 = vmatpush2.bf16.msra.mxu1 %v6972_v42  ;;  %v3339_v49 = vadd.f32 %v3338_v46, %v3298_v45  ;;  %v3378_v25 = vadd.f32 %v7661_v1, %v3337_v14  ;;  %v6920_v1 = vld [vmem:[#allocation8 + $0xcc] ss:$16 sps:$4 sm:$0xff]   ;;  %v617_v14 = vsub.s32 7, %v7566_v51 }
 0x28d   :  { %5263 = vmatprep.subr.bf16.mxu1 %v6980_v43  ;;  %v3340_v52 = vpop.f32.mrf.mxu0  ;;  %v6935_v42 = vld [vmem:[#allocation8 + $0x6c] ss:$16 sps:$4 sm:$0xff]   ;;  %v6933_v43 = vld [vmem:[#allocation8 + $0x68] ss:$16 sps:$4 sm:$0xff]  }
 0x28e   :  { %v3380_v55 = vadd.f32 %v7664_v5, %v3339_v49  ;;  %5223 = vmatpush2.bf16.msra.mxu0 %v6894_v21  ;;  %v6998_v5 = vld [vmem:[#allocation8 + $0x764] ss:$16 sps:$4 sm:$0xff]   ;;  %v3552_v30 = vmax.f32 %v3378_v25, 0.0  ;;  %v6947_v45 = vld [vmem:[#allocation8 + $0x2c] ss:$16 sps:$4 sm:$0xff]  }
 0x28f   :  { %v3341_v61 = vpop.f32.mrf.mxu0  ;;  %5224 = vmatprep.subr.bf16.mxu0 %v6899_v47  ;;  %v6945_v21 = vld [vmem:[#allocation8 + $0x28] ss:$16 sps:$4 sm:$0xff]   ;;  %v6953_v46 = vld [vmem:[#allocation8 + $0xc] ss:$16 sps:$4 sm:$0xff]  }
 0x290   :  { %5264 = vmatpush2.bf16.msra.mxu1 %v6978_v59  ;;  %v3553_v53 = vmax.f32 %v3380_v55, 0.0  ;;  %v7676_v32 = vpack.c.bf16 %v3552_v30, %v3552_v30  ;;  %v6951_v47 = vld [vmem:[#allocation8 + $0x8] ss:$16 sps:$4 sm:$0xff]   ;;  %v6959_v59 = vld [vmem:[#allocation8 + $0x1ec] ss:$16 sps:$4 sm:$0xff]  }
 0x291   :  { %5265 = vmatprep.subr.bf16.mxu1 %v6986_v15  ;;  %v6957_v49 = vld [vmem:[#allocation8 + $0x1e8] ss:$16 sps:$4 sm:$0xff]   ;;  %v6965_v15 = vld [vmem:[#allocation8 + $0x1cc] ss:$16 sps:$4 sm:$0xff]  }
 0x292   :  { %v7671_v4 = vpack.c.bf16 %v3553_v53, %v3553_v53  ;;  %5225 = vmatpush2.bf16.msra.mxu0 %v6897_v56  ;;  %v6963_v55 = vld [vmem:[#allocation8 + $0x1c8] ss:$16 sps:$4 sm:$0xff]   ;;  %v6971_v61 = vld [vmem:[#allocation8 + $0x1ac] ss:$16 sps:$4 sm:$0xff]  }
 0x293   :  { %5226 = vmatprep.subr.bf16.mxu0 %v6902_v24  ;;  %v7005_v25 = vld [vmem:[#allocation8 + $0x4e8] ss:$16 sps:$4 sm:$0xff]  }
 0x294   :  { %5266 = vmatpush2.bf16.msra.mxu1 %v6984_v28  ;;  %5236 = vmatprep.mubr.bf16.mxu0 %v7671_v4  ;;  %v6969_v28 = vld [vmem:[#allocation8 + $0x1a8] ss:$16 sps:$4 sm:$0xff]  }
 0x295   :  { %5267 = vmatprep.subr.bf16.mxu1 %v6992_v34  ;;  %v6977_v34 = vld [vmem:[#allocation8 + $0x18c] ss:$16 sps:$4 sm:$0xff]  }
 0x296   :  { %5227 = vmatpush2.bf16.msra.mxu0 %v6900_v7  ;;  %v6975_v7 = vld [vmem:[#allocation8 + $0x188] ss:$16 sps:$4 sm:$0xff]  }
 0x297   :  { %5228 = vmatprep.subr.bf16.mxu0 %v6905_v8  ;;  %v6983_v8 = vld [vmem:[#allocation8 + $0x16c] ss:$16 sps:$4 sm:$0xff]  }
 0x298   :  { %5268 = vmatpush2.bf16.msra.mxu1 %v6990_v9  ;;  %v6981_v9 = vld [vmem:[#allocation8 + $0x168] ss:$16 sps:$4 sm:$0xff]  }
 0x299   :  { %5269 = vmatprep.subr.bf16.mxu1 %v6998_v5  ;;  %v6989_v5 = vld [vmem:[#allocation8 + $0x14c] ss:$16 sps:$4 sm:$0xff]  }
 0x29a   :  { %5229 = vmatpush2.bf16.msra.mxu0 %v6903_v10  ;;  %v6987_v10 = vld [vmem:[#allocation8 + $0x148] ss:$16 sps:$4 sm:$0xff]  }
 0x29b   :  { %5230 = vmatprep.subr.bf16.mxu0 %v6908_v16  ;;  %v6995_v16 = vld [vmem:[#allocation8 + $0x12c] ss:$16 sps:$4 sm:$0xff]  }
 0x29c   :  { %5270 = vmatpush2.bf16.msra.mxu1 %v6996_v11  ;;  %v6993_v11 = vld [vmem:[#allocation8 + $0x128] ss:$16 sps:$4 sm:$0xff]  }
 0x29d   :  { %5271 = vmatprep.subr.bf16.mxu1 %v7004_v12  ;;  %v613_v12 = vsub.s32 6, %v7566_v51 }
 0x29e   :  { %5231 = vmatpush2.bf16.msra.mxu0 %v6906_v13  ;;  %v7001_v13 = vld [vmem:[#allocation8 + $0x10c] ss:$16 sps:$4 sm:$0xff]  }
 0x29f   :  { %5232 = vmatprep.subr.bf16.mxu0 %v6911_v58  ;;  %v6999_v58 = vld [vmem:[#allocation8 + $0x108] ss:$16 sps:$4 sm:$0xff]  }
 0x2a0   :  { %5272 = vmatpush2.bf16.msra.mxu1 %v7002_v17  ;;  %v614_v17 = vrot.slane %v7629_v48, %v613_v12  ;;  %v7059_v12 = vld [vmem:[#allocation8 + $0x5c8] ss:$16 sps:$4 sm:$0xff]  }
 0x2a1   :  { %5273 = vmatprep.subr.bf16.mxu1 %v7010_v62  ;;  %v7007_v62 = vld [vmem:[#allocation8 + $0x4ec] ss:$16 sps:$4 sm:$0xff]  }
 0x2a2   :  { %5233 = vmatpush2.bf16.msra.mxu0 %v6909_v22  ;;  %v618_v22 = vrot.slane %v7629_v48, %v617_v14  ;;  %v7067_v14 = vld [vmem:[#allocation8 + $0x5ac] ss:$16 sps:$4 sm:$0xff]  }
 0x2a3   :  { %5234 = vmatprep.subr.bf16.mxu0 %v6914_v19 }
 0x2a4   :  { %5274 = vmatpush2.bf16.msra.mxu1 %v7008_v23  ;;  %v7013_v23 = vld [vmem:[#allocation8 + $0x4cc] ss:$16 sps:$4 sm:$0xff]  }
 0x2a5   :  { %5275 = vmatprep.subr.bf16.mxu1 %v7016_v26 }
 0x2a6   :  { %5235 = vmatpush2.bf16.msra.mxu0 %v6912_v27 }
 0x2a7   :  { %5286 = vmatprep.subr.bf16.mxu0 %v6917_v18 }
 0x2a8   :  { %5276 = vmatpush2.bf16.msra.mxu1 %v7014_v3  ;;  %v7011_v3 = vld [vmem:[#allocation8 + $0x4c8] ss:$16 sps:$4 sm:$0xff]  }
 0x2a9   :  { %5327 = vmatprep.subr.bf16.mxu1 %v7022_v20  ;;  %5237 = vmatmul.mubr.bf16.vlgmr.msra.gmra.mxu0 %v7676_v32 }
 0x2aa   :  { %5287 = vmatpush1.bf16.msra.mxu0 %v6915_v60  ;;  %5318 = vmatprep.mubr.bf16.mxu0 %v7639_v36  ;;  %v6939_v36 = vld [vmem:[#allocation8 + $0x48] ss:$16 sps:$4 sm:$0xff]  }
 0x2ab   :  { %v7679_v29 = vpop.f32.mrf.mxu1  ;;  %5288 = vmatprep.subr.bf16.mxu0 %v6920_v1  ;;  %v7019_v1 = vld [vmem:[#allocation8 + $0x4ac] ss:$16 sps:$4 sm:$0xff]  }
 0x2ac   :  { %v3419_v19 = vadd.f32 %v7679_v29, %v614_v17  ;;  %v7065_v17 = vld [vmem:[#allocation8 + $0x5a8] ss:$16 sps:$4 sm:$0xff]  }
 0x2ad   :  { %v7682_v41 = vpop.f32.mrf.mxu1 }
 0x2ae   :  { %5289 = vmatpush1.bf16.msra.mxu0 %v6918_v50  ;;  %v3421_v26 = vadd.f32 %v7682_v41, %v618_v22  ;;  %v7017_v41 = vld [vmem:[#allocation8 + $0x4a8] ss:$16 sps:$4 sm:$0xff]   ;;  %v7073_v22 = vld [vmem:[#allocation8 + $0x58c] ss:$16 sps:$4 sm:$0xff]  }
 0x2af   :  { %v3422_v37 = vpop.f32.mrf.mxu1  ;;  %5290 = vmatprep.subr.bf16.mxu0 %v6923_v33 }
 0x2b1   :  { %v3423_v39 = vpop.f32.mrf.mxu1 }
 0x2b2   :  { %5291 = vmatpush1.bf16.msra.mxu0 %v6921_v38 }
 0x2b3   :  { %5292 = vmatprep.subr.bf16.mxu0 %v6929_v35 }
 0x2b6   :  { %5293 = vmatpush1.bf16.msra.mxu0 %v6927_v40 }
 0x2b7   :  { %5294 = vmatprep.subr.bf16.mxu0 %v6935_v42 }
 0x2ba   :  { %5295 = vmatpush1.bf16.msra.mxu0 %v6933_v43  ;;  %v7023_v43 = vld [vmem:[#allocation8 + $0x488] ss:$16 sps:$4 sm:$0xff]  }
 0x2bb   :  { %5296 = vmatprep.subr.bf16.mxu0 %v6941_v44 }
 0x2be   :  { %5297 = vmatpush1.bf16.msra.mxu0 %v6939_v36  ;;  %v7020_v36 = vld [vmem:[#allocation8 + $0x2e8] ss:$16 sps:$4 sm:$0xff]  }
 0x2bf   :  { %5298 = vmatprep.subr.bf16.mxu0 %v6947_v45 }
 0x2c2   :  { %5299 = vmatpush1.bf16.msra.mxu0 %v6945_v21  ;;  %v7028_v21 = vld [vmem:[#allocation8 + $0x2cc] ss:$16 sps:$4 sm:$0xff]  }
 0x2c3   :  { %5300 = vmatprep.subr.bf16.mxu0 %v6953_v46  ;;  %v7031_v46 = vld [vmem:[#allocation8 + $0x46c] ss:$16 sps:$4 sm:$0xff]  }
 0x2c6   :  { %5301 = vmatpush1.bf16.msra.mxu0 %v6951_v47  ;;  %v7029_v47 = vld [vmem:[#allocation8 + $0x468] ss:$16 sps:$4 sm:$0xff]  }
 0x2c7   :  { %5302 = vmatprep.subr.bf16.mxu0 %v6959_v59  ;;  %v7026_v59 = vld [vmem:[#allocation8 + $0x2c8] ss:$16 sps:$4 sm:$0xff]  }
 0x2c9   :  { %v3459_v52 = vpop.f32.mrf.mxu0 }
 0x2ca   :  { %5303 = vmatpush2.bf16.msra.mxu0 %v6957_v49  ;;  %v3460_v27 = vadd.f32 %v3459_v52, %v3419_v19  ;;  %v7037_v49 = vld [vmem:[#allocation8 + $0x44c] ss:$16 sps:$4 sm:$0xff]   ;;  %v7035_v52 = vld [vmem:[#allocation8 + $0x448] ss:$16 sps:$4 sm:$0xff]  }
 0x2cb   :  { %v3461_v56 = vpop.f32.mrf.mxu0  ;;  %5304 = vmatprep.subr.bf16.mxu0 %v6965_v15  ;;  %v7034_v15 = vld [vmem:[#allocation8 + $0x2ac] ss:$16 sps:$4 sm:$0xff]   ;;  %v7071_v19 = vld [vmem:[#allocation8 + $0x588] ss:$16 sps:$4 sm:$0xff]  }
 0x2cc   :  { %v3462_v20 = vadd.f32 %v3461_v56, %v3421_v26  ;;  %v7043_v56 = vld [vmem:[#allocation8 + $0x42c] ss:$16 sps:$4 sm:$0xff]  }
 0x2cd   :  { %v3463_v24 = vpop.f32.mrf.mxu0  ;;  %v7079_v26 = vld [vmem:[#allocation8 + $0x56c] ss:$16 sps:$4 sm:$0xff]  }
 0x2ce   :  { %5305 = vmatpush2.bf16.msra.mxu0 %v6963_v55  ;;  %v7032_v55 = vld [vmem:[#allocation8 + $0x2a8] ss:$16 sps:$4 sm:$0xff]  }
 0x2cf   :  { %v3464_v53 = vpop.f32.mrf.mxu0  ;;  %5306 = vmatprep.subr.bf16.mxu0 %v6971_v61  ;;  %v7040_v61 = vld [vmem:[#allocation8 + $0x28c] ss:$16 sps:$4 sm:$0xff]   ;;  %v7041_v24 = vld [vmem:[#allocation8 + $0x428] ss:$16 sps:$4 sm:$0xff]  }
 0x2d0   :  { %v7049_v53 = vld [vmem:[#allocation8 + $0x40c] ss:$16 sps:$4 sm:$0xff]  }
 0x2d2   :  { %5307 = vmatpush2.bf16.msra.mxu0 %v6969_v28  ;;  %v7038_v28 = vld [vmem:[#allocation8 + $0x288] ss:$16 sps:$4 sm:$0xff]  }
 0x2d3   :  { %5308 = vmatprep.subr.bf16.mxu0 %v6977_v34  ;;  %v7047_v34 = vld [vmem:[#allocation8 + $0x408] ss:$16 sps:$4 sm:$0xff]  }
 0x2d6   :  { %5309 = vmatpush2.bf16.msra.mxu0 %v6975_v7  ;;  %v7044_v7 = vld [vmem:[#allocation8 + $0x268] ss:$16 sps:$4 sm:$0xff]  }
 0x2d7   :  { %5310 = vmatprep.subr.bf16.mxu0 %v6983_v8  ;;  %v7055_v8 = vld [vmem:[#allocation8 + $0x5ec] ss:$16 sps:$4 sm:$0xff]  }
 0x2da   :  { %5311 = vmatpush2.bf16.msra.mxu0 %v6981_v9  ;;  %v7052_v9 = vld [vmem:[#allocation8 + $0x24c] ss:$16 sps:$4 sm:$0xff]  }
 0x2db   :  { %5312 = vmatprep.subr.bf16.mxu0 %v6989_v5  ;;  %v7053_v5 = vld [vmem:[#allocation8 + $0x5e8] ss:$16 sps:$4 sm:$0xff]  }
 0x2de   :  { %5313 = vmatpush2.bf16.msra.mxu0 %v6987_v10  ;;  %v7050_v10 = vld [vmem:[#allocation8 + $0x248] ss:$16 sps:$4 sm:$0xff]  }
 0x2df   :  { %5314 = vmatprep.subr.bf16.mxu0 %v6995_v16  ;;  %v7061_v16 = vld [vmem:[#allocation8 + $0x5cc] ss:$16 sps:$4 sm:$0xff]  }
 0x2e2   :  { %5315 = vmatpush2.bf16.msra.mxu0 %v6993_v11  ;;  %v7058_v11 = vld [vmem:[#allocation8 + $0x22c] ss:$16 sps:$4 sm:$0xff]  }
 0x2e3   :  { %5316 = vmatprep.subr.bf16.mxu0 %v7001_v13  ;;  %v7056_v13 = vld [vmem:[#allocation8 + $0x228] ss:$16 sps:$4 sm:$0xff]  }
 0x2e6   :  { %5317 = vmatpush2.bf16.msra.mxu0 %v6999_v58  ;;  %v7064_v58 = vld [vmem:[#allocation8 + $0x20c] ss:$16 sps:$4 sm:$0xff]  }
 0x2e7   :  { %5368 = vmatprep.subr.bf16.mxu0 %v7007_v62  ;;  %v7062_v62 = vld [vmem:[#allocation8 + $0x208] ss:$16 sps:$4 sm:$0xff]  }
 0x2e9   :  { %v3541_v30 = vpop.f32.mrf.mxu0  ;;  %5319 = vmatmul.mubr.bf16.vlgmr.msra.gmra.mxu0 %v7656_v2  ;;  %v7025_v2 = vld [vmem:[#allocation8 + $0x48c] ss:$16 sps:$4 sm:$0xff]  }
 0x2ea   :  { %5369 = vmatpush1.bf16.msra.mxu0 %v7005_v25  ;;  %5400 = vmatprep.mubr.bf16.mxu0 %v7671_v4  ;;  %v7070_v25 = vld [vmem:[#allocation8 + $0x3ec] ss:$16 sps:$4 sm:$0xff]  }
 0x2eb   :  { %v3500_v18 = vpop.f32.mrf.mxu1  ;;  %v3543_v48 = vpop.f32.mrf.mxu0  ;;  %5370 = vmatprep.subr.bf16.mxu0 %v7013_v23  ;;  %v7068_v23 = vld [vmem:[#allocation8 + $0x3e8] ss:$16 sps:$4 sm:$0xff]  }
 0x2ec   :  { %v3501_v60 = vadd.f32 %v3500_v18, %v3460_v27  ;;  %v7076_v27 = vld [vmem:[#allocation8 + $0x3cc] ss:$16 sps:$4 sm:$0xff]   ;;  %v7074_v18 = vld [vmem:[#allocation8 + $0x3c8] ss:$16 sps:$4 sm:$0xff]  }
 0x2ed   :  { %v3502_v50 = vpop.f32.mrf.mxu1  ;;  %v3545_v37 = vpop.f32.mrf.mxu0 }
 0x2ee   :  { %v3542_v29 = vadd.f32 %v3541_v30, %v3501_v60  ;;  %v3503_v33 = vadd.f32 %v3502_v50, %v3462_v20  ;;  %5371 = vmatpush1.bf16.msra.mxu0 %v7011_v3  ;;  %v7077_v30 = vld [vmem:[#allocation8 + $0x568] ss:$16 sps:$4 sm:$0xff]   ;;  %v7085_v3 = vld [vmem:[#allocation8 + $0x54c] ss:$16 sps:$4 sm:$0xff]  }
 0x2ef   :  { %v3504_v38 = vpop.f32.mrf.mxu1  ;;  %v3546_v39 = vpop.f32.mrf.mxu0  ;;  %5372 = vmatprep.subr.bf16.mxu0 %v7019_v1  ;;  %v7082_v20 = vld [vmem:[#allocation8 + $0x3ac] ss:$16 sps:$4 sm:$0xff]   ;;  %v7083_v60 = vld [vmem:[#allocation8 + $0x548] ss:$16 sps:$4 sm:$0xff]  }
 0x2f0   :  { %v3544_v35 = vadd.f32 %v3543_v48, %v3503_v33  ;;  %v3554_v40 = vmax.f32 %v3542_v29, 0.0  ;;  %v7080_v48 = vld [vmem:[#allocation8 + $0x3a8] ss:$16 sps:$4 sm:$0xff]   ;;  %v7091_v1 = vld [vmem:[#allocation8 + $0x52c] ss:$16 sps:$4 sm:$0xff]  }
 0x2f1   :  { %v3505_v42 = vpop.f32.mrf.mxu1  ;;  %v7088_v50 = vld [vmem:[#allocation8 + $0x38c] ss:$16 sps:$4 sm:$0xff]   ;;  %v7089_v29 = vld [vmem:[#allocation8 + $0x528] ss:$16 sps:$4 sm:$0xff]   ;;  %v7699_v39 = vld [vmem:[#allocation10] sm:$0xf] }
 0x2f2   :  { %v3555_v4 = vmax.f32 %v3544_v35, 0.0  ;;  %5373 = vmatpush1.bf16.msra.mxu0 %v7017_v41  ;;  %v7694_v45 = vpack.c.bf16 %v3554_v40, %v3554_v40  ;;  %v7086_v33 = vld [vmem:[#allocation8 + $0x388] ss:$16 sps:$4 sm:$0xff]   ;;  %v7097_v37 = vld [vmem:[#allocation8 + $0x50c] ss:$16 sps:$4 sm:$0xff]   ;;  %v3825_v42 = vrot.slane %v7699_v39, %v7569_v0 }
 0x2f3   :  { %5374 = vmatprep.subr.bf16.mxu0 %v7025_v2  ;;  %v7094_v38 = vld [vmem:[#allocation8 + $0x36c] ss:$16 sps:$4 sm:$0xff]   ;;  %v7095_v41 = vld [vmem:[#allocation8 + $0x508] ss:$16 sps:$4 sm:$0xff]  }
 0x2f4   :  { %v7692_v44 = vpack.c.bf16 %v3555_v4, %v3555_v4  ;;  %v7092_v35 = vld [vmem:[#allocation8 + $0x368] ss:$16 sps:$4 sm:$0xff]   ;;  %v7100_v40 = vld [vmem:[#allocation8 + $0x34c] ss:$16 sps:$4 sm:$0xff]  }
 0x2f5   :  { %v7157_v2 = vld [vmem:[#allocation11 + $0x74] ss:$8 sps:$4 sm:$0xff]   ;;  %v7155_v4 = vld [vmem:[#allocation11 + $0x70] ss:$8 sps:$4 sm:$0xff]  }
 0x2f6   :  { %5277 = vmatprep.mubr.bf16.mxu1 %v7692_v44  ;;  %5375 = vmatpush1.bf16.msra.mxu0 %v7023_v43  ;;  %v7098_v43 = vld [vmem:[#allocation8 + $0x348] ss:$16 sps:$4 sm:$0xff]  }
 0x2f7   :  { %5278 = vmatmul.mubr.bf16.vlgmr.msra.gmra.mxu1 %v7694_v45  ;;  %5376 = vmatprep.subr.bf16.mxu0 %v7031_v46  ;;  %v7103_v46 = vld [vmem:[#allocation8 + $0x32c] ss:$16 sps:$4 sm:$0xff]  }
 0x2f8   :  { %5328 = vmatpush1.bf16.msra.mxu1 %v7020_v36  ;;  %5359 = vmatprep.mubr.bf16.mxu1 %v7641_v31  ;;  %v7046_v31 = vld [vmem:[#allocation8 + $0x26c] ss:$16 sps:$4 sm:$0xff]   ;;  %v7160_v36 = vld [vmem:[#allocation11 + $0x64] ss:$8 sps:$4 sm:$0xff]  }
 0x2f9   :  { %5329 = vmatprep.subr.bf16.mxu1 %v7028_v21  ;;  %v3829_v21 = vrot.slane %v7699_v39, %v7574_v6 }
 0x2fa   :  { %5377 = vmatpush1.bf16.msra.mxu0 %v7029_v47 }
 0x2fb   :  { %5378 = vmatprep.subr.bf16.mxu0 %v7037_v49 }
 0x2fc   :  { %5330 = vmatpush1.bf16.msra.mxu1 %v7026_v59 }
 0x2fd   :  { %5331 = vmatprep.subr.bf16.mxu1 %v7034_v15  ;;  %v7158_v15 = vld [vmem:[#allocation11 + $0x60] ss:$8 sps:$4 sm:$0xff]  }
 0x2fe   :  { %5379 = vmatpush1.bf16.msra.mxu0 %v7035_v52 }
 0x2ff   :  { %5380 = vmatprep.subr.bf16.mxu0 %v7043_v56  ;;  %v7163_v56 = vld [vmem:[#allocation11 + $0x54] ss:$8 sps:$4 sm:$0xff]  }
 0x300   :  { %5332 = vmatpush1.bf16.msra.mxu1 %v7032_v55  ;;  %v7101_v55 = vld [vmem:[#allocation8 + $0x328] ss:$16 sps:$4 sm:$0xff]  }
 0x301   :  { %5333 = vmatprep.subr.bf16.mxu1 %v7040_v61 }
 0x302   :  { %5381 = vmatpush1.bf16.msra.mxu0 %v7041_v24 }
 0x303   :  { %5382 = vmatprep.subr.bf16.mxu0 %v7049_v53  ;;  %v7106_v53 = vld [vmem:[#allocation8 + $0x30c] ss:$16 sps:$4 sm:$0xff]  }
 0x304   :  { %5334 = vmatpush1.bf16.msra.mxu1 %v7038_v28 }
 0x305   :  { %5335 = vmatprep.subr.bf16.mxu1 %v7046_v31 }
 0x306   :  { %5383 = vmatpush1.bf16.msra.mxu0 %v7047_v34 }
 0x307   :  { %5384 = vmatprep.subr.bf16.mxu0 %v7055_v8 }
 0x308   :  { %5336 = vmatpush1.bf16.msra.mxu1 %v7044_v7 }
 0x309   :  { %5337 = vmatprep.subr.bf16.mxu1 %v7052_v9  ;;  %v7104_v9 = vld [vmem:[#allocation8 + $0x308] ss:$16 sps:$4 sm:$0xff]  }
 0x30a   :  { %5385 = vmatpush2.bf16.msra.mxu0 %v7053_v5  ;;  %v7166_v5 = vld [vmem:[#allocation11 + $0x44] ss:$8 sps:$4 sm:$0xff]  }
 0x30b   :  { %5386 = vmatprep.subr.bf16.mxu0 %v7061_v16  ;;  %v7109_v16 = vld [vmem:[#allocation8 + $0x6ec] ss:$16 sps:$4 sm:$0xff]  }
 0x30c   :  { %5338 = vmatpush1.bf16.msra.mxu1 %v7050_v10 }
 0x30d   :  { %5339 = vmatprep.subr.bf16.mxu1 %v7058_v11  ;;  %v7164_v11 = vld [vmem:[#allocation11 + $0x40] ss:$8 sps:$4 sm:$0xff]  }
 0x30e   :  { %5387 = vmatpush2.bf16.msra.mxu0 %v7059_v12  ;;  %v7107_v12 = vld [vmem:[#allocation8 + $0x6e8] ss:$16 sps:$4 sm:$0xff]  }
 0x30f   :  { %5388 = vmatprep.subr.bf16.mxu0 %v7067_v14  ;;  %v7169_v14 = vld [vmem:[#allocation11 + $0x34] ss:$8 sps:$4 sm:$0xff]  }
 0x310   :  { %5340 = vmatpush1.bf16.msra.mxu1 %v7056_v13  ;;  %v7112_v13 = vld [vmem:[#allocation8 + $0x6cc] ss:$16 sps:$4 sm:$0xff]  }
 0x311   :  { %5341 = vmatprep.subr.bf16.mxu1 %v7064_v58  ;;  %v7167_v58 = vld [vmem:[#allocation11 + $0x30] ss:$8 sps:$4 sm:$0xff]  }
 0x312   :  { %5389 = vmatpush2.bf16.msra.mxu0 %v7065_v17  ;;  %v7110_v17 = vld [vmem:[#allocation8 + $0x6c8] ss:$16 sps:$4 sm:$0xff]  }
 0x313   :  { %5390 = vmatprep.subr.bf16.mxu0 %v7073_v22  ;;  %v7115_v22 = vld [vmem:[#allocation8 + $0x6ac] ss:$16 sps:$4 sm:$0xff]  }
 0x314   :  { %5342 = vmatpush1.bf16.msra.mxu1 %v7062_v62  ;;  %v7172_v62 = vld [vmem:[#allocation11 + $0x24] ss:$8 sps:$4 sm:$0xff]  }
 0x315   :  { %5343 = vmatprep.subr.bf16.mxu1 %v7070_v25  ;;  %v7170_v25 = vld [vmem:[#allocation11 + $0x20] ss:$8 sps:$4 sm:$0xff]  }
 0x316   :  { %5391 = vmatpush2.bf16.msra.mxu0 %v7071_v19  ;;  %v7113_v19 = vld [vmem:[#allocation8 + $0x6a8] ss:$16 sps:$4 sm:$0xff]  }
 0x317   :  { %5392 = vmatprep.subr.bf16.mxu0 %v7079_v26  ;;  %v7118_v26 = vld [vmem:[#allocation8 + $0x68c] ss:$16 sps:$4 sm:$0xff]  }
 0x318   :  { %5344 = vmatpush2.bf16.msra.mxu1 %v7068_v23  ;;  %v7175_v23 = vld [vmem:[#allocation11 + $0x14] ss:$8 sps:$4 sm:$0xff]  }
 0x319   :  { %5345 = vmatprep.subr.bf16.mxu1 %v7076_v27  ;;  %v7116_v27 = vld [vmem:[#allocation8 + $0x688] ss:$16 sps:$4 sm:$0xff]  }
 0x31a   :  { %5393 = vmatpush2.bf16.msra.mxu0 %v7077_v30  ;;  %v7178_v30 = vld [vmem:[#allocation11 + $0x4] ss:$8 sps:$4 sm:$0xff]  }
 0x31b   :  { %5394 = vmatprep.subr.bf16.mxu0 %v7085_v3  ;;  %v7119_v3 = vld [vmem:[#allocation8 + $0x668] ss:$16 sps:$4 sm:$0xff]  }
 0x31c   :  { %5346 = vmatpush2.bf16.msra.mxu1 %v7074_v18  ;;  %v7176_v18 = vld [vmem:[#allocation11] ss:$8 sps:$4 sm:$0xff]  }
 0x31d   :  { %5347 = vmatprep.subr.bf16.mxu1 %v7082_v20  ;;  %v7181_v20 = vld [vmem:[#allocation11 + $0xf4] ss:$8 sps:$4 sm:$0xff]  }
 0x31e   :  { %5395 = vmatpush2.bf16.msra.mxu0 %v7083_v60  ;;  %v7124_v60 = vld [vmem:[#allocation8 + $0x64c] ss:$16 sps:$4 sm:$0xff]  }
 0x31f   :  { %5396 = vmatprep.subr.bf16.mxu0 %v7091_v1  ;;  %v7122_v1 = vld [vmem:[#allocation8 + $0x648] ss:$16 sps:$4 sm:$0xff]  }
 0x320   :  { %5348 = vmatpush2.bf16.msra.mxu1 %v7080_v48  ;;  %v7179_v48 = vld [vmem:[#allocation11 + $0xf0] ss:$8 sps:$4 sm:$0xff]  }
 0x321   :  { %5349 = vmatprep.subr.bf16.mxu1 %v7088_v50  ;;  %v7184_v50 = vld [vmem:[#allocation11 + $0xe4] ss:$8 sps:$4 sm:$0xff]  }
 0x322   :  { %5397 = vmatpush2.bf16.msra.mxu0 %v7089_v29  ;;  %v7127_v29 = vld [vmem:[#allocation8 + $0x62c] ss:$16 sps:$4 sm:$0xff]  }
 0x323   :  { %5398 = vmatprep.subr.bf16.mxu0 %v7097_v37  ;;  %v7125_v37 = vld [vmem:[#allocation8 + $0x628] ss:$16 sps:$4 sm:$0xff]  }
 0x324   :  { %5350 = vmatpush2.bf16.msra.mxu1 %v7086_v33  ;;  %v7182_v33 = vld [vmem:[#allocation11 + $0xe0] ss:$8 sps:$4 sm:$0xff]  }
 0x325   :  { %5351 = vmatprep.subr.bf16.mxu1 %v7094_v38  ;;  %v7187_v38 = vld [vmem:[#allocation11 + $0xd4] ss:$8 sps:$4 sm:$0xff]  }
 0x326   :  { %5399 = vmatpush2.bf16.msra.mxu0 %v7095_v41  ;;  %v7130_v41 = vld [vmem:[#allocation8 + $0x60c] ss:$16 sps:$4 sm:$0xff]  }
 0x327   :  { %5854 = vmatprep.subr.bf16.mxu0 %v7157_v2  ;;  %v7128_v2 = vld [vmem:[#allocation8 + $0x608] ss:$16 sps:$4 sm:$0xff]  }
 0x328   :  { %5352 = vmatpush2.bf16.msra.mxu1 %v7092_v35  ;;  %v7185_v35 = vld [vmem:[#allocation11 + $0xd0] ss:$8 sps:$4 sm:$0xff]  }
 0x329   :  { %5353 = vmatprep.subr.bf16.mxu1 %v7100_v40  ;;  %v5156_v47 = vpop.f32.mrf.mxu0  ;;  %5401 = vmatmul.mubr.bf16.vlgmr.msra.gmra.mxu0 %v7676_v32  ;;  %v7161_v32 = vld [vmem:[#allocation11 + $0x50] ss:$8 sps:$4 sm:$0xff]   ;;  %v7190_v40 = vld [vmem:[#allocation11 + $0xc4] ss:$8 sps:$4 sm:$0xff]  }
 0x32a   :  { %v5157_v59 = vadd.f32 %v5156_v47, %v3825_v42  ;;  %5855 = vmatpush1.bf16.msra.mxu0 %v7155_v4  ;;  %v7133_v42 = vld [vmem:[#allocation8 + $0x7ec] ss:$16 sps:$4 sm:$0xff]   ;;  %v7134_v47 = vld [vmem:[#allocation8 + $0x7c8] ss:$16 sps:$4 sm:$0xff]  }
 0x32b   :  { %v5197_v49 = vpop.f32.mrf.mxu1  ;;  %v5158_v52 = vpop.f32.mrf.mxu0  ;;  %5856 = vmatprep.subr.bf16.mxu0 %v7160_v36  ;;  %v7188_v4 = vld [vmem:[#allocation11 + $0xc0] ss:$8 sps:$4 sm:$0xff]   ;;  %v7193_v36 = vld [vmem:[#allocation11 + $0xb4] ss:$8 sps:$4 sm:$0xff]  }
 0x32c   :  { %5354 = vmatpush2.bf16.msra.mxu1 %v7098_v43  ;;  %v7706_v61 = vadd.f32 %v5197_v49, %v5157_v59  ;;  %v5159_v24 = vadd.f32 %v5158_v52, %v3829_v21  ;;  %v7131_v43 = vld [vmem:[#allocation8 + $0x7e8] ss:$16 sps:$4 sm:$0xff]   ;;  %v7136_v21 = vld [vmem:[#allocation8 + $0x7cc] ss:$16 sps:$4 sm:$0xff]  }
 0x32d   :  { %v5199_v28 = vpop.f32.mrf.mxu1  ;;  %5355 = vmatprep.subr.bf16.mxu1 %v7103_v46  ;;  %v5160_v31 = vpop.f32.mrf.mxu0  ;;  %v7191_v46 = vld [vmem:[#allocation11 + $0xb0] ss:$8 sps:$4 sm:$0xff]   ;;  %v7196_v59 = vld [vmem:[#allocation11 + $0xa4] ss:$8 sps:$4 sm:$0xff]  }
 0x32e   :  { %v7708_v34 = vadd.f32 %v5199_v28, %v5159_v24  ;;  %5857 = vmatpush1.bf16.msra.mxu0 %v7158_v15  ;;  %v7139_v49 = vld [vmem:[#allocation8 + $0x7ac] ss:$16 sps:$4 sm:$0xff]   ;;  %v7137_v52 = vld [vmem:[#allocation8 + $0x7a8] ss:$16 sps:$4 sm:$0xff]  }
 0x32f   :  { %v5201_v7 = vpop.f32.mrf.mxu1  ;;  %v5161_v8 = vpop.f32.mrf.mxu0  ;;  %5858 = vmatprep.subr.bf16.mxu0 %v7163_v56  ;;  %v7194_v15 = vld [vmem:[#allocation11 + $0xa0] ss:$8 sps:$4 sm:$0xff]   ;;  %v7197_v24 = vld [vmem:[#allocation11 + $0x90] ss:$8 sps:$4 sm:$0xff]   ;;  %v7140_v28 = vld [vmem:[#allocation8 + $0x788] ss:$16 sps:$4 sm:$0xff]  }
 0x330   :  { %5356 = vmatpush2.bf16.msra.mxu1 %v7101_v55  ;;  %v7199_v55 = vld [vmem:[#allocation11 + $0x94] ss:$8 sps:$4 sm:$0xff]   ;;  %v7142_v56 = vld [vmem:[#allocation8 + $0x78c] ss:$16 sps:$4 sm:$0xff]  }
 0x331   :  { %v5202_v10 = vpop.f32.mrf.mxu1  ;;  %5357 = vmatprep.subr.bf16.mxu1 %v7106_v53  ;;  %v7202_v53 = vld [vmem:[#allocation11 + $0x84] ss:$8 sps:$4 sm:$0xff]   ;;  %v7145_v31 = vld [vmem:[#allocation8 + $0x76c] ss:$16 sps:$4 sm:$0xff]  }
 0x332   :  { %5859 = vmatpush1.bf16.msra.mxu0 %v7161_v32  ;;  %v7200_v7 = vld [vmem:[#allocation11 + $0x80] ss:$8 sps:$4 sm:$0xff]   ;;  %v7143_v32 = vld [vmem:[#allocation8 + $0x768] ss:$16 sps:$4 sm:$0xff]  }
 0x333   :  { %5860 = vmatprep.subr.bf16.mxu0 %v7166_v5  ;;  %v7148_v8 = vld [vmem:[#allocation8 + $0x74c] ss:$16 sps:$4 sm:$0xff]  }
 0x334   :  { %5358 = vmatpush2.bf16.msra.mxu1 %v7104_v9  ;;  %v7146_v9 = vld [vmem:[#allocation8 + $0x748] ss:$16 sps:$4 sm:$0xff]   ;;  %v7151_v5 = vld [vmem:[#allocation8 + $0x72c] ss:$16 sps:$4 sm:$0xff]  }
 0x335   :  { %5409 = vmatprep.subr.bf16.mxu1 %v7109_v16 }
 0x336   :  { %5861 = vmatpush1.bf16.msra.mxu0 %v7164_v11 }
 0x337   :  { %5360 = vmatmul.mubr.bf16.vlgmr.msra.gmra.mxu1 %v7658_v63  ;;  %5862 = vmatprep.subr.bf16.mxu0 %v7169_v14  ;;  %v7173_v63 = vld [vmem:[#allocation11 + $0x10] ss:$8 sps:$4 sm:$0xff]  }
 0x338   :  { %5410 = vmatpush1.bf16.msra.mxu1 %v7107_v12  ;;  %5441 = vmatprep.mubr.bf16.mxu1 %v7692_v44  ;;  %v7121_v44 = vld [vmem:[#allocation8 + $0x66c] ss:$16 sps:$4 sm:$0xff]   ;;  %v7149_v12 = vld [vmem:[#allocation8 + $0x728] ss:$16 sps:$4 sm:$0xff]  }
 0x339   :  { %5411 = vmatprep.subr.bf16.mxu1 %v7112_v13  ;;  %v7154_v14 = vld [vmem:[#allocation8 + $0x70c] ss:$16 sps:$4 sm:$0xff]  }
 0x33a   :  { %5863 = vmatpush1.bf16.msra.mxu0 %v7167_v58 }
 0x33b   :  { %5864 = vmatprep.subr.bf16.mxu0 %v7172_v62  ;;  %v7152_v62 = vld [vmem:[#allocation8 + $0x708] ss:$16 sps:$4 sm:$0xff]  }
 0x33c   :  { %5412 = vmatpush1.bf16.msra.mxu1 %v7110_v17 }
 0x33d   :  { %5413 = vmatprep.subr.bf16.mxu1 %v7115_v22  ;;  %v7203_v22 = vld [vmem:[#allocation11 + $0x170] ss:$8 sps:$4 sm:$0xff]  }
 0x33e   :  { %5865 = vmatpush1.bf16.msra.mxu0 %v7170_v25  ;;  %v7205_v25 = vld [vmem:[#allocation11 + $0x174] ss:$8 sps:$4 sm:$0xff]  }
 0x33f   :  { %5866 = vmatprep.subr.bf16.mxu0 %v7175_v23  ;;  %v7211_v23 = vld [vmem:[#allocation11 + $0x154] ss:$8 sps:$4 sm:$0xff]  }
 0x340   :  { %5414 = vmatpush1.bf16.msra.mxu1 %v7113_v19  ;;  %v7206_v19 = vld [vmem:[#allocation11 + $0x160] ss:$8 sps:$4 sm:$0xff]  }
 0x341   :  { %5415 = vmatprep.subr.bf16.mxu1 %v7118_v26  ;;  %v7214_v26 = vld [vmem:[#allocation11 + $0x144] ss:$8 sps:$4 sm:$0xff]  }
 0x342   :  { %5867 = vmatpush1.bf16.msra.mxu0 %v7173_v63  ;;  %v7212_v63 = vld [vmem:[#allocation11 + $0x140] ss:$8 sps:$4 sm:$0xff]  }
 0x343   :  { %5868 = vmatprep.subr.bf16.mxu0 %v7178_v30  ;;  %v7215_v30 = vld [vmem:[#allocation11 + $0x130] ss:$8 sps:$4 sm:$0xff]  }
 0x344   :  { %5416 = vmatpush1.bf16.msra.mxu1 %v7116_v27  ;;  %v7217_v27 = vld [vmem:[#allocation11 + $0x134] ss:$8 sps:$4 sm:$0xff]  }
 0x345   :  { %5417 = vmatprep.subr.bf16.mxu1 %v7121_v44  ;;  %v7218_v44 = vld [vmem:[#allocation11 + $0x120] ss:$8 sps:$4 sm:$0xff]  }
 0x346   :  { %5869 = vmatpush1.bf16.msra.mxu0 %v7176_v18  ;;  %v7223_v18 = vld [vmem:[#allocation11 + $0x114] ss:$8 sps:$4 sm:$0xff]  }
 0x347   :  { %5870 = vmatprep.subr.bf16.mxu0 %v7181_v20  ;;  %v7226_v20 = vld [vmem:[#allocation11 + $0x104] ss:$8 sps:$4 sm:$0xff]  }
 0x348   :  { %5418 = vmatpush1.bf16.msra.mxu1 %v7119_v3  ;;  %v7221_v3 = vld [vmem:[#allocation11 + $0x110] ss:$8 sps:$4 sm:$0xff]  }
 0x349   :  { %5419 = vmatprep.subr.bf16.mxu1 %v7124_v60  ;;  %v7224_v60 = vld [vmem:[#allocation11 + $0x100] ss:$8 sps:$4 sm:$0xff]  }
 0x34a   :  { %5871 = vmatpush2.bf16.msra.mxu0 %v7179_v48  ;;  %v7229_v48 = vld [vmem:[#allocation11 + $0x1f4] ss:$8 sps:$4 sm:$0xff]  }
 0x34b   :  { %5872 = vmatprep.subr.bf16.mxu0 %v7184_v50  ;;  %v7232_v50 = vld [vmem:[#allocation11 + $0x1e4] ss:$8 sps:$4 sm:$0xff]  }
 0x34c   :  { %5420 = vmatpush1.bf16.msra.mxu1 %v7122_v1  ;;  %v7227_v1 = vld [vmem:[#allocation11 + $0x1f0] ss:$8 sps:$4 sm:$0xff]  }
 0x34d   :  { %5421 = vmatprep.subr.bf16.mxu1 %v7127_v29  ;;  %v7230_v29 = vld [vmem:[#allocation11 + $0x1e0] ss:$8 sps:$4 sm:$0xff]  }
 0x34e   :  { %5873 = vmatpush2.bf16.msra.mxu0 %v7182_v33  ;;  %v7235_v33 = vld [vmem:[#allocation11 + $0x1d4] ss:$8 sps:$4 sm:$0xff]  }
 0x34f   :  { %5874 = vmatprep.subr.bf16.mxu0 %v7187_v38  ;;  %v7238_v38 = vld [vmem:[#allocation11 + $0x1c4] ss:$8 sps:$4 sm:$0xff]  }
 0x350   :  { %5422 = vmatpush1.bf16.msra.mxu1 %v7125_v37  ;;  %v7233_v37 = vld [vmem:[#allocation11 + $0x1d0] ss:$8 sps:$4 sm:$0xff]  }
 0x351   :  { %5423 = vmatprep.subr.bf16.mxu1 %v7130_v41  ;;  %v7236_v41 = vld [vmem:[#allocation11 + $0x1c0] ss:$8 sps:$4 sm:$0xff]  }
 0x352   :  { %5875 = vmatpush2.bf16.msra.mxu0 %v7185_v35  ;;  %v7241_v35 = vld [vmem:[#allocation11 + $0x1b4] ss:$8 sps:$4 sm:$0xff]  }
 0x353   :  { %5876 = vmatprep.subr.bf16.mxu0 %v7190_v40 }
 0x354   :  { %5424 = vmatpush1.bf16.msra.mxu1 %v7128_v2 }
 0x355   :  { %5425 = vmatprep.subr.bf16.mxu1 %v7133_v42  ;;  %v7239_v42 = vld [vmem:[#allocation11 + $0x1b0] ss:$8 sps:$4 sm:$0xff]  }
 0x356   :  { %5877 = vmatpush2.bf16.msra.mxu0 %v7188_v4  ;;  %v7244_v4 = vld [vmem:[#allocation11 + $0x1a4] ss:$8 sps:$4 sm:$0xff]  }
 0x357   :  { %5878 = vmatprep.subr.bf16.mxu0 %v7193_v36 }
 0x358   :  { %5426 = vmatpush2.bf16.msra.mxu1 %v7131_v43 }
 0x359   :  { %5427 = vmatprep.subr.bf16.mxu1 %v7136_v21  ;;  %v7242_v21 = vld [vmem:[#allocation11 + $0x1a0] ss:$8 sps:$4 sm:$0xff]  }
 0x35a   :  { %5879 = vmatpush2.bf16.msra.mxu0 %v7191_v46 }
 0x35b   :  { %5880 = vmatprep.subr.bf16.mxu0 %v7196_v59 }
 0x35c   :  { %5428 = vmatpush2.bf16.msra.mxu1 %v7134_v47  ;;  %v7247_v47 = vld [vmem:[#allocation11 + $0x194] ss:$8 sps:$4 sm:$0xff]  }
 0x35d   :  { %5429 = vmatprep.subr.bf16.mxu1 %v7139_v49  ;;  %v7245_v49 = vld [vmem:[#allocation11 + $0x190] ss:$8 sps:$4 sm:$0xff]  }
 0x35e   :  { %5881 = vmatpush2.bf16.msra.mxu0 %v7194_v15 }
 0x35f   :  { %5882 = vmatprep.subr.bf16.mxu0 %v7199_v55 }
 0x360   :  { %5430 = vmatpush2.bf16.msra.mxu1 %v7137_v52 }
 0x361   :  { %5431 = vmatprep.subr.bf16.mxu1 %v7142_v56 }
 0x362   :  { %5883 = vmatpush2.bf16.msra.mxu0 %v7197_v24  ;;  %v7250_v24 = vld [vmem:[#allocation11 + $0x184] ss:$8 sps:$4 sm:$0xff]  }
 0x363   :  { %5884 = vmatprep.subr.bf16.mxu0 %v7202_v53  ;;  %v7248_v53 = vld [vmem:[#allocation11 + $0x180] ss:$8 sps:$4 sm:$0xff]  }
 0x364   :  { %5432 = vmatpush2.bf16.msra.mxu1 %v7140_v28 }
 0x365   :  { %5433 = vmatprep.subr.bf16.mxu1 %v7145_v31 }
 0x366   :  { %5885 = vmatpush2.bf16.msra.mxu0 %v7200_v7 }
 0x368   :  { %5434 = vmatpush2.bf16.msra.mxu1 %v7143_v32 }
 0x369   :  { %5435 = vmatprep.subr.bf16.mxu1 %v7148_v8  ;;  %v5238_v10 = vpop.f32.mrf.mxu0 }
 0x36a   :  { %v7713_v16 = vadd.f32 %v5238_v10, %v7706_v61  ;;  %v7208_v61 = vld [vmem:[#allocation11 + $0x164] ss:$8 sps:$4 sm:$0xff]  }
 0x36b   :  { %v5240_v11 = vpop.f32.mrf.mxu0 }
 0x36c   :  { %5436 = vmatpush2.bf16.msra.mxu1 %v7146_v9  ;;  %v7716_v13 = vadd.f32 %v5240_v11, %v7708_v34  ;;  %v7209_v34 = vld [vmem:[#allocation11 + $0x150] ss:$8 sps:$4 sm:$0xff]   ;;  %v3837_v11 = vrot.slane %v7699_v39, %v601_v57 }
 0x36d   :  { %5437 = vmatprep.subr.bf16.mxu1 %v7151_v5  ;;  %v5242_v58 = vpop.f32.mrf.mxu0 }
 0x36f   :  { %v5243_v17 = vpop.f32.mrf.mxu0 }
 0x370   :  { %5438 = vmatpush2.bf16.msra.mxu1 %v7149_v12 }
 0x371   :  { %5439 = vmatprep.subr.bf16.mxu1 %v7154_v14 }
 0x374   :  { %5440 = vmatpush2.bf16.msra.mxu1 %v7152_v62 }
 0x375   :  { %5895 = vmatprep.subr.bf16.mxu1 %v7205_v25 }
 0x377   :  { %5442 = vmatmul.mubr.bf16.vlgmr.msra.gmra.mxu1 %v7694_v45  ;;  %v7220_v45 = vld [vmem:[#allocation11 + $0x124] ss:$8 sps:$4 sm:$0xff]  }
 0x378   :  { %5896 = vmatpush1.bf16.msra.mxu1 %v7203_v22 }
 0x379   :  { %5897 = vmatprep.subr.bf16.mxu1 %v7208_v61 }
 0x37c   :  { %5898 = vmatpush1.bf16.msra.mxu1 %v7206_v19 }
 0x37d   :  { %5899 = vmatprep.subr.bf16.mxu1 %v7211_v23 }
 0x380   :  { %5900 = vmatpush1.bf16.msra.mxu1 %v7209_v34 }
 0x381   :  { %5901 = vmatprep.subr.bf16.mxu1 %v7214_v26 }
 0x384   :  { %5902 = vmatpush1.bf16.msra.mxu1 %v7212_v63 }
 0x385   :  { %5903 = vmatprep.subr.bf16.mxu1 %v7217_v27 }
 0x388   :  { %5904 = vmatpush1.bf16.msra.mxu1 %v7215_v30 }
 0x389   :  { %5905 = vmatprep.subr.bf16.mxu1 %v7220_v45 }
 0x38c   :  { %5906 = vmatpush1.bf16.msra.mxu1 %v7218_v44 }
 0x38d   :  { %5907 = vmatprep.subr.bf16.mxu1 %v7223_v18 }
 0x390   :  { %5908 = vmatpush1.bf16.msra.mxu1 %v7221_v3 }
 0x391   :  { %5909 = vmatprep.subr.bf16.mxu1 %v7226_v20  ;;  %v5522_v20 = vld [vmem:[#allocation13] sm:$0x3] }
 0x394   :  { %5910 = vmatpush1.bf16.msra.mxu1 %v7224_v60  ;;  %v5527_v60 = vrot.slane %v5522_v20, %v7569_v0 }
 0x395   :  { %5911 = vmatprep.subr.bf16.mxu1 %v7229_v48  ;;  %v5531_v48 = vrot.slane %v5522_v20, %v7574_v6 }
 0x398   :  { %5912 = vmatpush2.bf16.msra.mxu1 %v7227_v1 }
 0x399   :  { %5913 = vmatprep.subr.bf16.mxu1 %v7232_v50 }
 0x39c   :  { %5914 = vmatpush2.bf16.msra.mxu1 %v7230_v29  ;;  %v5938_v29 = vld [vmem:[#allocation14] sm:$0x3] }
 0x39d   :  { %5915 = vmatprep.subr.bf16.mxu1 %v7235_v33 }
 0x3a0   :  { %5916 = vmatpush2.bf16.msra.mxu1 %v7233_v37 }
 0x3a1   :  { %5917 = vmatprep.subr.bf16.mxu1 %v7238_v38 }
 0x3a4   :  { %5918 = vmatpush2.bf16.msra.mxu1 %v7236_v41 }
 0x3a5   :  { %5919 = vmatprep.subr.bf16.mxu1 %v7241_v35 }
 0x3a8   :  { %5920 = vmatpush2.bf16.msra.mxu1 %v7239_v42 }
 0x3a9   :  { %v5320_v2 = vpop.f32.mrf.mxu0  ;;  %5921 = vmatprep.subr.bf16.mxu1 %v7244_v4 }
 0x3ab   :  { %v5322_v40 = vpop.f32.mrf.mxu0 }
 0x3ac   :  { %5922 = vmatpush2.bf16.msra.mxu1 %v7242_v21  ;;  %v5323_v14 = vadd.f32 %v5322_v40, %v3837_v11  ;;  %v5947_v40 = vrot.slane %v5938_v29, %v7574_v6 }
 0x3ad   :  { %v5324_v43 = vpop.f32.mrf.mxu0  ;;  %5923 = vmatprep.subr.bf16.mxu1 %v7247_v47  ;;  %v5956_v47 = vstv %s7745_s8 }
 0x3af   :  { %v5325_v36 = vpop.f32.mrf.mxu0 }
 0x3b0   :  { %5924 = vmatpush2.bf16.msra.mxu1 %v7245_v49 }
 0x3b1   :  { %5925 = vmatprep.subr.bf16.mxu1 %v7250_v24 }
 0x3b4   :  { %5926 = vmatpush2.bf16.msra.mxu1 %v7248_v53 }
 0x3b7   :  { %v5279_v46 = vpop.f32.mrf.mxu1 }
 0x3b8   :  { %v5280_v59 = vadd.f32 %v5279_v46, %v7713_v16  ;;  %v3833_v16 = vrot.slane %v7699_v39, %v597_v54 }
 0x3b9   :  { %v5281_v15 = vpop.f32.mrf.mxu1 }
 0x3ba   :  { %v5282_v52 = vadd.f32 %v5281_v15, %v7716_v13  ;;  %v5450_v55 = vmax.f32 %v5280_v59, 0.0  ;;  %v5321_v12 = vadd.f32 %v5320_v2, %v3833_v16  ;;  %v5943_v2 = vrot.slane %v5938_v29, %v7569_v0 }
 0x3bb   :  { %v5283_v56 = vpop.f32.mrf.mxu1 }
 0x3bc   :  { %v5451_v28 = vmax.f32 %v5282_v52, 0.0  ;;  %v5454_v32 = vpack.c.bf16 %v5450_v55, %v5450_v55 }
 0x3bd   :  { %v5284_v31 = vpop.f32.mrf.mxu1 }
 0x3be   :  { %v5455_v7 = vpack.c.bf16 %v5451_v28, %v5451_v28 }
 0x3c0   :  { %5886 = vmatprep.mubr.bf16.mxu0 %v5455_v7 }
 0x3c1   :  { %5887 = vmatmul.mubr.bf16.vlgmr.msra.gmra.mxu0 %v5454_v32 }
 0x3e9   :  { %v5402_v8 = vpop.f32.mrf.mxu0 }
 0x3eb   :  { %v5404_v9 = vpop.f32.mrf.mxu0 }
 0x3ed   :  { %v5406_v5 = vpop.f32.mrf.mxu0 }
 0x3ef   :  { %v5407_v10 = vpop.f32.mrf.mxu0 }
 0x3f7   :  { %v5361_v13 = vpop.f32.mrf.mxu1 }
 0x3f8   :  { %v5362_v58 = vadd.f32 %v5361_v13, %v5321_v12 }
 0x3f9   :  { %v5363_v17 = vpop.f32.mrf.mxu1 }
 0x3fa   :  { %v5364_v62 = vadd.f32 %v5363_v17, %v5323_v14  ;;  %v5403_v22 = vadd.f32 %v5402_v8, %v5362_v58 }
 0x3fb   :  { %v5365_v25 = vpop.f32.mrf.mxu1 }
 0x3fc   :  { %v5405_v61 = vadd.f32 %v5404_v9, %v5364_v62 }
 0x3fd   :  { %v5366_v19 = vpop.f32.mrf.mxu1 }
 0x437   :  { %v5443_v23 = vpop.f32.mrf.mxu1 }
 0x438   :  { %v5444_v34 = vadd.f32 %v5443_v23, %v5403_v22 }
 0x439   :  { %v5445_v26 = vpop.f32.mrf.mxu1 }
 0x43a   :  { %v5446_v63 = vadd.f32 %v5445_v26, %v5405_v61  ;;  %v5452_v27 = vmax.f32 %v5444_v34, 0.0 }
 0x43b   :  { %v5447_v54 = vpop.f32.mrf.mxu1 }
 0x43c   :  { %v5453_v30 = vmax.f32 %v5446_v63, 0.0  ;;  %v5456_v57 = vpack.c.bf16 %v5452_v27, %v5452_v27 }
 0x43d   :  { %v5448_v51 = vpop.f32.mrf.mxu1 }
 0x43e   :  { %v5457_v45 = vpack.c.bf16 %v5453_v30, %v5453_v30 }
 0x440   :  { %5927 = vmatprep.mubr.bf16.mxu1 %v5457_v45 }
 0x441   :  { %5928 = vmatmul.mubr.bf16.vlgmr.msra.gmra.mxu1 %v5456_v57 }
 0x481   :  { %v5888_v39 = vpop.f32.mrf.mxu0 }
 0x482   :  { %v5889_v1 = vadd.f32 %v5888_v39, %v5527_v60 }
 0x483   :  { %v5890_v44 = vpop.f32.mrf.mxu0 }
 0x484   :  { %v5891_v33 = vadd.f32 %v5890_v44, %v5531_v48 }
 0x485   :  { %v5892_v18 = vpop.f32.mrf.mxu0 }
 0x487   :  { %v5893_v3 = vpop.f32.mrf.mxu0 }
 0x501   :  { %v5929_v50 = vpop.f32.mrf.mxu1 }
 0x502   :  { %v5930_v37 = vadd.f32 %v5929_v50, %v5889_v1 }
 0x503   :  { %v5931_v38 = vpop.f32.mrf.mxu1 }
 0x504   :  { %v5936_v41 = vmax.f32 %v5930_v37, 0.0  ;;  %v5932_v35 = vadd.f32 %v5931_v38, %v5891_v33 }
 0x505   :  { %v5933_v42 = vpop.f32.mrf.mxu1 }
 0x506   :  { %v5937_v4 = vmax.f32 %v5932_v35, 0.0  ;;  %v5950_v36 = vmul.f32 %v5943_v2, %v5936_v41 }
 0x507   :  { %v5934_v43 = vpop.f32.mrf.mxu1 }
 0x508   :  { %v5951_v21 = vmul.f32 %v5947_v40, %v5937_v4 }
 0x50a   :  { %v5952_v46 = vadd.f32 %v5951_v21, %v5950_v36 }
 0x50c   :  { %5953 = vadd.xlane.f32.xlu0 %v5952_v46 }
 0x595   :  { %v5954_v59 = vpop.xlane.xlu0 %5953 }
 0x596   :  { %v5957_v49 = vadd.f32 %v5956_v47, %v5954_v59 }
 0x598   :  { %v5958_v15 = vsub.f32 0.0, %v5957_v49 }
 0x59a   :  { %v5959_v52 = vmul.f32 1.442695, %v5958_v15 }
 0x59c   :  { %7251 = vpow2.f32 %v5959_v52 }
 0x5a9   :  { %v7252_v55 = vpop.eup %7251 }
 0x5aa   :  { %v5961_v0 = vadd.f32 1.0, %v7252_v55 }
 0x5ac   :  { %7253 = vrcp.f32 %v5961_v0 }
 0x5b9   :  { %v7254_v6 = vpop.eup %7253 }
 0x5ba   :  { %5964 = vst.msk [vmem:[%s7746_s9] sm:$0xff] %vm5963_vm0, %v7254_v6 }
 0x5bb   :  { %5969 = vsyncpa [#allocation4], 1 }
 0x5bc   :  { %5970 = vsyncpa [#allocation6], 1 }
 0x5bd   :  { %5971 = vsyncpa [#allocation9], 1 }
 0x5be   :  { %5972 = vsyncpa [#allocation12], 1 }
 0x5bf   :  { %5973 = vsyncpa [#allocation15], 1 }

</bundles_post_ra>
